<compile_context>
chip_gen: v5e
topology: v5e:2x2
jax: 0.10.0
libtpu: 0.0.40
codegen_flags: <defaults>
</compile_context>

<pallas_src>
import functools

import jax
import jax.numpy as jnp
from jax.experimental import pallas as pl
from jax.experimental.pallas import tpu as pltpu


# ----------------------------- Pallas kernels ------------------------------

def _spatial_kernel(xp_ref, wsp_ref, bsp_ref, w1_ref, b1_ref,
                    y12_ref, cx_ref, *, H, W, cin, dim):
    """Fused conv1.2d + conv2.2d (3x3, pad=1, ReLU) and 1x1 conv(x) for one t.

    xp_ref : (H+2, W+2, cin) bf16  -- zero-padded NHWC slab (cin = 2*dim)
    wsp_ref: (9, cin, 2*dim)       -- fused spatial weights (tap-major)
    y12_ref: (H*W, 2*dim) bf16     -- relu(conv1_2d) || relu(conv2_2d)
    cx_ref : (H*W, dim)  f32       -- 1x1 conv(x) (no ReLU), residual for later
    """
    nout = 2 * dim
    x = xp_ref[...].astype(jnp.float32)            # f32 for robust slicing/reshape
    acc = jnp.zeros((H * W, nout), jnp.float32)
    for k in range(9):                             # 9 taps, unrolled
        di, dj = divmod(k, 3)
        tap = x[di:di + H, dj:dj + W, :].reshape(H * W, cin)
        acc = acc + jnp.dot(tap, wsp_ref[k].astype(jnp.float32),
                            preferred_element_type=jnp.float32)
    y12_ref[...] = jnp.maximum(acc + bsp_ref[...], 0.0).astype(y12_ref.dtype)

    # centre tap, first `dim` channels == original x  ->  1x1 conv, no ReLU
    center = x[1:1 + H, 1:1 + W, :dim].reshape(H * W, dim)
    cx_ref[...] = (jnp.dot(center, w1_ref[...].astype(jnp.float32),
                           preferred_element_type=jnp.float32)
                   + b1_ref[...])


def _temporal_kernel(yp_ref, yc_ref, yn_ref, wt_ref, bt_ref, res_ref,
                     xo_ref, pe_ref, pe_acc, *, dim, inv_rows):
    """Fused conv1/conv2 temporal 1d conv (circular), residual add, mean epilogue.

    yp/yc/yn : (TILE_HW, 2*dim) bf16  -- y12 at times (t-1)%T, t, (t+1)%T
    wt_ref   : (3, 2*dim, 2*dim) bf16 -- block-diag(conv1_tap_k, conv2_tap_k)
    res_ref  : (TILE_HW, dim) f32     -- conv(x) residual
    xo_ref   : (TILE_HW, dim) f32     -- x_prompt rows
    pe_ref   : (1, dim) f32           -- prompt_embed (written on last step)
    pe_acc   : (1, dim) f32 VMEM scratch -- running column sums
    """
    t = pl.program_id(0)
    m = pl.program_id(1)

    acc = jnp.dot(yp_ref[...], wt_ref[0], preferred_element_type=jnp.float32)
    acc = acc + jnp.dot(yc_ref[...], wt_ref[1], preferred_element_type=jnp.float32)
    acc = acc + jnp.dot(yn_ref[...], wt_ref[2], preferred_element_type=jnp.float32)
    acc = acc + bt_ref[...]

    # x_prompt = conv1(x_p) + conv(x)
    xo_ref[...] = acc[:, :dim] + res_ref[...]

    @pl.when(jnp.logical_and(t == 0, m == 0))
    def _init():
        pe_acc[...] = jnp.zeros_like(pe_acc)

    pe_acc[...] += jnp.sum(acc[:, dim:], axis=0, keepdims=True)

    @pl.when(jnp.logical_and(t == pl.num_programs(0) - 1,
                             m == pl.num_programs(1) - 1))
    def _finalize():
        pe_ref[...] = pe_acc[...] * inv_rows


# ----------------------------- Pallas wrappers ------------------------------

_VMEM_LIMIT = 32 * 1024 * 1024  # safe on v5e/v6e/v7x scoped VMEM


def fused_spatial_conv(xp_pad, w_sp, b_sp, w1x1, b1x1, *, H, W, dim):
    """xp_pad: (T, H+2, W+2, 2*dim) bf16 -> (y12 (T,H*W,2*dim) bf16, conv_x (T,H*W,dim) f32)."""
    T = xp_pad.shape[0]
    cin = xp_pad.shape[-1]
    nout = 2 * dim
    kernel = functools.partial(_spatial_kernel, H=H, W=W, cin=cin, dim=dim)
    return pl.pallas_call(
        kernel,
        grid=(T,),
        in_specs=[
            pl.BlockSpec((None, H + 2, W + 2, cin), lambda t: (t, 0, 0, 0)),
            pl.BlockSpec((9, cin, nout), lambda t: (0, 0, 0)),
            pl.BlockSpec((1, nout), lambda t: (0, 0)),
            pl.BlockSpec((dim, dim), lambda t: (0, 0)),
            pl.BlockSpec((1, dim), lambda t: (0, 0)),
        ],
        out_specs=(
            pl.BlockSpec((None, H * W, nout), lambda t: (t, 0, 0)),
            pl.BlockSpec((None, H * W, dim), lambda t: (t, 0, 0)),
        ),
        out_shape=(
            jax.ShapeDtypeStruct((T, H * W, nout), jnp.bfloat16),
            jax.ShapeDtypeStruct((T, H * W, dim), jnp.float32),
        ),
        compiler_params=pltpu.CompilerParams(
            dimension_semantics=("parallel",),
            vmem_limit_bytes=_VMEM_LIMIT,
        ),
    )(xp_pad, w_sp, b_sp, w1x1, b1x1)


def _pick_tile(hw, target=512):
    """Largest HW tile <= target that divides HW and is a multiple of 8 (else full)."""
    if hw <= target:
        return hw
    for t in range(target, 7, -1):
        if hw % t == 0 and t % 8 == 0:
            return t
    return hw


def fused_temporal_conv(y12, w_t, b_t, res, *, dim, tile_hw):
    """y12: (T, HW, 2*dim) bf16; res: (T, HW, dim) f32 ->
    (x_prompt rows (T, HW, dim) f32, prompt_embed (1, dim) f32)."""
    T, HW, nout = y12.shape
    assert HW % tile_hw == 0
    n_m = HW // tile_hw
    kernel = functools.partial(_temporal_kernel, dim=dim,
                               inv_rows=1.0 / float(T * HW))

    def y_spec(shift):
        # circular temporal tap handled as pure index arithmetic (no roll/stack)
        return pl.BlockSpec((None, tile_hw, nout),
                            lambda t, m, s=shift: ((t + s) % T, m, 0))

    return pl.pallas_call(
        kernel,
        grid=(T, n_m),
        in_specs=[
            y_spec(T - 1),          # y12[(t-1) % T]
            y_spec(0),              # y12[t]
            y_spec(1),              # y12[(t+1) % T]
            pl.BlockSpec((3, nout, nout), lambda t, m: (0, 0, 0)),
            pl.BlockSpec((1, nout), lambda t, m: (0, 0)),
            pl.BlockSpec((None, tile_hw, dim), lambda t, m: (t, m, 0)),
        ],
        out_specs=(
            pl.BlockSpec((None, tile_hw, dim), lambda t, m: (t, m, 0)),
            pl.BlockSpec((1, dim), lambda t, m: (0, 0)),
        ),
        out_shape=(
            jax.ShapeDtypeStruct((T, HW, dim), jnp.float32),
            jax.ShapeDtypeStruct((1, dim), jnp.float32),
        ),
        scratch_shapes=[pltpu.VMEM((1, dim), jnp.float32)],
        compiler_params=pltpu.CompilerParams(
            # mean output is a grid-wide accumulator -> must run sequentially
            dimension_semantics=("arbitrary", "arbitrary"),
            vmem_limit_bytes=_VMEM_LIMIT,
        ),
    )(y12, y12, y12, w_t, b_t, res)


# ------------------------------- glue (JAX) ---------------------------------

def bilinear_resize_chw(img, out_h, out_w):
    """PyTorch F.interpolate(mode='bilinear', align_corners=False) on a CHW image."""
    C, h, w = img.shape

    def src_index(out_size, in_size):
        scale = in_size / out_size
        s = (jnp.arange(out_size, dtype=jnp.float32) + 0.5) * scale - 0.5
        s = jnp.maximum(s, 0.0)
        i0 = jnp.minimum(jnp.floor(s).astype(jnp.int32), in_size - 1)
        i1 = jnp.minimum(i0 + 1, in_size - 1)
        frac = s - i0.astype(jnp.float32)
        return i0, i1, frac

    y0, y1, fy = src_index(out_h, h)
    x0, x1, fx = src_index(out_w, w)
    row0 = img[:, y0, :]
    row1 = img[:, y1, :]
    top = row0[:, :, x0] * (1.0 - fx)[None, None, :] + row0[:, :, x1] * fx[None, None, :]
    bot = row1[:, :, x0] * (1.0 - fx)[None, None, :] + row1[:, :, x1] * fx[None, None, :]
    return top * (1.0 - fy)[None, :, None] + bot * fy[None, :, None]


def _prep_weights(params, dim):
    """Fuse conv1/conv2 weights for the two Pallas kernels."""
    cin = 2 * dim
    # spatial 3x3: (Cout, Cin, 3, 3) -> (9, Cin, Cout), taps row-major (di,dj)
    w1s = jnp.transpose(params['conv1']['w2d'], (2, 3, 1, 0)).reshape(9, cin, dim)
    w2s = jnp.transpose(params['conv2']['w2d'], (2, 3, 1, 0)).reshape(9, cin, dim)
    w_sp = jnp.concatenate([w1s, w2s], axis=-1).astype(jnp.bfloat16)        # (9, cin, 2*dim)
    b_sp = jnp.concatenate([params['conv1']['b2d'],
                            params['conv2']['b2d']]).reshape(1, 2 * dim).astype(jnp.float32)

    # temporal 1d: block-diagonal per tap so one matmul serves conv1 and conv2
    wt1 = params['conv1']['w1d']            # (out, in, 3)
    wt2 = params['conv2']['w1d']
    zeros = jnp.zeros((dim, dim), jnp.float32)
    taps = []
    for k in range(3):
        a = wt1[:, :, k].T                  # (in, out)
        b = wt2[:, :, k].T
        taps.append(jnp.block([[a, zeros], [zeros, b]]))
    w_t = jnp.stack(taps, axis=0).astype(jnp.bfloat16)                       # (3, 2*dim, 2*dim)
    b_t = jnp.concatenate([params['conv1']['b1d'],
                           params['conv2']['b1d']]).reshape(1, 2 * dim).astype(jnp.float32)

    # 1x1 conv(x)
    w1x1 = params['conv_w'].reshape(dim, dim).T.astype(jnp.bfloat16)
    b1x1 = params['conv_b'].reshape(1, dim).astype(jnp.float32)
    return w_sp, b_sp, w1x1, b1x1, w_t, b_t


def prompt_block_forward(x, params):
    """x: (B, dim, H, W) NCHW. Returns (x_prompt (B,dim,H,W), prompt_embed (1,dim))."""
    T, C, H, W = x.shape
    dim = C

    # prompt resize + channel concat, move to NHWC, zero-pad spatially, bf16
    prompt_resized = bilinear_resize_chw(params['prompt'][0], H, W)          # (dim, H, W)
    xp = jnp.concatenate(
        [x, jnp.broadcast_to(prompt_resized[None], (T, dim, H, W))], axis=1)  # (T, 2*dim, H, W)
    xp = jnp.transpose(xp, (0, 2, 3, 1))                                      # (T, H, W, 2*dim)
    xp = jnp.pad(xp, ((0, 0), (1, 1), (1, 1), (0, 0))).astype(jnp.bfloat16)

    w_sp, b_sp, w1x1, b1x1, w_t, b_t = _prep_weights(params, dim)

    # kernel 1: fused spatial 3x3 convs (+ReLU) and folded 1x1 conv(x)
    y12, conv_x = fused_spatial_conv(xp, w_sp, b_sp, w1x1, b1x1, H=H, W=W, dim=dim)

    # kernel 2: fused temporal convs + residual add + mean epilogue
    tile_hw = _pick_tile(H * W)
    x_rows, prompt_embed = fused_temporal_conv(y12, w_t, b_t, conv_x,
                                               dim=dim, tile_hw=tile_hw)

    x_prompt = x_rows.reshape(T, H, W, dim).transpose(0, 3, 1, 2)             # back to NCHW
    return x_prompt, prompt_embed


# ----------------------------- parameter init -------------------------------

def init_params(key, dim, prompt_size):
    ks = jax.random.split(key, 11)

    def nrm(k, shape, scale=0.1):
        return scale * jax.random.normal(k, shape, dtype=jnp.float32)

    return {
        'prompt': jax.random.normal(ks[0], (1, dim, prompt_size, prompt_size), dtype=jnp.float32),
        'conv1': {
            'w2d': nrm(ks[1], (dim, 2 * dim, 3, 3)), 'b2d': nrm(ks[2], (dim,)),
            'w1d': nrm(ks[3], (dim, dim, 3)),        'b1d': nrm(ks[4], (dim,)),
        },
        'conv2': {
            'w2d': nrm(ks[5], (dim, 2 * dim, 3, 3)), 'b2d': nrm(ks[6], (dim,)),
            'w1d': nrm(ks[7], (dim, dim, 3)),        'b1d': nrm(ks[8], (dim,)),
        },
        'conv_w': nrm(ks[9], (dim, dim, 1, 1)),
        'conv_b': nrm(ks[10], (dim,)),
    }


# ---------------------------------- main -------------------------------------

if __name__ == "__main__":
    dim, prompt_size = 4, 8
    B, H, W = 2, 16, 16

    key = jax.random.PRNGKey(0)
    kx, kp = jax.random.split(key)
    x = jax.random.normal(kx, (B, dim, H, W), dtype=jnp.float32)
    params = init_params(kp, dim, prompt_size)

    fwd = jax.jit(prompt_block_forward)
    x_prompt, prompt_embed = fwd(x, params)
    jax.block_until_ready((x_prompt, prompt_embed))

    assert x_prompt.shape == (B, dim, H, W)
    assert prompt_embed.shape == (1, dim)
    assert bool(jnp.all(jnp.isfinite(x_prompt))) and bool(jnp.all(jnp.isfinite(prompt_embed)))
    print("KERNEL_OK")
</pallas_src>

<mosaic_0001>
module attributes {stable_mosaic.version = 11 : i64} {
  func.func @_spatial_kernel(%arg0: i32, %arg1: memref<1x18x18x8xbf16, #tpu.memory_space<vmem>>, %arg2: memref<9x8x8xbf16, #tpu.memory_space<vmem>>, %arg3: memref<1x8xf32, #tpu.memory_space<vmem>>, %arg4: memref<4x4xbf16, #tpu.memory_space<vmem>>, %arg5: memref<1x4xf32, #tpu.memory_space<vmem>>, %arg6: memref<1x256x8xbf16, #tpu.memory_space<vmem>>, %arg7: memref<1x256x4xf32, #tpu.memory_space<vmem>>) attributes {dimension_semantics = [#tpu.dimension_semantics<parallel>], iteration_bounds = array<i64: 2>, scalar_prefetch = 0 : i64, scratch_operands = 0 : i64, tpu.core_type = #tpu.core_type<tc>, window_params = [{transform_indices = @transform_0, window_bounds = array<i64: 1, 18, 18, 8>}, {pipeline_mode = #tpu.pipeline_mode<synchronous>, transform_indices = @transform_1, window_bounds = array<i64: 9, 8, 8>}, {pipeline_mode = #tpu.pipeline_mode<synchronous>, transform_indices = @transform_2, window_bounds = array<i64: 1, 8>}, {pipeline_mode = #tpu.pipeline_mode<synchronous>, transform_indices = @transform_3, window_bounds = array<i64: 4, 4>}, {pipeline_mode = #tpu.pipeline_mode<synchronous>, transform_indices = @transform_4, window_bounds = array<i64: 1, 4>}, {transform_indices = @transform_5, window_bounds = array<i64: 1, 256, 8>}, {transform_indices = @transform_6, window_bounds = array<i64: 1, 256, 4>}]} {
    %c0 = arith.constant 0 : index
    %c0_0 = arith.constant 0 : index
    %c0_1 = arith.constant 0 : index
    %c0_2 = arith.constant 0 : index
    %0 = vector.load %arg1[%c0, %c0_0, %c0_1, %c0_2] : memref<1x18x18x8xbf16, #tpu.memory_space<vmem>>, vector<1x18x18x8xbf16>
    %1 = vector.shape_cast %0 : vector<1x18x18x8xbf16> to vector<18x18x8xbf16>
    %2 = arith.extf %1 : vector<18x18x8xbf16> to vector<18x18x8xf32>
    %cst = arith.constant 0.000000e+00 : f32
    %3 = vector.broadcast %cst : f32 to vector<256x8xf32>
    %4 = vector.extract_strided_slice %2 {offsets = [0, 0, 0], sizes = [16, 16, 8], strides = [1, 1, 1]} : vector<18x18x8xf32> to vector<16x16x8xf32>
    %5 = vector.shape_cast %4 : vector<16x16x8xf32> to vector<256x8xf32>
    %c0_3 = arith.constant 0 : index
    %c0_4 = arith.constant 0 : index
    %c0_5 = arith.constant 0 : index
    %6 = vector.load %arg2[%c0_3, %c0_4, %c0_5] : memref<9x8x8xbf16, #tpu.memory_space<vmem>>, vector<1x8x8xbf16>
    %7 = vector.shape_cast %6 : vector<1x8x8xbf16> to vector<8x8xbf16>
    %8 = arith.extf %7 : vector<8x8xbf16> to vector<8x8xf32>
    %cst_6 = arith.constant dense<0.000000e+00> : vector<256x8xf32>
    %9 = tpu.matmul %5, %8, %cst_6 {dimension_numbers = #tpu.dot_dimension_numbers<[1], [0], [0], [1], [0, 0, 1, 1], [], []>} : vector<256x8xf32>, vector<8x8xf32>, vector<256x8xf32> -> vector<256x8xf32>
    %10 = arith.addf %3, %9 : vector<256x8xf32>
    %11 = vector.extract_strided_slice %2 {offsets = [0, 1, 0], sizes = [16, 16, 8], strides = [1, 1, 1]} : vector<18x18x8xf32> to vector<16x16x8xf32>
    %12 = vector.shape_cast %11 : vector<16x16x8xf32> to vector<256x8xf32>
    %c1 = arith.constant 1 : index
    %c0_7 = arith.constant 0 : index
    %c0_8 = arith.constant 0 : index
    %13 = vector.load %arg2[%c1, %c0_7, %c0_8] : memref<9x8x8xbf16, #tpu.memory_space<vmem>>, vector<1x8x8xbf16>
    %14 = vector.shape_cast %13 : vector<1x8x8xbf16> to vector<8x8xbf16>
    %15 = arith.extf %14 : vector<8x8xbf16> to vector<8x8xf32>
    %cst_9 = arith.constant dense<0.000000e+00> : vector<256x8xf32>
    %16 = tpu.matmul %12, %15, %cst_9 {dimension_numbers = #tpu.dot_dimension_numbers<[1], [0], [0], [1], [0, 0, 1, 1], [], []>} : vector<256x8xf32>, vector<8x8xf32>, vector<256x8xf32> -> vector<256x8xf32>
    %17 = arith.addf %10, %16 : vector<256x8xf32>
    %18 = vector.extract_strided_slice %2 {offsets = [0, 2, 0], sizes = [16, 16, 8], strides = [1, 1, 1]} : vector<18x18x8xf32> to vector<16x16x8xf32>
    %19 = vector.shape_cast %18 : vector<16x16x8xf32> to vector<256x8xf32>
    %c2 = arith.constant 2 : index
    %c0_10 = arith.constant 0 : index
    %c0_11 = arith.constant 0 : index
    %20 = vector.load %arg2[%c2, %c0_10, %c0_11] : memref<9x8x8xbf16, #tpu.memory_space<vmem>>, vector<1x8x8xbf16>
    %21 = vector.shape_cast %20 : vector<1x8x8xbf16> to vector<8x8xbf16>
    %22 = arith.extf %21 : vector<8x8xbf16> to vector<8x8xf32>
    %cst_12 = arith.constant dense<0.000000e+00> : vector<256x8xf32>
    %23 = tpu.matmul %19, %22, %cst_12 {dimension_numbers = #tpu.dot_dimension_numbers<[1], [0], [0], [1], [0, 0, 1, 1], [], []>} : vector<256x8xf32>, vector<8x8xf32>, vector<256x8xf32> -> vector<256x8xf32>
    %24 = arith.addf %17, %23 : vector<256x8xf32>
    %25 = vector.extract_strided_slice %2 {offsets = [1, 0, 0], sizes = [16, 16, 8], strides = [1, 1, 1]} : vector<18x18x8xf32> to vector<16x16x8xf32>
    %26 = vector.shape_cast %25 : vector<16x16x8xf32> to vector<256x8xf32>
    %c3 = arith.constant 3 : index
    %c0_13 = arith.constant 0 : index
    %c0_14 = arith.constant 0 : index
    %27 = vector.load %arg2[%c3, %c0_13, %c0_14] : memref<9x8x8xbf16, #tpu.memory_space<vmem>>, vector<1x8x8xbf16>
    %28 = vector.shape_cast %27 : vector<1x8x8xbf16> to vector<8x8xbf16>
    %29 = arith.extf %28 : vector<8x8xbf16> to vector<8x8xf32>
    %cst_15 = arith.constant dense<0.000000e+00> : vector<256x8xf32>
    %30 = tpu.matmul %26, %29, %cst_15 {dimension_numbers = #tpu.dot_dimension_numbers<[1], [0], [0], [1], [0, 0, 1, 1], [], []>} : vector<256x8xf32>, vector<8x8xf32>, vector<256x8xf32> -> vector<256x8xf32>
    %31 = arith.addf %24, %30 : vector<256x8xf32>
    %32 = vector.extract_strided_slice %2 {offsets = [1, 1, 0], sizes = [16, 16, 8], strides = [1, 1, 1]} : vector<18x18x8xf32> to vector<16x16x8xf32>
    %33 = vector.shape_cast %32 : vector<16x16x8xf32> to vector<256x8xf32>
    %c4 = arith.constant 4 : index
    %c0_16 = arith.constant 0 : index
    %c0_17 = arith.constant 0 : index
    %34 = vector.load %arg2[%c4, %c0_16, %c0_17] : memref<9x8x8xbf16, #tpu.memory_space<vmem>>, vector<1x8x8xbf16>
    %35 = vector.shape_cast %34 : vector<1x8x8xbf16> to vector<8x8xbf16>
    %36 = arith.extf %35 : vector<8x8xbf16> to vector<8x8xf32>
    %cst_18 = arith.constant dense<0.000000e+00> : vector<256x8xf32>
    %37 = tpu.matmul %33, %36, %cst_18 {dimension_numbers = #tpu.dot_dimension_numbers<[1], [0], [0], [1], [0, 0, 1, 1], [], []>} : vector<256x8xf32>, vector<8x8xf32>, vector<256x8xf32> -> vector<256x8xf32>
    %38 = arith.addf %31, %37 : vector<256x8xf32>
    %39 = vector.extract_strided_slice %2 {offsets = [1, 2, 0], sizes = [16, 16, 8], strides = [1, 1, 1]} : vector<18x18x8xf32> to vector<16x16x8xf32>
    %40 = vector.shape_cast %39 : vector<16x16x8xf32> to vector<256x8xf32>
    %c5 = arith.constant 5 : index
    %c0_19 = arith.constant 0 : index
    %c0_20 = arith.constant 0 : index
    %41 = vector.load %arg2[%c5, %c0_19, %c0_20] : memref<9x8x8xbf16, #tpu.memory_space<vmem>>, vector<1x8x8xbf16>
    %42 = vector.shape_cast %41 : vector<1x8x8xbf16> to vector<8x8xbf16>
    %43 = arith.extf %42 : vector<8x8xbf16> to vector<8x8xf32>
    %cst_21 = arith.constant dense<0.000000e+00> : vector<256x8xf32>
    %44 = tpu.matmul %40, %43, %cst_21 {dimension_numbers = #tpu.dot_dimension_numbers<[1], [0], [0], [1], [0, 0, 1, 1], [], []>} : vector<256x8xf32>, vector<8x8xf32>, vector<256x8xf32> -> vector<256x8xf32>
    %45 = arith.addf %38, %44 : vector<256x8xf32>
    %46 = vector.extract_strided_slice %2 {offsets = [2, 0, 0], sizes = [16, 16, 8], strides = [1, 1, 1]} : vector<18x18x8xf32> to vector<16x16x8xf32>
    %47 = vector.shape_cast %46 : vector<16x16x8xf32> to vector<256x8xf32>
    %c6 = arith.constant 6 : index
    %c0_22 = arith.constant 0 : index
    %c0_23 = arith.constant 0 : index
    %48 = vector.load %arg2[%c6, %c0_22, %c0_23] : memref<9x8x8xbf16, #tpu.memory_space<vmem>>, vector<1x8x8xbf16>
    %49 = vector.shape_cast %48 : vector<1x8x8xbf16> to vector<8x8xbf16>
    %50 = arith.extf %49 : vector<8x8xbf16> to vector<8x8xf32>
    %cst_24 = arith.constant dense<0.000000e+00> : vector<256x8xf32>
    %51 = tpu.matmul %47, %50, %cst_24 {dimension_numbers = #tpu.dot_dimension_numbers<[1], [0], [0], [1], [0, 0, 1, 1], [], []>} : vector<256x8xf32>, vector<8x8xf32>, vector<256x8xf32> -> vector<256x8xf32>
    %52 = arith.addf %45, %51 : vector<256x8xf32>
    %53 = vector.extract_strided_slice %2 {offsets = [2, 1, 0], sizes = [16, 16, 8], strides = [1, 1, 1]} : vector<18x18x8xf32> to vector<16x16x8xf32>
    %54 = vector.shape_cast %53 : vector<16x16x8xf32> to vector<256x8xf32>
    %c7 = arith.constant 7 : index
    %c0_25 = arith.constant 0 : index
    %c0_26 = arith.constant 0 : index
    %55 = vector.load %arg2[%c7, %c0_25, %c0_26] : memref<9x8x8xbf16, #tpu.memory_space<vmem>>, vector<1x8x8xbf16>
    %56 = vector.shape_cast %55 : vector<1x8x8xbf16> to vector<8x8xbf16>
    %57 = arith.extf %56 : vector<8x8xbf16> to vector<8x8xf32>
    %cst_27 = arith.constant dense<0.000000e+00> : vector<256x8xf32>
    %58 = tpu.matmul %54, %57, %cst_27 {dimension_numbers = #tpu.dot_dimension_numbers<[1], [0], [0], [1], [0, 0, 1, 1], [], []>} : vector<256x8xf32>, vector<8x8xf32>, vector<256x8xf32> -> vector<256x8xf32>
    %59 = arith.addf %52, %58 : vector<256x8xf32>
    %60 = vector.extract_strided_slice %2 {offsets = [2, 2, 0], sizes = [16, 16, 8], strides = [1, 1, 1]} : vector<18x18x8xf32> to vector<16x16x8xf32>
    %61 = vector.shape_cast %60 : vector<16x16x8xf32> to vector<256x8xf32>
    %c8 = arith.constant 8 : index
    %c0_28 = arith.constant 0 : index
    %c0_29 = arith.constant 0 : index
    %62 = vector.load %arg2[%c8, %c0_28, %c0_29] : memref<9x8x8xbf16, #tpu.memory_space<vmem>>, vector<1x8x8xbf16>
    %63 = vector.shape_cast %62 : vector<1x8x8xbf16> to vector<8x8xbf16>
    %64 = arith.extf %63 : vector<8x8xbf16> to vector<8x8xf32>
    %cst_30 = arith.constant dense<0.000000e+00> : vector<256x8xf32>
    %65 = tpu.matmul %61, %64, %cst_30 {dimension_numbers = #tpu.dot_dimension_numbers<[1], [0], [0], [1], [0, 0, 1, 1], [], []>} : vector<256x8xf32>, vector<8x8xf32>, vector<256x8xf32> -> vector<256x8xf32>
    %66 = arith.addf %59, %65 : vector<256x8xf32>
    %c0_31 = arith.constant 0 : index
    %c0_32 = arith.constant 0 : index
    %67 = vector.load %arg3[%c0_31, %c0_32] : memref<1x8xf32, #tpu.memory_space<vmem>>, vector<1x8xf32>
    %68 = vector.broadcast %67 : vector<1x8xf32> to vector<256x8xf32>
    %69 = arith.addf %66, %68 : vector<256x8xf32>
    %cst_33 = arith.constant 0.000000e+00 : f32
    %70 = vector.broadcast %cst_33 : f32 to vector<256x8xf32>
    %71 = arith.maximumf %69, %70 : vector<256x8xf32>
    %72 = arith.truncf %71 : vector<256x8xf32> to vector<256x8xbf16>
    %c0_34 = arith.constant 0 : index
    %c0_35 = arith.constant 0 : index
    %c0_36 = arith.constant 0 : index
    %73 = vector.load %arg6[%c0_34, %c0_35, %c0_36] : memref<1x256x8xbf16, #tpu.memory_space<vmem>>, vector<1x256x8xbf16>
    %74 = vector.shape_cast %73 : vector<1x256x8xbf16> to vector<256x8xbf16>
    %75 = vector.shape_cast %72 : vector<256x8xbf16> to vector<1x256x8xbf16>
    tpu.vector_store %arg6[%c0_34, %c0_35, %c0_36], %75 {strides = array<i32>} : memref<1x256x8xbf16, #tpu.memory_space<vmem>>, vector<1x256x8xbf16>,
    %76 = vector.extract_strided_slice %2 {offsets = [1, 1, 0], sizes = [16, 16, 4], strides = [1, 1, 1]} : vector<18x18x8xf32> to vector<16x16x4xf32>
    %77 = vector.shape_cast %76 : vector<16x16x4xf32> to vector<256x4xf32>
    %c0_37 = arith.constant 0 : index
    %c0_38 = arith.constant 0 : index
    %78 = vector.load %arg4[%c0_37, %c0_38] : memref<4x4xbf16, #tpu.memory_space<vmem>>, vector<4x4xbf16>
    %79 = arith.extf %78 : vector<4x4xbf16> to vector<4x4xf32>
    %cst_39 = arith.constant dense<0.000000e+00> : vector<256x4xf32>
    %80 = tpu.matmul %77, %79, %cst_39 {dimension_numbers = #tpu.dot_dimension_numbers<[1], [0], [0], [1], [0, 0, 1, 1], [], []>} : vector<256x4xf32>, vector<4x4xf32>, vector<256x4xf32> -> vector<256x4xf32>
    %c0_40 = arith.constant 0 : index
    %c0_41 = arith.constant 0 : index
    %81 = vector.load %arg5[%c0_40, %c0_41] : memref<1x4xf32, #tpu.memory_space<vmem>>, vector<1x4xf32>
    %82 = vector.broadcast %81 : vector<1x4xf32> to vector<256x4xf32>
    %83 = arith.addf %80, %82 : vector<256x4xf32>
    %c0_42 = arith.constant 0 : index
    %c0_43 = arith.constant 0 : index
    %c0_44 = arith.constant 0 : index
    %84 = vector.load %arg7[%c0_42, %c0_43, %c0_44] : memref<1x256x4xf32, #tpu.memory_space<vmem>>, vector<1x256x4xf32>
    %85 = vector.shape_cast %84 : vector<1x256x4xf32> to vector<256x4xf32>
    %86 = vector.shape_cast %83 : vector<256x4xf32> to vector<1x256x4xf32>
    tpu.vector_store %arg7[%c0_42, %c0_43, %c0_44], %86 {strides = array<i32>} : memref<1x256x4xf32, #tpu.memory_space<vmem>>, vector<1x256x4xf32>,
    return
  }
  func.func @transform_0(%arg0: i32) -> (i32, i32, i32, i32) {
    %c0_i32 = arith.constant 0 : i32
    %c0_i32_0 = arith.constant 0 : i32
    %c0_i32_1 = arith.constant 0 : i32
    %c0_i32_2 = arith.constant 0 : i32
    return %arg0, %c0_i32, %c0_i32_0, %c0_i32_1 : i32, i32, i32, i32
  }
  func.func @transform_1(%arg0: i32) -> (i32, i32, i32) {
    %c0_i32 = arith.constant 0 : i32
    %c0_i32_0 = arith.constant 0 : i32
    %c0_i32_1 = arith.constant 0 : i32
    %c0_i32_2 = arith.constant 0 : i32
    return %c0_i32, %c0_i32_0, %c0_i32_1 : i32, i32, i32
  }
  func.func @transform_2(%arg0: i32) -> (i32, i32) {
    %c0_i32 = arith.constant 0 : i32
    %c0_i32_0 = arith.constant 0 : i32
    %c0_i32_1 = arith.constant 0 : i32
    return %c0_i32, %c0_i32_0 : i32, i32
  }
  func.func @transform_3(%arg0: i32) -> (i32, i32) {
    %c0_i32 = arith.constant 0 : i32
    %c0_i32_0 = arith.constant 0 : i32
    %c0_i32_1 = arith.constant 0 : i32
    return %c0_i32, %c0_i32_0 : i32, i32
  }
  func.func @transform_4(%arg0: i32) -> (i32, i32) {
    %c0_i32 = arith.constant 0 : i32
    %c0_i32_0 = arith.constant 0 : i32
    %c0_i32_1 = arith.constant 0 : i32
    return %c0_i32, %c0_i32_0 : i32, i32
  }
  func.func @transform_5(%arg0: i32) -> (i32, i32, i32) {
    %c0_i32 = arith.constant 0 : i32
    %c0_i32_0 = arith.constant 0 : i32
    %c0_i32_1 = arith.constant 0 : i32
    return %arg0, %c0_i32, %c0_i32_0 : i32, i32, i32
  }
  func.func @transform_6(%arg0: i32) -> (i32, i32, i32) {
    %c0_i32 = arith.constant 0 : i32
    %c0_i32_0 = arith.constant 0 : i32
    %c0_i32_1 = arith.constant 0 : i32
    return %arg0, %c0_i32, %c0_i32_0 : i32, i32, i32
  }
}

module attributes {stable_mosaic.version = 11 : i64} {
  func.func @_temporal_kernel(%arg0: i32, %arg1: i32, %arg2: memref<1x256x8xbf16, #tpu.memory_space<vmem>>, %arg3: memref<1x256x8xbf16, #tpu.memory_space<vmem>>, %arg4: memref<1x256x8xbf16, #tpu.memory_space<vmem>>, %arg5: memref<3x8x8xbf16, #tpu.memory_space<vmem>>, %arg6: memref<1x8xf32, #tpu.memory_space<vmem>>, %arg7: memref<1x256x4xf32, #tpu.memory_space<vmem>>, %arg8: memref<1x256x4xf32, #tpu.memory_space<vmem>>, %arg9: memref<1x4xf32, #tpu.memory_space<vmem>>, %arg10: memref<1x4xf32, #tpu.memory_space<vmem>>) attributes {dimension_semantics = [#tpu.dimension_semantics<arbitrary>, #tpu.dimension_semantics<arbitrary>], iteration_bounds = array<i64: 2, 1>, scalar_prefetch = 0 : i64, scratch_operands = 1 : i64, tpu.core_type = #tpu.core_type<tc>, window_params = [{transform_indices = @transform_0, window_bounds = array<i64: 1, 256, 8>}, {transform_indices = @transform_1, window_bounds = array<i64: 1, 256, 8>}, {transform_indices = @transform_2, window_bounds = array<i64: 1, 256, 8>}, {pipeline_mode = #tpu.pipeline_mode<synchronous>, transform_indices = @transform_3, window_bounds = array<i64: 3, 8, 8>}, {pipeline_mode = #tpu.pipeline_mode<synchronous>, transform_indices = @transform_4, window_bounds = array<i64: 1, 8>}, {transform_indices = @transform_5, window_bounds = array<i64: 1, 256, 4>}, {transform_indices = @transform_6, window_bounds = array<i64: 1, 256, 4>}, {pipeline_mode = #tpu.pipeline_mode<synchronous>, transform_indices = @transform_7, window_bounds = array<i64: 1, 4>}]} {
    %c0 = arith.constant 0 : index
    %c0_0 = arith.constant 0 : index
    %c0_1 = arith.constant 0 : index
    %0 = vector.load %arg2[%c0, %c0_0, %c0_1] : memref<1x256x8xbf16, #tpu.memory_space<vmem>>, vector<1x256x8xbf16>
    %1 = vector.shape_cast %0 : vector<1x256x8xbf16> to vector<256x8xbf16>
    %c0_2 = arith.constant 0 : index
    %c0_3 = arith.constant 0 : index
    %c0_4 = arith.constant 0 : index
    %2 = vector.load %arg5[%c0_2, %c0_3, %c0_4] : memref<3x8x8xbf16, #tpu.memory_space<vmem>>, vector<1x8x8xbf16>
    %3 = vector.shape_cast %2 : vector<1x8x8xbf16> to vector<8x8xbf16>
    %cst = arith.constant dense<0.000000e+00> : vector<256x8xf32>
    %4 = tpu.matmul %1, %3, %cst {dimension_numbers = #tpu.dot_dimension_numbers<[1], [0], [0], [1], [0, 0, 1, 1], [], []>} : vector<256x8xbf16>, vector<8x8xbf16>, vector<256x8xf32> -> vector<256x8xf32>
    %c0_5 = arith.constant 0 : index
    %c0_6 = arith.constant 0 : index
    %c0_7 = arith.constant 0 : index
    %5 = vector.load %arg3[%c0_5, %c0_6, %c0_7] : memref<1x256x8xbf16, #tpu.memory_space<vmem>>, vector<1x256x8xbf16>
    %6 = vector.shape_cast %5 : vector<1x256x8xbf16> to vector<256x8xbf16>
    %c1 = arith.constant 1 : index
    %c0_8 = arith.constant 0 : index
    %c0_9 = arith.constant 0 : index
    %7 = vector.load %arg5[%c1, %c0_8, %c0_9] : memref<3x8x8xbf16, #tpu.memory_space<vmem>>, vector<1x8x8xbf16>
    %8 = vector.shape_cast %7 : vector<1x8x8xbf16> to vector<8x8xbf16>
    %cst_10 = arith.constant dense<0.000000e+00> : vector<256x8xf32>
    %9 = tpu.matmul %6, %8, %cst_10 {dimension_numbers = #tpu.dot_dimension_numbers<[1], [0], [0], [1], [0, 0, 1, 1], [], []>} : vector<256x8xbf16>, vector<8x8xbf16>, vector<256x8xf32> -> vector<256x8xf32>
    %10 = arith.addf %4, %9 : vector<256x8xf32>
    %c0_11 = arith.constant 0 : index
    %c0_12 = arith.constant 0 : index
    %c0_13 = arith.constant 0 : index
    %11 = vector.load %arg4[%c0_11, %c0_12, %c0_13] : memref<1x256x8xbf16, #tpu.memory_space<vmem>>, vector<1x256x8xbf16>
    %12 = vector.shape_cast %11 : vector<1x256x8xbf16> to vector<256x8xbf16>
    %c2 = arith.constant 2 : index
    %c0_14 = arith.constant 0 : index
    %c0_15 = arith.constant 0 : index
    %13 = vector.load %arg5[%c2, %c0_14, %c0_15] : memref<3x8x8xbf16, #tpu.memory_space<vmem>>, vector<1x8x8xbf16>
    %14 = vector.shape_cast %13 : vector<1x8x8xbf16> to vector<8x8xbf16>
    %cst_16 = arith.constant dense<0.000000e+00> : vector<256x8xf32>
    %15 = tpu.matmul %12, %14, %cst_16 {dimension_numbers = #tpu.dot_dimension_numbers<[1], [0], [0], [1], [0, 0, 1, 1], [], []>} : vector<256x8xbf16>, vector<8x8xbf16>, vector<256x8xf32> -> vector<256x8xf32>
    %16 = arith.addf %10, %15 : vector<256x8xf32>
    %c0_17 = arith.constant 0 : index
    %c0_18 = arith.constant 0 : index
    %17 = vector.load %arg6[%c0_17, %c0_18] : memref<1x8xf32, #tpu.memory_space<vmem>>, vector<1x8xf32>
    %18 = vector.broadcast %17 : vector<1x8xf32> to vector<256x8xf32>
    %19 = arith.addf %16, %18 : vector<256x8xf32>
    %20 = vector.extract_strided_slice %19 {offsets = [0, 0], sizes = [256, 4], strides = [1, 1]} : vector<256x8xf32> to vector<256x4xf32>
    %c0_19 = arith.constant 0 : index
    %c0_20 = arith.constant 0 : index
    %c0_21 = arith.constant 0 : index
    %21 = vector.load %arg7[%c0_19, %c0_20, %c0_21] : memref<1x256x4xf32, #tpu.memory_space<vmem>>, vector<1x256x4xf32>
    %22 = vector.shape_cast %21 : vector<1x256x4xf32> to vector<256x4xf32>
    %23 = arith.addf %20, %22 : vector<256x4xf32>
    %c0_22 = arith.constant 0 : index
    %c0_23 = arith.constant 0 : index
    %c0_24 = arith.constant 0 : index
    %24 = vector.load %arg8[%c0_22, %c0_23, %c0_24] : memref<1x256x4xf32, #tpu.memory_space<vmem>>, vector<1x256x4xf32>
    %25 = vector.shape_cast %24 : vector<1x256x4xf32> to vector<256x4xf32>
    %26 = vector.shape_cast %23 : vector<256x4xf32> to vector<1x256x4xf32>
    tpu.vector_store %arg8[%c0_22, %c0_23, %c0_24], %26 {strides = array<i32>} : memref<1x256x4xf32, #tpu.memory_space<vmem>>, vector<1x256x4xf32>,
    %c0_i32 = arith.constant 0 : i32
    %27 = arith.cmpi eq, %arg0, %c0_i32 : i32
    %c0_i32_25 = arith.constant 0 : i32
    %28 = arith.cmpi eq, %arg1, %c0_i32_25 : i32
    %29 = arith.andi %27, %28 : i1
    %30 = arith.extui %29 : i1 to i32
    %c0_i32_26 = arith.constant 0 : i32
    %31 = arith.cmpi ne, %30, %c0_i32_26 : i32
    scf.if %31 {
      %cst_34 = arith.constant 0.000000e+00 : f32
      %43 = vector.broadcast %cst_34 : f32 to vector<1x4xf32>
      %c0_35 = arith.constant 0 : index
      %c0_36 = arith.constant 0 : index
      %44 = vector.load %arg10[%c0_35, %c0_36] : memref<1x4xf32, #tpu.memory_space<vmem>>, vector<1x4xf32>
      tpu.vector_store %arg10[%c0_35, %c0_36], %43 {strides = array<i32>} : memref<1x4xf32, #tpu.memory_space<vmem>>, vector<1x4xf32>,
    } else {
    }
    %c0_27 = arith.constant 0 : index
    %c0_28 = arith.constant 0 : index
    %32 = vector.load %arg10[%c0_27, %c0_28] : memref<1x4xf32, #tpu.memory_space<vmem>>, vector<1x4xf32>
    %33 = vector.extract_strided_slice %19 {offsets = [0, 4], sizes = [256, 4], strides = [1, 1]} : vector<256x8xf32> to vector<256x4xf32>
    %cst_29 = arith.constant dense<0.000000e+00> : vector<4xf32>
    %34 = vector.multi_reduction <add>, %33, %cst_29 [0] : vector<256x4xf32> to vector<4xf32>
    %35 = vector.shape_cast %34 : vector<4xf32> to vector<1x4xf32>
    %36 = arith.addf %32, %35 : vector<1x4xf32>
    %c0_30 = arith.constant 0 : index
    %c0_31 = arith.constant 0 : index
    %37 = vector.load %arg10[%c0_30, %c0_31] : memref<1x4xf32, #tpu.memory_space<vmem>>, vector<1x4xf32>
    tpu.vector_store %arg10[%c0_30, %c0_31], %36 {strides = array<i32>} : memref<1x4xf32, #tpu.memory_space<vmem>>, vector<1x4xf32>,
    %c1_i32 = arith.constant 1 : i32
    %38 = arith.cmpi eq, %arg0, %c1_i32 : i32
    %c0_i32_32 = arith.constant 0 : i32
    %39 = arith.cmpi eq, %arg1, %c0_i32_32 : i32
    %40 = arith.andi %38, %39 : i1
    %41 = arith.extui %40 : i1 to i32
    %c0_i32_33 = arith.constant 0 : i32
    %42 = arith.cmpi ne, %41, %c0_i32_33 : i32
    scf.if %42 {
      %c0_34 = arith.constant 0 : index
      %c0_35 = arith.constant 0 : index
      %43 = vector.load %arg10[%c0_34, %c0_35] : memref<1x4xf32, #tpu.memory_space<vmem>>, vector<1x4xf32>
      %cst_36 = arith.constant 0.001953125 : f32
      %44 = vector.broadcast %cst_36 : f32 to vector<1x4xf32>
      %45 = arith.mulf %43, %44 : vector<1x4xf32>
      %c0_37 = arith.constant 0 : index
      %c0_38 = arith.constant 0 : index
      %46 = vector.load %arg9[%c0_37, %c0_38] : memref<1x4xf32, #tpu.memory_space<vmem>>, vector<1x4xf32>
      tpu.vector_store %arg9[%c0_37, %c0_38], %45 {strides = array<i32>} : memref<1x4xf32, #tpu.memory_space<vmem>>, vector<1x4xf32>,
    } else {
    }
    return
  }
  func.func @transform_0(%arg0: i32, %arg1: i32) -> (i32, i32, i32) {
    %c1_i32 = arith.constant 1 : i32
    %0 = arith.addi %arg0, %c1_i32 : i32
    %c2_i32 = arith.constant 2 : i32
    %c0_i32 = arith.constant 0 : i32
    %1 = arith.cmpi eq, %c2_i32, %c0_i32 : i32
    %c1_i32_0 = arith.constant 1 : i32
    %2 = arith.select %1, %c1_i32_0, %c2_i32 : i32
    %3 = arith.remsi %0, %2 : i32
    %c0_i32_1 = arith.constant 0 : i32
    %4 = arith.cmpi ne, %3, %c0_i32_1 : i32
    %c0_i32_2 = arith.constant 0 : i32
    %5 = arith.cmpi slt, %3, %c0_i32_2 : i32
    %c0_i32_3 = arith.constant 0 : i32
    %6 = arith.cmpi slt, %2, %c0_i32_3 : i32
    %7 = arith.xori %5, %6 : i1
    %8 = arith.andi %7, %4 : i1
    %9 = arith.addi %3, %2 : i32
    %10 = arith.select %8, %9, %3 : i32
    %c0_i32_4 = arith.constant 0 : i32
    %c0_i32_5 = arith.constant 0 : i32
    return %10, %arg1, %c0_i32_4 : i32, i32, i32
  }
  func.func @transform_1(%arg0: i32, %arg1: i32) -> (i32, i32, i32) {
    %c0_i32 = arith.constant 0 : i32
    %0 = arith.addi %arg0, %c0_i32 : i32
    %c2_i32 = arith.constant 2 : i32
    %c0_i32_0 = arith.constant 0 : i32
    %1 = arith.cmpi eq, %c2_i32, %c0_i32_0 : i32
    %c1_i32 = arith.constant 1 : i32
    %2 = arith.select %1, %c1_i32, %c2_i32 : i32
    %3 = arith.remsi %0, %2 : i32
    %c0_i32_1 = arith.constant 0 : i32
    %4 = arith.cmpi ne, %3, %c0_i32_1 : i32
    %c0_i32_2 = arith.constant 0 : i32
    %5 = arith.cmpi slt, %3, %c0_i32_2 : i32
    %c0_i32_3 = arith.constant 0 : i32
    %6 = arith.cmpi slt, %2, %c0_i32_3 : i32
    %7 = arith.xori %5, %6 : i1
    %8 = arith.andi %7, %4 : i1
    %9 = arith.addi %3, %2 : i32
    %10 = arith.select %8, %9, %3 : i32
    %c0_i32_4 = arith.constant 0 : i32
    %c0_i32_5 = arith.constant 0 : i32
    return %10, %arg1, %c0_i32_4 : i32, i32, i32
  }
  func.func @transform_2(%arg0: i32, %arg1: i32) -> (i32, i32, i32) {
    %c1_i32 = arith.constant 1 : i32
    %0 = arith.addi %arg0, %c1_i32 : i32
    %c2_i32 = arith.constant 2 : i32
    %c0_i32 = arith.constant 0 : i32
    %1 = arith.cmpi eq, %c2_i32, %c0_i32 : i32
    %c1_i32_0 = arith.constant 1 : i32
    %2 = arith.select %1, %c1_i32_0, %c2_i32 : i32
    %3 = arith.remsi %0, %2 : i32
    %c0_i32_1 = arith.constant 0 : i32
    %4 = arith.cmpi ne, %3, %c0_i32_1 : i32
    %c0_i32_2 = arith.constant 0 : i32
    %5 = arith.cmpi slt, %3, %c0_i32_2 : i32
    %c0_i32_3 = arith.constant 0 : i32
    %6 = arith.cmpi slt, %2, %c0_i32_3 : i32
    %7 = arith.xori %5, %6 : i1
    %8 = arith.andi %7, %4 : i1
    %9 = arith.addi %3, %2 : i32
    %10 = arith.select %8, %9, %3 : i32
    %c0_i32_4 = arith.constant 0 : i32
    %c0_i32_5 = arith.constant 0 : i32
    return %10, %arg1, %c0_i32_4 : i32, i32, i32
  }
  func.func @transform_3(%arg0: i32, %arg1: i32) -> (i32, i32, i32) {
    %c0_i32 = arith.constant 0 : i32
    %c0_i32_0 = arith.constant 0 : i32
    %c0_i32_1 = arith.constant 0 : i32
    %c0_i32_2 = arith.constant 0 : i32
    return %c0_i32, %c0_i32_0, %c0_i32_1 : i32, i32, i32
  }
  func.func @transform_4(%arg0: i32, %arg1: i32) -> (i32, i32) {
    %c0_i32 = arith.constant 0 : i32
    %c0_i32_0 = arith.constant 0 : i32
    %c0_i32_1 = arith.constant 0 : i32
    return %c0_i32, %c0_i32_0 : i32, i32
  }
  func.func @transform_5(%arg0: i32, %arg1: i32) -> (i32, i32, i32) {
    %c0_i32 = arith.constant 0 : i32
    %c0_i32_0 = arith.constant 0 : i32
    return %arg0, %arg1, %c0_i32 : i32, i32, i32
  }
  func.func @transform_6(%arg0: i32, %arg1: i32) -> (i32, i32, i32) {
    %c0_i32 = arith.constant 0 : i32
    %c0_i32_0 = arith.constant 0 : i32
    return %arg0, %arg1, %c0_i32 : i32, i32, i32
  }
  func.func @transform_7(%arg0: i32, %arg1: i32) -> (i32, i32) {
    %c0_i32 = arith.constant 0 : i32
    %c0_i32_0 = arith.constant 0 : i32
    %c0_i32_1 = arith.constant 0 : i32
    return %c0_i32, %c0_i32_0 : i32, i32
  }
}

</mosaic_0001>

<bundles_post_ra>
// kernel: prompt_block_forward.3
= control target key start
LH: loop header
LB: loop body
LE: loop exit
PB: predicated region body
PF: predicated region fallthrough
CT: control target
= control target key end

     0   :  { %13 = vsyncpa [#allocation4], 0  ;;  %s2362_s24 = smov 0   ;;  %s2364_s25 = smov 0   ;;  %s2874_s0 = inlined_call_operand.vmem [shape: bf16[2,256,8], index: 0, kind: input, shape index: {}, may-alias: {0,1,2}]   ;;  %s2875_s1 = inlined_call_operand.vmem [shape: bf16[2,256,8], index: 1, kind: input, shape index: {}, may-alias: {0,1,2}]   ;;  %s2876_s2 = inlined_call_operand.vmem [shape: bf16[2,256,8], index: 2, kind: input, shape index: {}, may-alias: {0,1,2}]   ;;  %s2877_s3 = inlined_call_operand.vmem [shape: bf16[3,8,8], index: 3, kind: input, shape index: {}]   ;;  %s2878_s4 = inlined_call_operand.vmem [shape: f32[1,8], index: 4, kind: input, shape index: {}]   ;;  %s2879_s5 = inlined_call_operand.vmem [shape: f32[2,256,4], index: 5, kind: input, shape index: {}]   ;;  %s2880_s6 = inlined_call_operand.vmem [shape: f32[2,256,4], index: 6, kind: output, shape index: {0}]   ;;  %s2881_s7 = inlined_call_operand.hbm [shape: f32[1,4], index: 7, kind: output, shape index: {1}]  }
   0x1   :  { %s2366_s26 = smov 0  }
   0x2 LB: > { %s1881_s27 = sadd.s32 4294967295, %s2317_s26   ;;  %s31_s28 = sadd.s32 1, %s2313_s25  ;;  %s2317_s26 = sphi %s2366_s26, %s19_s26   ;;  %s2313_s25 = sphi %s2364_s25, %s2883_s25   ;;  %s2309_s24 = sphi %s2362_s24, %s2882_s24  }
   0x3   : > { %p33_p0 = scmp.ge.s32.totalorder %s31_s28, 2  ;;  %p1903_p1 = scmp.ge.s32.totalorder %s2317_s26, 1 }
   0x4   : > { %p460_p2 = scmp.lt.s32.totalorder %s2317_s26, 3 }
   0x5   : > { %s2885_s28 = smov (%p33_p0, %s31_s28), 0 }
   0x6   : > { %p461_p3 = pnand %p1903_p1, %p460_p2 }
   0x7   : > { %p601_p4 = scmp.lt.s32.totalorder (!%p461_p3), %s2309_s24, 0  ;;  %s602_s12 = ssub.s32 (!%p461_p3), 0, %s2309_s24 }
   0x8   : > { %464 = sbr.rel (%p461_p3) target bundleno = 559 (0x22f), region = 44  ;;  %s1909_s13 = smin.u32 (!%p461_p3), %s2309_s24, %s602_s12 }
   0x9   : > { %s565_s14 = sadd.s32 (!%p461_p3), 1, %s2309_s24  ;;  %s604_s15 = sand.u32 (!%p461_p3), 1, %s1909_s13  }
   0xa   : > { %s605_s16 = ssub.s32 (!%p461_p3), 0, %s604_s15  ;;  %s567_s17 = ssub.s32 (!%p461_p3), 0, %s565_s14 }
   0xb   : > { %s1904_s18 = smin.u32 (!%p461_p3), %s567_s17, %s565_s14  ;;  %p566_p6 = scmp.lt.s32.totalorder (!%p461_p3), %s565_s14, 0 }
   0xc   : > { %s569_s20 = sand.u32 (!%p461_p3), 1, %s1904_s18   ;;  %p672_p10 = scmp.lt.s32.totalorder (!%p461_p3), %s2309_s24, 1 }
   0xd   : > { %v1923_v0 = vld [vmem:[%s2877_s3 + $0x4] sm:$0xf]  ;;  %vm888_vm0 = vcmask 1043456   ;;  %v724_v1 = vld [vmem:[%s2877_s3] sm:$0xf]  ;;  %s2887_s16 = smov (!%p601_p4, %s605_s16), %s604_s15  ;;  %s570_s21 = ssub.s32 0, %s569_s20 }
   0xe   : > { %v890_v2 = vsel %vm888_vm0, %v1923_v0, 0  ;;  %v1110_v3 = vsel %vm888_vm0, %v724_v1, 0  ;;  %v2084_v4 = vld [vmem:[%s2877_s3 + $0x8] sm:$0xf]  ;;  %p1911_p5 = scmp.lt.s32.totalorder %s2887_s16, 0  ;;  %s611_s19 = sadd.s32 2, %s2887_s16 }
   0xf   : > { %899 = vmatpush.bf16.msra.mxu0 %v890_v2  ;;  %2226 = vmatpush.bf16.msra.mxu3 %v890_v2  ;;  %v1364_v5 = vsel %vm888_vm0, %v2084_v4, 0  ;;  %s2891_s21 = smov (!%p566_p6, %s570_s21), %s569_s20  ;;  %vm839_vm1 = vcmask 64512   ;;  %v2495_v47 = vld [vmem:[%s2878_s4] ss:$0 sm:$0xff]  ;;  %vm1587_vm2 = vcmask 31744   ;;  %p1620_p11 = scmp.eq.s32.totalorder %s2309_s24, 0 }
  0x10   : > { %1119 = vmatpush.bf16.msra.mxu1 %v1110_v3  ;;  %1373 = vmatpush.bf16.msra.mxu2 %v1364_v5  ;;  %s2889_s19 = smov (!%p1911_p5, %s611_s19), %s2887_s16  ;;  %p1906_p8 = scmp.lt.s32.totalorder %s2891_s21, 0  ;;  %vm1626_vm3 = vcmask (%p1620_p11), 24576  }
  0x11   : > { %p614_p7 = scmp.lt.s32.totalorder %s2889_s19, 1  ;;  %s576_s22 = sadd.s32 2, %s2891_s21 }
  0x12   : > { %s2895_s22 = smov (!%p1906_p8, %s576_s22), %s2891_s21 }
  0x13   : > { %2227 = vmatpush.bf16.msrb.mxu3 %v1110_v3  ;;  %s2893_s19 = smov (!%p614_p7, %s2889_s19), 1  ;;  %p579_p9 = scmp.lt.s32.totalorder %s2895_s22, 1 }
  0x14   : > { %s2172_s23 = sshll.u32 %s2893_s19, 7 }
  0x15   : > { %s2399_s8 = scalar_lea.vmem %s2875_s1, %s2172_s23  ;;  %s2897_s22 = smov (!%p579_p9, %s2895_s22), 1 }
  0x16   : > { %v2192_v6 = vld [vmem:[%s2399_s8] sm:$0xff]  ;;  %s2171_s9 = sshll.u32 %s2897_s22, 7  ;;  %v2193_v10 = vld [vmem:[%s2399_s8 + $0x8] sm:$0xff]  ;;  %v2194_v14 = vld [vmem:[%s2399_s8 + $0x10] sm:$0xff] }
  0x17   : > { %v2204_v7 = vld [vmem:[%s2399_s8 + $0x60] sm:$0xff]  ;;  %1988 = vmatmul.msk.bf16.vlgmr.msra.gmra.mxu0 %vm839_vm1, %v2192_v6  ;;  %s2408_s12 = scalar_lea.vmem %s2874_s0, %s2171_s9  ;;  %s2413_s15 = scalar_lea.vmem %s2876_s2, %s2171_s9  ;;  %v2205_v11 = vld [vmem:[%s2399_s8 + $0x68] sm:$0xff]  ;;  %v2206_v15 = vld [vmem:[%s2399_s8 + $0x70] sm:$0xff] }
  0x18   : > { %2000 = vmatmul.msk.bf16.vlgmr.msra.gmra.mxu3 %vm839_vm1, %v2204_v7  ;;  %v2176_v8 = vld [vmem:[%s2408_s12] sm:$0xff]  ;;  %v2177_v12 = vld [vmem:[%s2408_s12 + $0x8] sm:$0xff]  ;;  %v2178_v16 = vld [vmem:[%s2408_s12 + $0x10] sm:$0xff]  ;;  %s673_s16 = scalar_select %p672_p10, %s2309_s24, 1 }
  0x19   : > { %2228 = vmatpush.bf16.msra.mxu3 %v1364_v5  ;;  %v2208_v9 = vld [vmem:[%s2413_s15] sm:$0xff]  ;;  %2068 = vmatmul.msk.bf16.vlgmr.msra.gmra.mxu1 %vm839_vm1, %v2176_v8  ;;  %v2209_v13 = vld [vmem:[%s2413_s15 + $0x8] sm:$0xff]  ;;  %v2210_v17 = vld [vmem:[%s2413_s15 + $0x10] sm:$0xff] }
  0x1a   : > { %2149 = vmatmul.msk.bf16.vlgmr.msra.gmra.mxu2 %vm839_vm1, %v2208_v9  ;;  %v2195_v18 = vld [vmem:[%s2399_s8 + $0x18] sm:$0xff]  ;;  %v2196_v22 = vld [vmem:[%s2399_s8 + $0x20] sm:$0xff]  ;;  %v2197_v26 = vld [vmem:[%s2399_s8 + $0x28] sm:$0xff]  ;;  %s2174_s17 = sshll.u32 %s673_s16, 8 }
  0x1b   : > { %v2207_v19 = vld [vmem:[%s2399_s8 + $0x78] sm:$0xff]  ;;  %v2188_v23 = vld [vmem:[%s2408_s12 + $0x60] sm:$0xff]  ;;  %v2189_v27 = vld [vmem:[%s2408_s12 + $0x68] sm:$0xff]  ;;  %s2490_s20 = scalar_lea.vmem %s2879_s5, %s2174_s17  ;;  %s2508_s30 = scalar_lea.vmem %s2880_s6, %s2174_s17 }
  0x1c   : > { %v2179_v20 = vld [vmem:[%s2408_s12 + $0x18] sm:$0xff]  ;;  %v2180_v24 = vld [vmem:[%s2408_s12 + $0x20] sm:$0xff]  ;;  %v2181_v28 = vld [vmem:[%s2408_s12 + $0x28] sm:$0xff] }
  0x1d   : > { %v2211_v21 = vld [vmem:[%s2413_s15 + $0x18] sm:$0xff]  ;;  %v2212_v25 = vld [vmem:[%s2413_s15 + $0x20] sm:$0xff]  ;;  %v2213_v29 = vld [vmem:[%s2413_s15 + $0x28] sm:$0xff] }
  0x1e   : > { %v2198_v30 = vld [vmem:[%s2399_s8 + $0x30] sm:$0xff]  ;;  %v2199_v34 = vld [vmem:[%s2399_s8 + $0x38] sm:$0xff]  ;;  %v2200_v38 = vld [vmem:[%s2399_s8 + $0x40] sm:$0xff] }
  0x1f   : > { %v2190_v31 = vld [vmem:[%s2408_s12 + $0x70] sm:$0xff]  ;;  %v2191_v35 = vld [vmem:[%s2408_s12 + $0x78] sm:$0xff]  ;;  %v2220_v39 = vld [vmem:[%s2413_s15 + $0x60] sm:$0xff] }
  0x20   : > { %v2182_v32 = vld [vmem:[%s2408_s12 + $0x30] sm:$0xff]  ;;  %v2183_v36 = vld [vmem:[%s2408_s12 + $0x38] sm:$0xff]  ;;  %v2184_v42 = vld [vmem:[%s2408_s12 + $0x40] sm:$0xff] }
  0x21   : > { %v2214_v33 = vld [vmem:[%s2413_s15 + $0x30] sm:$0xff]  ;;  %v2215_v37 = vld [vmem:[%s2413_s15 + $0x38] sm:$0xff]  ;;  %v2216_v43 = vld [vmem:[%s2413_s15 + $0x40] sm:$0xff] }
  0x22   : > { %v2201_v51 = vld [vmem:[%s2399_s8 + $0x48] sm:$0xff]  ;;  %v1523_v53 = vld [vmem:[%s2490_s20] sm:$0xff]  ;;  %v2202_v9 = vld [vmem:[%s2399_s8 + $0x50] sm:$0xff] }
  0x23   : > { %v2221_v52 = vld [vmem:[%s2413_s15 + $0x68] sm:$0xff] }
  0x24   : > { %v2185_v62 = vld [vmem:[%s2408_s12 + $0x48] sm:$0xff] }
  0x25   : > { %v2217_v63 = vld [vmem:[%s2413_s15 + $0x48] sm:$0xff] }
  0x26   : > { %v1524_v0 = vld [vmem:[%s2490_s20 + $0x8] sm:$0xff] }
  0x27   : > { %1989 = vmatmul.msk.bf16.gmra.mxu0 %vm839_vm1, %v2193_v10  ;;  %v2222_v10 = vld [vmem:[%s2413_s15 + $0x70] sm:$0xff] }
  0x28   : > { %2001 = vmatmul.msk.bf16.gmra.mxu3 %vm839_vm1, %v2205_v11  ;;  %v1525_v11 = vld [vmem:[%s2490_s20 + $0x10] sm:$0xff] }
  0x29   : > { %2069 = vmatmul.msk.bf16.gmra.mxu1 %vm839_vm1, %v2177_v12 }
  0x2a   : > { %2150 = vmatmul.msk.bf16.gmra.mxu2 %vm839_vm1, %v2209_v13 }
  0x37   : > { %1990 = vmatmul.msk.bf16.gmra.mxu0 %vm839_vm1, %v2194_v14 }
  0x38   : > { %2002 = vmatmul.msk.bf16.gmra.mxu3 %vm839_vm1, %v2206_v15 }
  0x39   : > { %2070 = vmatmul.msk.bf16.gmra.mxu1 %vm839_vm1, %v2178_v16 }
  0x3a   : > { %2151 = vmatmul.msk.bf16.gmra.mxu2 %vm839_vm1, %v2210_v17 }
  0x47   : > { %1991 = vmatmul.msk.bf16.gmra.mxu0 %vm839_vm1, %v2195_v18 }
  0x48   : > { %2003 = vmatmul.msk.bf16.gmra.mxu3 %vm839_vm1, %v2207_v19 }
  0x49   : > { %2071 = vmatmul.msk.bf16.gmra.mxu1 %vm839_vm1, %v2179_v20  ;;  %v2186_v20 = vld [vmem:[%s2408_s12 + $0x50] sm:$0xff] }
  0x4a   : > { %2152 = vmatmul.msk.bf16.gmra.mxu2 %vm839_vm1, %v2211_v21  ;;  %v2218_v21 = vld [vmem:[%s2413_s15 + $0x50] sm:$0xff] }
  0x57   : > { %1992 = vmatmul.msk.bf16.gmra.mxu0 %vm839_vm1, %v2196_v22  ;;  %v1526_v22 = vld [vmem:[%s2490_s20 + $0x18] sm:$0xff] }
  0x58   : > { %2080 = vmatmul.msk.bf16.vlgmr.msrb.gmra.mxu3 %vm839_vm1, %v2188_v23 }
  0x59   : > { %2072 = vmatmul.msk.bf16.gmra.mxu1 %vm839_vm1, %v2180_v24 }
  0x5a   : > { %2153 = vmatmul.msk.bf16.gmra.mxu2 %vm839_vm1, %v2212_v25 }
  0x67   : > { %1993 = vmatmul.msk.bf16.gmra.mxu0 %vm839_vm1, %v2197_v26 }
  0x68   : > { %2081 = vmatmul.msk.bf16.gmra.mxu3 %vm839_vm1, %v2189_v27 }
  0x69   : > { %2073 = vmatmul.msk.bf16.gmra.mxu1 %vm839_vm1, %v2181_v28 }
  0x6a   : > { %2154 = vmatmul.msk.bf16.gmra.mxu2 %vm839_vm1, %v2213_v29 }
  0x77   : > { %1994 = vmatmul.msk.bf16.gmra.mxu0 %vm839_vm1, %v2198_v30 }
  0x78   : > { %2082 = vmatmul.msk.bf16.gmra.mxu3 %vm839_vm1, %v2190_v31  ;;  %v2203_v31 = vld [vmem:[%s2399_s8 + $0x58] sm:$0xff] }
  0x79   : > { %2074 = vmatmul.msk.bf16.gmra.mxu1 %vm839_vm1, %v2182_v32  ;;  %v2223_v32 = vld [vmem:[%s2413_s15 + $0x78] sm:$0xff] }
  0x7a   : > { %2155 = vmatmul.msk.bf16.gmra.mxu2 %vm839_vm1, %v2214_v33  ;;  %v1527_v33 = vld [vmem:[%s2490_s20 + $0x20] sm:$0xff] }
  0x87   : > { %1995 = vmatmul.msk.bf16.gmra.mxu0 %vm839_vm1, %v2199_v34 }
  0x88   : > { %2083 = vmatmul.msk.bf16.gmra.mxu3 %vm839_vm1, %v2191_v35 }
  0x89   : > { %2075 = vmatmul.msk.bf16.gmra.mxu1 %vm839_vm1, %v2183_v36 }
  0x8a   : > { %2156 = vmatmul.msk.bf16.gmra.mxu2 %vm839_vm1, %v2215_v37 }
  0x94   : > { %v901_v40 = vpop.f32.mrf.mxu0 }
  0x96   : > { %v1121_v44 = vpop.f32.mrf.mxu1 }
  0x97   : > { %1996 = vmatmul.msk.bf16.gmra.mxu0 %vm839_vm1, %v2200_v38  ;;  %v1122_v46 = vadd.f32 %v1121_v44, %v901_v40  ;;  %v2219_v44 = vld [vmem:[%s2413_s15 + $0x58] sm:$0xff] }
  0x98   : > { %2161 = vmatmul.msk.bf16.vlgmr.msra.gmra.mxu3 %vm839_vm1, %v2220_v39 }
  0x99   : > { %2076 = vmatmul.msk.bf16.gmra.mxu1 %vm839_vm1, %v2184_v42 }
  0x9a   : > { %2157 = vmatmul.msk.bf16.gmra.mxu2 %vm839_vm1, %v2216_v43  ;;  %v2187_v43 = vld [vmem:[%s2408_s12 + $0x58] sm:$0xff] }
  0x9b   : > { %v2480_v41 = vpop.f32.mrf.mxu3 }
  0x9c   : > { %v903_v45 = vpop.f32.mrf.mxu0 }
  0x9d   : > { %v1375_v48 = vpop.f32.mrf.mxu2 }
  0x9e   : > { %v1455_v50 = vadd.f32 %v1375_v48, %v1122_v46  ;;  %v1123_v54 = vpop.f32.mrf.mxu1 }
  0x9f   : > { %v1124_v58 = vadd.f32 %v1123_v54, %v903_v45  ;;  %v1528_v45 = vld [vmem:[%s2490_s20 + $0x28] sm:$0xff] }
  0xa0   : > { %v2503_v56 = vadd.f32 %v2495_v47, %v1455_v50 }
  0xa2   : > { %v1555_v57 = vadd.f32 %v1523_v53, %v2503_v56 }
  0xa3   : > { %v2497_v49 = vpop.f32.mrf.mxu3 }
  0xa4   : > { %v906_v55 = vpop.f32.mrf.mxu0  ;;  %1588 = vst.msk [vmem:[%s2508_s30] sm:$0xff] %vm1587_vm2, %v1555_v57  ;;  %v1529_v57 = vld [vmem:[%s2490_s20 + $0x30] sm:$0xff] }
  0xa5   : > { %v1377_v59 = vpop.f32.mrf.mxu2 }
  0xa6   : > { %v1456_v61 = vadd.f32 %v1377_v59, %v1124_v58  ;;  %v1126_v1 = vpop.f32.mrf.mxu1 }
  0xa7   : > { %1997 = vmatmul.msk.bf16.gmra.mxu0 %vm839_vm1, %v2201_v51  ;;  %v1127_v5 = vadd.f32 %v1126_v1, %v906_v55 }
  0xa8   : > { %2162 = vmatmul.msk.bf16.gmra.mxu3 %vm839_vm1, %v2221_v52  ;;  %v2521_v3 = vadd.f32 %v2495_v47, %v1456_v61 }
  0xa9   : > { %2077 = vmatmul.msk.bf16.gmra.mxu1 %vm839_vm1, %v2185_v62 }
  0xaa   : > { %v1556_v4 = vadd.f32 %v1524_v0, %v2521_v3  ;;  %2158 = vmatmul.msk.bf16.gmra.mxu2 %vm839_vm1, %v2217_v63 }
  0xab   : > { %v2515_v60 = vpop.f32.mrf.mxu3 }
  0xac   : > { %v908_v2 = vpop.f32.mrf.mxu0  ;;  %1589 = vst.msk [vmem:[%s2508_s30 + $0x8] sm:$0xff] %vm1587_vm2, %v1556_v4  ;;  %v1530_v4 = vld [vmem:[%s2490_s20 + $0x38] sm:$0xff] }
  0xad   : > { %v1380_v6 = vpop.f32.mrf.mxu2 }
  0xae   : > { %v1457_v8 = vadd.f32 %v1380_v6, %v1127_v5  ;;  %v1128_v12 = vpop.f32.mrf.mxu1 }
  0xaf   : > { %v1129_v16 = vadd.f32 %v1128_v12, %v908_v2 }
  0xb0   : > { %v2534_v14 = vadd.f32 %v2495_v47, %v1457_v8 }
  0xb2   : > { %v1557_v15 = vadd.f32 %v1525_v11, %v2534_v14 }
  0xb3   : > { %v2528_v7 = vpop.f32.mrf.mxu3 }
  0xb4   : > { %v911_v13 = vpop.f32.mrf.mxu0  ;;  %1590 = vst.msk [vmem:[%s2508_s30 + $0x10] sm:$0xff] %vm1587_vm2, %v1557_v15  ;;  %v1531_v15 = vld [vmem:[%s2490_s20 + $0x40] sm:$0xff] }
  0xb5   : > { %v1382_v17 = vpop.f32.mrf.mxu2 }
  0xb6   : > { %v1458_v19 = vadd.f32 %v1382_v17, %v1129_v16  ;;  %v1131_v23 = vpop.f32.mrf.mxu1 }
  0xb7   : > { %1998 = vmatmul.msk.bf16.gmra.mxu0 %vm839_vm1, %v2202_v9  ;;  %v1132_v27 = vadd.f32 %v1131_v23, %v911_v13 }
  0xb8   : > { %2163 = vmatmul.msk.bf16.gmra.mxu3 %vm839_vm1, %v2222_v10  ;;  %v2547_v25 = vadd.f32 %v2495_v47, %v1458_v19 }
  0xb9   : > { %2078 = vmatmul.msk.bf16.gmra.mxu1 %vm839_vm1, %v2186_v20 }
  0xba   : > { %v1558_v26 = vadd.f32 %v1526_v22, %v2547_v25  ;;  %2159 = vmatmul.msk.bf16.gmra.mxu2 %vm839_vm1, %v2218_v21 }
  0xbb   : > { %v2541_v18 = vpop.f32.mrf.mxu3 }
  0xbc   : > { %v913_v24 = vpop.f32.mrf.mxu0  ;;  %1591 = vst.msk [vmem:[%s2508_s30 + $0x18] sm:$0xff] %vm1587_vm2, %v1558_v26  ;;  %v1532_v26 = vld [vmem:[%s2490_s20 + $0x48] sm:$0xff] }
  0xbd   : > { %v1385_v28 = vpop.f32.mrf.mxu2 }
  0xbe   : > { %v1459_v30 = vadd.f32 %v1385_v28, %v1132_v27  ;;  %v1133_v34 = vpop.f32.mrf.mxu1 }
  0xbf   : > { %v1134_v38 = vadd.f32 %v1133_v34, %v913_v24 }
  0xc0   : > { %v2560_v36 = vadd.f32 %v2495_v47, %v1459_v30 }
  0xc2   : > { %v1559_v37 = vadd.f32 %v1527_v33, %v2560_v36 }
  0xc3   : > { %v2554_v29 = vpop.f32.mrf.mxu3 }
  0xc4   : > { %v916_v35 = vpop.f32.mrf.mxu0  ;;  %1592 = vst.msk [vmem:[%s2508_s30 + $0x20] sm:$0xff] %vm1587_vm2, %v1559_v37  ;;  %v1533_v37 = vld [vmem:[%s2490_s20 + $0x50] sm:$0xff] }
  0xc5   : > { %v1387_v39 = vpop.f32.mrf.mxu2 }
  0xc6   : > { %v1460_v42 = vadd.f32 %v1387_v39, %v1134_v38  ;;  %v1136_v46 = vpop.f32.mrf.mxu1 }
  0xc7   : > { %1999 = vmatmul.msk.bf16.gmra.mxu0 %vm839_vm1, %v2203_v31  ;;  %v1137_v52 = vadd.f32 %v1136_v46, %v916_v35 }
  0xc8   : > { %2164 = vmatmul.msk.bf16.gmra.mxu3 %vm839_vm1, %v2223_v32  ;;  %v2573_v50 = vadd.f32 %v2495_v47, %v1460_v42 }
  0xc9   : > { %2079 = vmatmul.msk.bf16.gmra.mxu1 %vm839_vm1, %v2187_v43 }
  0xca   : > { %v1560_v51 = vadd.f32 %v1528_v45, %v2573_v50  ;;  %2160 = vmatmul.msk.bf16.gmra.mxu2 %vm839_vm1, %v2219_v44 }
  0xcb   : > { %v2567_v40 = vpop.f32.mrf.mxu3 }
  0xcc   : > { %v918_v48 = vpop.f32.mrf.mxu0  ;;  %1593 = vst.msk [vmem:[%s2508_s30 + $0x28] sm:$0xff] %vm1587_vm2, %v1560_v51  ;;  %v1534_v51 = vld [vmem:[%s2490_s20 + $0x58] sm:$0xff] }
  0xcd   : > { %v1390_v53 = vpop.f32.mrf.mxu2 }
  0xce   : > { %v1461_v55 = vadd.f32 %v1390_v53, %v1137_v52  ;;  %v1138_v58 = vpop.f32.mrf.mxu1 }
  0xcf   : > { %v1139_v63 = vadd.f32 %v1138_v58, %v918_v48 }
  0xd0   : > { %v2584_v61 = vadd.f32 %v2495_v47, %v1461_v55 }
  0xd2   : > { %v1561_v62 = vadd.f32 %v1529_v57, %v2584_v61 }
  0xd3   : > { %v2580_v54 = vpop.f32.mrf.mxu3 }
  0xd4   : > { %v921_v59 = vpop.f32.mrf.mxu0  ;;  %1594 = vst.msk [vmem:[%s2508_s30 + $0x30] sm:$0xff] %vm1587_vm2, %v1561_v62 }
  0xd5   : > { %v1392_v0 = vpop.f32.mrf.mxu2 }
  0xd6   : > { %v1462_v2 = vadd.f32 %v1392_v0, %v1139_v63  ;;  %v1141_v5 = vpop.f32.mrf.mxu1  ;;  %v1535_v0 = vld [vmem:[%s2490_s20 + $0x60] sm:$0xff] }
  0xd7   : > { %v1142_v10 = vadd.f32 %v1141_v5, %v921_v59 }
  0xd8   : > { %v2593_v8 = vadd.f32 %v2495_v47, %v1462_v2 }
  0xda   : > { %v1562_v9 = vadd.f32 %v1530_v4, %v2593_v8 }
  0xdb   : > { %v2589_v1 = vpop.f32.mrf.mxu3 }
  0xdc   : > { %v923_v6 = vpop.f32.mrf.mxu0  ;;  %1595 = vst.msk [vmem:[%s2508_s30 + $0x38] sm:$0xff] %vm1587_vm2, %v1562_v9 }
  0xdd   : > { %v1395_v11 = vpop.f32.mrf.mxu2 }
  0xde   : > { %v1463_v13 = vadd.f32 %v1395_v11, %v1142_v10  ;;  %v1143_v16 = vpop.f32.mrf.mxu1 }
  0xdf   : > { %v1144_v21 = vadd.f32 %v1143_v16, %v923_v6 }
  0xe0   : > { %v2603_v19 = vadd.f32 %v2495_v47, %v1463_v13 }
  0xe2   : > { %v1563_v20 = vadd.f32 %v1531_v15, %v2603_v19  ;;  %v1536_v15 = vld [vmem:[%s2490_s20 + $0x68] sm:$0xff] }
  0xe3   : > { %v2599_v12 = vpop.f32.mrf.mxu3 }
  0xe4   : > { %v926_v17 = vpop.f32.mrf.mxu0  ;;  %1596 = vst.msk [vmem:[%s2508_s30 + $0x40] sm:$0xff] %vm1587_vm2, %v1563_v20 }
  0xe5   : > { %v1397_v22 = vpop.f32.mrf.mxu2 }
  0xe6   : > { %v1464_v24 = vadd.f32 %v1397_v22, %v1144_v21  ;;  %v1146_v27 = vpop.f32.mrf.mxu1 }
  0xe7   : > { %v1147_v32 = vadd.f32 %v1146_v27, %v926_v17 }
  0xe8   : > { %v2612_v30 = vadd.f32 %v2495_v47, %v1464_v24 }
  0xea   : > { %v1564_v31 = vadd.f32 %v1532_v26, %v2612_v30 }
  0xeb   : > { %v2608_v23 = vpop.f32.mrf.mxu3 }
  0xec   : > { %v928_v28 = vpop.f32.mrf.mxu0  ;;  %1597 = vst.msk [vmem:[%s2508_s30 + $0x48] sm:$0xff] %vm1587_vm2, %v1564_v31 }
  0xed   : > { %v1400_v33 = vpop.f32.mrf.mxu2 }
  0xee   : > { %v1465_v35 = vadd.f32 %v1400_v33, %v1147_v32  ;;  %v1148_v38 = vpop.f32.mrf.mxu1 }
  0xef   : > { %v1149_v44 = vadd.f32 %v1148_v38, %v928_v28  ;;  %v1537_v28 = vld [vmem:[%s2490_s20 + $0x70] sm:$0xff] }
  0xf0   : > { %v2621_v42 = vadd.f32 %v2495_v47, %v1465_v35 }
  0xf2   : > { %v1565_v43 = vadd.f32 %v1533_v37, %v2621_v42  ;;  %v1182_v37 = vadd.f32 %v2589_v1, %v2480_v41 }
  0xf3   : > { %v2617_v34 = vpop.f32.mrf.mxu3 }
  0xf4   : > { %v931_v39 = vpop.f32.mrf.mxu0  ;;  %1598 = vst.msk [vmem:[%s2508_s30 + $0x50] sm:$0xff] %vm1587_vm2, %v1565_v43 }
  0xf5   : > { %v1402_v45 = vpop.f32.mrf.mxu2 }
  0xf6   : > { %v1466_v48 = vadd.f32 %v1402_v45, %v1149_v44  ;;  %v1151_v52 = vpop.f32.mrf.mxu1 }
  0xf7   : > { %v1152_v58 = vadd.f32 %v1151_v52, %v931_v39  ;;  %v1547_v52 = vld [vmem:[%s2490_s20 + $0xc0] sm:$0xff] }
  0xf8   : > { %v2630_v55 = vadd.f32 %v2495_v47, %v1466_v48  ;;  %v1538_v48 = vld [vmem:[%s2490_s20 + $0x78] sm:$0xff] }
  0xfa   : > { %v1566_v57 = vadd.f32 %v1534_v51, %v2630_v55 }
  0xfb   : > { %v2626_v46 = vpop.f32.mrf.mxu3 }
  0xfc   : > { %v933_v53 = vpop.f32.mrf.mxu0  ;;  %1599 = vst.msk [vmem:[%s2508_s30 + $0x58] sm:$0xff] %vm1587_vm2, %v1566_v57 }
  0xfd   : > { %v1405_v59 = vpop.f32.mrf.mxu2 }
  0xfe   : > { %v1467_v63 = vadd.f32 %v1405_v59, %v1152_v58  ;;  %v1153_v2 = vpop.f32.mrf.mxu1 }
  0xff   : > { %v1154_v9 = vadd.f32 %v1153_v2, %v933_v53 }
 0x100   : > { %v2639_v5 = vadd.f32 %v2495_v47, %v1467_v63  ;;  %v1184_v63 = vadd.f32 %v2599_v12, %v2497_v49 }
 0x102   : > { %v1567_v6 = vadd.f32 %v1535_v0, %v2639_v5 }
 0x103   : > { %v2635_v62 = vpop.f32.mrf.mxu3 }
 0x104   : > { %v936_v4 = vpop.f32.mrf.mxu0  ;;  %1600 = vst.msk [vmem:[%s2508_s30 + $0x60] sm:$0xff] %vm1587_vm2, %v1567_v6 }
 0x105   : > { %v1407_v10 = vpop.f32.mrf.mxu2 }
 0x106   : > { %v1468_v13 = vadd.f32 %v1407_v10, %v1154_v9  ;;  %v1156_v16 = vpop.f32.mrf.mxu1  ;;  %v1539_v9 = vld [vmem:[%s2490_s20 + $0x80] sm:$0xff] }
 0x107   : > { %v1157_v22 = vadd.f32 %v1156_v16, %v936_v4 }
 0x108   : > { %v2648_v20 = vadd.f32 %v2495_v47, %v1468_v13  ;;  %v1548_v13 = vld [vmem:[%s2490_s20 + $0xc8] sm:$0xff] }
 0x10a   : > { %v1568_v21 = vadd.f32 %v1536_v15, %v2648_v20 }
 0x10b   : > { %v2644_v11 = vpop.f32.mrf.mxu3 }
 0x10c   : > { %v938_v17 = vpop.f32.mrf.mxu0  ;;  %1601 = vst.msk [vmem:[%s2508_s30 + $0x68] sm:$0xff] %vm1587_vm2, %v1568_v21  ;;  %v1187_v21 = vadd.f32 %v2608_v23, %v2515_v60 }
 0x10d   : > { %v1410_v24 = vpop.f32.mrf.mxu2 }
 0x10e   : > { %v1469_v27 = vadd.f32 %v1410_v24, %v1157_v22  ;;  %v1158_v31 = vpop.f32.mrf.mxu1 }
 0x10f   : > { %v1159_v38 = vadd.f32 %v1158_v31, %v938_v17 }
 0x110   : > { %v2657_v33 = vadd.f32 %v2495_v47, %v1469_v27 }
 0x112   : > { %v1569_v35 = vadd.f32 %v1537_v28, %v2657_v33 }
 0x113   : > { %v2653_v26 = vpop.f32.mrf.mxu3 }
 0x114   : > { %v941_v32 = vpop.f32.mrf.mxu0  ;;  %1602 = vst.msk [vmem:[%s2508_s30 + $0x70] sm:$0xff] %vm1587_vm2, %v1569_v35 }
 0x115   : > { %v1412_v39 = vpop.f32.mrf.mxu2 }
 0x116   : > { %v1470_v44 = vadd.f32 %v1412_v39, %v1159_v38  ;;  %v1161_v51 = vpop.f32.mrf.mxu1 }
 0x117   : > { %v1162_v58 = vadd.f32 %v1161_v51, %v941_v32  ;;  %v1540_v32 = vld [vmem:[%s2490_s20 + $0x88] sm:$0xff] }
 0x118   : > { %v2667_v57 = vadd.f32 %v2495_v47, %v1470_v44 }
 0x11a   : > { %v1570_v1 = vadd.f32 %v1538_v48, %v2667_v57 }
 0x11b   : > { %v1435_v43 = vpop.f32.mrf.mxu3 }
 0x11c   : > { %v1479_v45 = vadd.f32 %v1435_v43, %v1182_v37  ;;  %v943_v53 = vpop.f32.mrf.mxu0  ;;  %1603 = vst.msk [vmem:[%s2508_s30 + $0x78] sm:$0xff] %vm1587_vm2, %v1570_v1  ;;  %v1549_v37 = vld [vmem:[%s2490_s20 + $0xd0] sm:$0xff] }
 0x11d   : > { %v1415_v0 = vpop.f32.mrf.mxu2  ;;  %v1541_v1 = vld [vmem:[%s2490_s20 + $0x90] sm:$0xff] }
 0x11e   : > { %v2670_v41 = vadd.f32 %v2495_v47, %v1479_v45  ;;  %v1471_v4 = vadd.f32 %v1415_v0, %v1162_v58  ;;  %v1163_v10 = vpop.f32.mrf.mxu1  ;;  %v1189_v45 = vadd.f32 %v2617_v34, %v2528_v7 }
 0x11f   : > { %v1164_v22 = vadd.f32 %v1163_v10, %v943_v53 }
 0x120   : > { %v1579_v59 = vadd.f32 %v1547_v52, %v2670_v41  ;;  %v2683_v16 = vadd.f32 %v2495_v47, %v1471_v4  ;;  %v1192_v4 = vadd.f32 %v2626_v46, %v2541_v18 }
 0x122   : > { %1612 = vst.msk [vmem:[%s2508_s30 + $0xc0] sm:$0xff] %vm1587_vm2, %v1579_v59  ;;  %v1571_v12 = vadd.f32 %v1539_v9, %v2683_v16  ;;  %v1550_v59 = vld [vmem:[%s2490_s20 + $0xd8] sm:$0xff] }
 0x123   : > { %v1437_v2 = vpop.f32.mrf.mxu3 }
 0x124   : > { %v1480_v6 = vadd.f32 %v1437_v2, %v1184_v63  ;;  %v946_v15 = vpop.f32.mrf.mxu0  ;;  %1604 = vst.msk [vmem:[%s2508_s30 + $0x80] sm:$0xff] %vm1587_vm2, %v1571_v12  ;;  %v1542_v12 = vld [vmem:[%s2490_s20 + $0x98] sm:$0xff] }
 0x125   : > { %v1417_v24 = vpop.f32.mrf.mxu2 }
 0x126   : > { %v2686_v49 = vadd.f32 %v2495_v47, %v1480_v6  ;;  %v1472_v28 = vadd.f32 %v1417_v24, %v1164_v22  ;;  %v1166_v35 = vpop.f32.mrf.mxu1 }
 0x127   : > { %v1167_v43 = vadd.f32 %v1166_v35, %v946_v15 }
 0x128   : > { %v1580_v17 = vadd.f32 %v1548_v13, %v2686_v49  ;;  %v2699_v38 = vadd.f32 %v2495_v47, %v1472_v28  ;;  %v1194_v28 = vadd.f32 %v2635_v62, %v2554_v29 }
 0x12a   : > { %1613 = vst.msk [vmem:[%s2508_s30 + $0xc8] sm:$0xff] %vm1587_vm2, %v1580_v17  ;;  %v1572_v39 = vadd.f32 %v1540_v32, %v2699_v38 }
 0x12b   : > { %v1440_v27 = vpop.f32.mrf.mxu3 }
 0x12c   : > { %v1481_v31 = vadd.f32 %v1440_v27, %v1187_v21  ;;  %v948_v23 = vpop.f32.mrf.mxu0  ;;  %1605 = vst.msk [vmem:[%s2508_s30 + $0x88] sm:$0xff] %vm1587_vm2, %v1572_v39  ;;  %v1551_v21 = vld [vmem:[%s2490_s20 + $0xe0] sm:$0xff] }
 0x12d   : > { %v1420_v48 = vpop.f32.mrf.mxu2  ;;  %v1543_v39 = vld [vmem:[%s2490_s20 + $0xa0] sm:$0xff] }
 0x12e   : > { %v2702_v60 = vadd.f32 %v2495_v47, %v1481_v31  ;;  %v1473_v52 = vadd.f32 %v1420_v48, %v1167_v43  ;;  %v1168_v58 = vpop.f32.mrf.mxu1 }
 0x12f   : > { %v1169_v6 = vadd.f32 %v1168_v58, %v948_v23 }
 0x130   : > { %v1581_v44 = vadd.f32 %v1549_v37, %v2702_v60  ;;  %v2715_v63 = vadd.f32 %v2495_v47, %v1473_v52 }
 0x132   : > { %1614 = vst.msk [vmem:[%s2508_s30 + $0xd0] sm:$0xff] %vm1587_vm2, %v1581_v44  ;;  %v1573_v34 = vadd.f32 %v1541_v1, %v2715_v63  ;;  %v1552_v44 = vld [vmem:[%s2490_s20 + $0xe8] sm:$0xff] }
 0x133   : > { %v1442_v51 = vpop.f32.mrf.mxu3 }
 0x134   : > { %v1482_v53 = vadd.f32 %v1442_v51, %v1189_v45  ;;  %v951_v2 = vpop.f32.mrf.mxu0  ;;  %1606 = vst.msk [vmem:[%s2508_s30 + $0x90] sm:$0xff] %vm1587_vm2, %v1573_v34  ;;  %v1197_v51 = vadd.f32 %v2644_v11, %v2567_v40  ;;  %v1544_v34 = vld [vmem:[%s2490_s20 + $0xa8] sm:$0xff] }
 0x135   : > { %v1422_v9 = vpop.f32.mrf.mxu2 }
 0x136   : > { %v2718_v7 = vadd.f32 %v2495_v47, %v1482_v53  ;;  %v1474_v13 = vadd.f32 %v1422_v9, %v1169_v6  ;;  %v1171_v17 = vpop.f32.mrf.mxu1 }
 0x137   : > { %v1172_v24 = vadd.f32 %v1171_v17, %v951_v2 }
 0x138   : > { %v1582_v0 = vadd.f32 %v1550_v59, %v2718_v7  ;;  %v2731_v22 = vadd.f32 %v2495_v47, %v1474_v13  ;;  %v1199_v13 = vadd.f32 %v2653_v26, %v2580_v54 }
 0x13a   : > { %1615 = vst.msk [vmem:[%s2508_s30 + $0xd8] sm:$0xff] %vm1587_vm2, %v1582_v0  ;;  %v1574_v46 = vadd.f32 %v1542_v12, %v2731_v22 }
 0x13b   : > { %v1445_v10 = vpop.f32.mrf.mxu3 }
 0x13c   : > { %v1483_v15 = vadd.f32 %v1445_v10, %v1192_v4  ;;  %1607 = vst.msk [vmem:[%s2508_s30 + $0x98] sm:$0xff] %vm1587_vm2, %v1574_v46  ;;  %v953_v31 = vpop.f32.mrf.mxu0  ;;  %v1553_v4 = vld [vmem:[%s2490_s20 + $0xf0] sm:$0xff] }
 0x13d   : > { %v1425_v32 = vpop.f32.mrf.mxu2  ;;  %v1545_v46 = vld [vmem:[%s2490_s20 + $0xb0] sm:$0xff] }
 0x13e   : > { %v2734_v18 = vadd.f32 %v2495_v47, %v1483_v15  ;;  %v1475_v37 = vadd.f32 %v1425_v32, %v1172_v24  ;;  %v1173_v43 = vpop.f32.mrf.mxu1  ;;  %v1554_v24 = vld [vmem:[%s2490_s20 + $0xf8] sm:$0xff] }
 0x13f   : > { %v1174_v52 = vadd.f32 %v1173_v43, %v953_v31 }
 0x140   : > { %v1583_v27 = vadd.f32 %v1551_v21, %v2734_v18  ;;  %v2747_v45 = vadd.f32 %v2495_v47, %v1475_v37 }
 0x142   : > { %1616 = vst.msk [vmem:[%s2508_s30 + $0xe0] sm:$0xff] %vm1587_vm2, %v1583_v27  ;;  %v1575_v62 = vadd.f32 %v1543_v39, %v2747_v45  ;;  %v1546_v39 = vld [vmem:[%s2490_s20 + $0xb8] sm:$0xff] }
 0x143   : > { %v1447_v35 = vpop.f32.mrf.mxu3 }
 0x144   : > { %v1484_v23 = vadd.f32 %v1447_v35, %v1194_v28  ;;  %1608 = vst.msk [vmem:[%s2508_s30 + $0xa0] sm:$0xff] %vm1587_vm2, %v1575_v62  ;;  %v956_v0 = vpop.f32.mrf.mxu0  ;;  %v2319_v62 = vmov (%p1620_p11), 0.0  }
 0x145   : > { %v1427_v53 = vpop.f32.mrf.mxu2  ;;  %1627 = vst.msk [vmem:[#allocation2] sm:$0x1] (%p1620_p11), %vm1626_vm3, %v2319_v62 }
 0x146   : > { %v2750_v29 = vadd.f32 %v2495_v47, %v1484_v23  ;;  %v1476_v58 = vadd.f32 %v1427_v53, %v1174_v52  ;;  %v1176_v2 = vpop.f32.mrf.mxu1 }
 0x147   : > { %v1177_v9 = vadd.f32 %v1176_v2, %v956_v0 }
 0x148   : > { %v1584_v48 = vadd.f32 %v1552_v44, %v2750_v29  ;;  %v2763_v6 = vadd.f32 %v2495_v47, %v1476_v58 }
 0x14a   : > { %1617 = vst.msk [vmem:[%s2508_s30 + $0xe8] sm:$0xff] %vm1587_vm2, %v1584_v48  ;;  %v1576_v11 = vadd.f32 %v1544_v34, %v2763_v6 }
 0x14b   : > { %v1450_v1 = vpop.f32.mrf.mxu3 }
 0x14c   : > { %v1485_v59 = vadd.f32 %v1450_v1, %v1197_v51  ;;  %1609 = vst.msk [vmem:[%s2508_s30 + $0xa8] sm:$0xff] %vm1587_vm2, %v1576_v11  ;;  %v958_v54 = vpop.f32.mrf.mxu0 }
 0x14d   : > { %v1430_v15 = vpop.f32.mrf.mxu2 }
 0x14e   : > { %v2766_v40 = vadd.f32 %v2495_v47, %v1485_v59  ;;  %v1477_v17 = vadd.f32 %v1430_v15, %v1177_v9  ;;  %v1178_v26 = vpop.f32.mrf.mxu1 }
 0x14f   : > { %v1179_v35 = vadd.f32 %v1178_v26, %v958_v54 }
 0x150   : > { %v1585_v10 = vadd.f32 %v1553_v4, %v2766_v40  ;;  %v2779_v27 = vadd.f32 %v2495_v47, %v1477_v17 }
 0x152   : > { %1618 = vst.msk [vmem:[%s2508_s30 + $0xf0] sm:$0xff] %vm1587_vm2, %v1585_v10  ;;  %v1577_v31 = vadd.f32 %v1545_v46, %v2779_v27 }
 0x153   : > { %v1452_v12 = vpop.f32.mrf.mxu3 }
 0x154   : > { %v1486_v21 = vadd.f32 %v1452_v12, %v1199_v13  ;;  %1610 = vst.msk [vmem:[%s2508_s30 + $0xb0] sm:$0xff] %vm1587_vm2, %v1577_v31 }
 0x155   : > { %v1432_v37 = vpop.f32.mrf.mxu2 }
 0x156   : > { %v2782_v28 = vadd.f32 %v2495_v47, %v1486_v21  ;;  %v1478_v23 = vadd.f32 %v1432_v37, %v1179_v35 }
 0x158   : > { %v1586_v32 = vadd.f32 %v1554_v24, %v2782_v28  ;;  %v1514_v43 = vadd.f32 %v2495_v47, %v1478_v23  ;;  %1625 = sbr.rel (!%p1620_p11) target bundleno = 349 (0x15d), region = 48 }
 0x15a   : > { %1619 = vst.msk [vmem:[%s2508_s30 + $0xf8] sm:$0xff] %vm1587_vm2, %v1586_v32  ;;  %v1578_v44 = vadd.f32 %v1546_v39, %v1514_v43 }
 0x15c   : > { %1611 = vst.msk [vmem:[%s2508_s30 + $0xb8] sm:$0xff] %vm1587_vm2, %v1578_v44 }
 0x15d PF: > { %vm1629_vm4 = vcmask 64544   ;;  %p1706_p12 = scmp.eq.s32.totalorder %s2309_s24, 1  ;;  %s2320_s8 = smov 124   ;;  %vm1704_vm5 = vcmask 24576  }
 0x15e   : > { %v1630_v48 = vsel %vm1629_vm4, %v2503_v56, 0.0  ;;  %v1631_v51 = vsel %vm1629_vm4, %v2521_v3, 0.0  ;;  %v1633_v47 = vsel %vm1629_vm4, %v2534_v14, 0.0  ;;  %v1635_v53 = vsel %vm1629_vm4, %v2547_v25, 0.0 }
 0x15f   : > { %v1632_v52 = vadd.f32 %v1631_v51, %v1630_v48  ;;  %v1637_v58 = vsel %vm1629_vm4, %v2560_v36, 0.0  ;;  %v1639_v34 = vsel %vm1629_vm4, %v2573_v50, 0.0  ;;  %v1641_v56 = vsel %vm1629_vm4, %v2584_v61, 0.0 }
 0x160   : > { %v1643_v14 = vsel %vm1629_vm4, %v2593_v8, 0.0  ;;  %v1645_v25 = vsel %vm1629_vm4, %v2603_v19, 0.0  ;;  %v1647_v36 = vsel %vm1629_vm4, %v2612_v30, 0.0  ;;  %v1649_v50 = vsel %vm1629_vm4, %v2621_v42, 0.0 }
 0x161   : > { %v1634_v1 = vadd.f32 %v1633_v47, %v1632_v52  ;;  %v1651_v61 = vsel %vm1629_vm4, %v2630_v55, 0.0  ;;  %v1653_v8 = vsel %vm1629_vm4, %v2639_v5, 0.0  ;;  %v1655_v19 = vsel %vm1629_vm4, %v2648_v20, 0.0 }
 0x162   : > { %v1657_v30 = vsel %vm1629_vm4, %v2657_v33, 0.0  ;;  %v1659_v42 = vsel %vm1629_vm4, %v2667_v57, 0.0  ;;  %v1661_v55 = vsel %vm1629_vm4, %v2683_v16, 0.0  ;;  %v1663_v5 = vsel %vm1629_vm4, %v2699_v38, 0.0 }
 0x163   : > { %v1636_v59 = vadd.f32 %v1635_v53, %v1634_v1  ;;  %v1665_v20 = vsel %vm1629_vm4, %v2715_v63, 0.0  ;;  %v1667_v33 = vsel %vm1629_vm4, %v2731_v22, 0.0  ;;  %v1669_v57 = vsel %vm1629_vm4, %v2747_v45, 0.0 }
 0x164   : > { %v1671_v16 = vsel %vm1629_vm4, %v2763_v6, 0.0  ;;  %v1673_v38 = vsel %vm1629_vm4, %v2779_v27, 0.0  ;;  %v1675_v35 = vsel %vm1629_vm4, %v1514_v43, 0.0  ;;  %v1677_v37 = vsel %vm1629_vm4, %v2670_v41, 0.0 }
 0x165   : > { %v1638_v0 = vadd.f32 %v1637_v58, %v1636_v59  ;;  %v1679_v23 = vsel %vm1629_vm4, %v2686_v49, 0.0  ;;  %v1681_v6 = vsel %vm1629_vm4, %v2702_v60, 0.0  ;;  %v1683_v27 = vsel %vm1629_vm4, %v2718_v7, 0.0 }
 0x166   : > { %v1685_v43 = vsel %vm1629_vm4, %v2734_v18, 0.0  ;;  %v1687_v41 = vsel %vm1629_vm4, %v2750_v29, 0.0  ;;  %v1689_v49 = vsel %vm1629_vm4, %v2766_v40, 0.0  ;;  %v1691_v60 = vsel %vm1629_vm4, %v2782_v28, 0.0  ;;  %v1628_v29 = vld [vmem:[#allocation2] sm:$0x1] }
 0x167   : > { %v1640_v3 = vadd.f32 %v1639_v34, %v1638_v0 }
 0x169   : > { %v1642_v2 = vadd.f32 %v1641_v56, %v1640_v3 }
 0x16b   : > { %v1644_v4 = vadd.f32 %v1643_v14, %v1642_v2 }
 0x16d   : > { %v1646_v11 = vadd.f32 %v1645_v25, %v1644_v4 }
 0x16f   : > { %v1648_v9 = vadd.f32 %v1647_v36, %v1646_v11 }
 0x171   : > { %v1650_v10 = vadd.f32 %v1649_v50, %v1648_v9 }
 0x173   : > { %v1652_v13 = vadd.f32 %v1651_v61, %v1650_v10 }
 0x175   : > { %v1654_v15 = vadd.f32 %v1653_v8, %v1652_v13 }
 0x177   : > { %v1656_v12 = vadd.f32 %v1655_v19, %v1654_v15 }
 0x179   : > { %v1658_v17 = vadd.f32 %v1657_v30, %v1656_v12 }
 0x17b   : > { %v1660_v21 = vadd.f32 %v1659_v42, %v1658_v17 }
 0x17d   : > { %v1662_v46 = vadd.f32 %v1661_v55, %v1660_v21 }
 0x17f   : > { %v1664_v24 = vadd.f32 %v1663_v5, %v1662_v46 }
 0x181   : > { %v1666_v54 = vadd.f32 %v1665_v20, %v1664_v24 }
 0x183   : > { %v1668_v26 = vadd.f32 %v1667_v33, %v1666_v54 }
 0x185   : > { %v1670_v31 = vadd.f32 %v1669_v57, %v1668_v26 }
 0x187   : > { %v1672_v32 = vadd.f32 %v1671_v16, %v1670_v31 }
 0x189   : > { %v1674_v63 = vadd.f32 %v1673_v38, %v1672_v32 }
 0x18b   : > { %v1676_v22 = vadd.f32 %v1675_v35, %v1674_v63 }
 0x18d   : > { %v1678_v45 = vadd.f32 %v1677_v37, %v1676_v22 }
 0x18f   : > { %v1680_v39 = vadd.f32 %v1679_v23, %v1678_v45 }
 0x191   : > { %v1682_v44 = vadd.f32 %v1681_v6, %v1680_v39 }
 0x193   : > { %v1684_v62 = vadd.f32 %v1683_v27, %v1682_v44 }
 0x195   : > { %v1686_v48 = vadd.f32 %v1685_v43, %v1684_v62 }
 0x197   : > { %v1688_v51 = vadd.f32 %v1687_v41, %v1686_v48 }
 0x199   : > { %v1690_v47 = vadd.f32 %v1689_v49, %v1688_v51 }
 0x19b   : > { %v1692_v52 = vadd.f32 %v1691_v60, %v1690_v47 }
 0x19d   : > { %v1693_v53 = vrot.slane %v1692_v52, 4 }
 0x19f   : > { %v1694_v7 = vadd.f32 %v1693_v53, %v1692_v52 }
 0x1a1   : > { %v1695_v1 = vrot.slane %v1694_v7, 2 }
 0x1a3   : > { %v1696_v58 = vadd.f32 %v1695_v1, %v1694_v7 }
 0x1a5   : > { %v1697_v18 = vrot.slane %v1696_v58, 1 }
 0x1a7   : > { %v1698_v59 = vadd.f32 %v1697_v18, %v1696_v58 }
 0x1a9   : > { %1700 = vrot.lane.b32.xlu0 %v1698_v59, %s2320_s8 }
 0x21a   : > { %1710 = sbr.rel (!%p1706_p12) target bundleno = 553 (0x229), region = 52 }
 0x21b   : > { %v1701_v34 = vpop.permute.xlu0 %1700 }
 0x21c   : > { %v1703_v0 = vadd.f32 %v1701_v34, %v1628_v29 }
 0x21e   : > { %1705 = vst.msk [vmem:[#allocation2] sm:$0x1] %vm1704_vm5, %v1703_v0 }
 0x225   : > { %v1711_v40 = vld [vmem:[#allocation2] sm:$0x1] }
 0x226   : > { %v1712_v56 = vmul.f32 0.001953125, %v1711_v40 }
 0x228   : > { %1713 = vst.msk [vmem:[#allocation3] sm:$0x1] %vm1704_vm5, %v1712_v56 }
 0x229 PF: > { %p2233_p13 = scmp.eq.s32.totalorder %s1881_s27, 1  ;;  %s1735_s10 = sshll.u32 %s2881_s7, 4  ;;  %s1736_s10 = int_to_ptr.hbm [resolvable:$true] %s1735_s10 }
 0x22a   : > { %s2321_s11 = smov [#allocation3]  }
 0x22b   : > { %s1733_s12 = sshll.u32 %s2321_s11, 4  ;;  %s1734_s12 = int_to_ptr.vmem [resolvable:$true] %s1733_s12 }
 0x22c   : > { %2230 = dma.vmem_to_hbm [thread:$0]  (%p2233_p13), %s1734_s12, 16, %s1736_s10, [#allocation4]  }
 0x22d   : > { %2304 = dma.done.wait (%p2233_p13), [#allocation4], 16  }
 0x22e   : > { %2306 = vsyncadd (%p2233_p13), [#allocation4], 4294967280 }
 0x22f PF: > { %s19_s26 = sadd.s32 1, %s2317_s26   ;;  %s2882_s24 = smov %s2313_s25 }
 0x230   : > { %p16_p0 = scmp.ge.s32.totalorder %s19_s26, 4   ;;  %s2883_s25 = smov %s2885_s28 }
 0x232   :  { %18 = sbr.rel (!%p16_p0) target bundleno = 2 (0x2), region = 102 }
 0x237   :  { %1761 = vsyncpa [#allocation4], 1 }
 0x238   :  { %1763 = vsyncpa [#allocation4 + $0x1], 1 }

// kernel: prompt_block_forward.2
= control target key start
LH: loop header
LB: loop body
LE: loop exit
PB: predicated region body
PF: predicated region fallthrough
CT: control target
= control target key end

     0   :  { %s2977_s21 = smov 0   ;;  %s4578_s0 = inlined_call_operand.vmem [shape: bf16[2,18,18,8], index: 0, kind: input, shape index: {}]   ;;  %s4579_s1 = inlined_call_operand.vmem [shape: bf16[9,8,8], index: 1, kind: input, shape index: {}]   ;;  %s4580_s2 = inlined_call_operand.vmem [shape: f32[1,8], index: 2, kind: input, shape index: {}]   ;;  %s4581_s3 = inlined_call_operand.vmem [shape: bf16[4,4], index: 3, kind: input, shape index: {}]   ;;  %s4582_s4 = inlined_call_operand.vmem [shape: f32[1,4], index: 4, kind: input, shape index: {}]   ;;  %s4583_s5 = inlined_call_operand.vmem [shape: bf16[2,256,8], index: 5, kind: output, shape index: {0}]   ;;  %s4584_s6 = inlined_call_operand.vmem [shape: f32[2,256,4], index: 6, kind: output, shape index: {1}]  }
   0x1 LB: > { %s2534_s22 = sadd.s32 4294967295, %s2940_s21   ;;  %p2538_p0 = scmp.ge.s32.totalorder %s2940_s21, 1  ;;  %s2940_s21 = sphi %s2977_s21, %s17_s21  }
   0x2   : > { %p215_p1 = scmp.lt.s32.totalorder %s2940_s21, 3 }
   0x4   : > { %p216_p2 = pnand %p2538_p0, %p215_p1 }
   0x6   : > { %219 = sbr.rel (%p216_p2) target bundleno = 800 (0x320), region = 40 }
   0xb   : > { %v2544_v0 = vld [vmem:[%s4579_s1 + $0x4] sm:$0xff]   ;;  %v373_v1 = vld [vmem:[%s4579_s1] sm:$0xf]  ;;  %p250_p3 = scmp.lt.s32.totalorder %s2534_s22, 1  ;;  %v2642_v5 = vld [vmem:[%s4579_s1 + $0xc] sm:$0xff]   ;;  %vm507_vm0 = vcmask 64512  }
   0xc   : > { %v506_v2 = vunpack.c.l.bf16 %v2544_v0  ;;  %v374_v3 = vunpack.c.l.bf16 %v373_v1  ;;  %v945_v4 = vunpack.c.h.bf16 %v2544_v0  ;;  %v2997_v6 = vld [vmem:[%s4579_s1 + $0x14] sm:$0xff]   ;;  %v1157_v7 = vunpack.c.l.bf16 %v2642_v5 }
   0xd   : > { %s4931_s22 = smov (!%p250_p3, %s2534_s22), 1  ;;  %v1317_v8 = vunpack.c.h.bf16 %v2642_v5  ;;  %v1474_v9 = vunpack.c.l.bf16 %v2997_v6  ;;  %vm423_vm1 = vcmask 1046528   ;;  %vm2297_vm2 = vcmask 1043456  }
   0xe   : > { %2921 = vmatpush.msra.mxu2 %v506_v2  ;;  %2922 = vmatpush.msra.mxu3 %v374_v3  ;;  %s2923_s7 = smul.u32 216, %s4931_s22  ;;  %vm862_vm3 = vcmask 1045504   ;;  %vm2232_vm4 = vcmask 31744   ;;  %s2876_s15 = sshll.u32 %s4931_s22, 8  ;;  %vm2193_vm5 = vcmask 60416  }
   0xf   : > { %587 = vmatpush.msra.mxu0 %v506_v2  ;;  %764 = vmatpush.msra.mxu1 %v374_v3  ;;  %s4207_s20 = scalar_lea.vmem %s4584_s6, %s2876_s15  ;;  %s2875_s25 = sshll.u32 %s4931_s22, 7 }
  0x10   : > { %1025 = vmatpush.msrb.mxu2 %v945_v4  ;;  %1179 = vmatpush.msrb.mxu3 %v1157_v7  ;;  %s3006_s10 = scalar_lea.vmem %s4578_s0, %s2923_s7  ;;  %s4247_s28 = scalar_lea.vmem %s4583_s5, %s2875_s25 }
  0x11   : > { %1337 = vmatpush.msrb.mxu0 %v1317_v8  ;;  %1494 = vmatpush.msrb.mxu1 %v1474_v9  ;;  %v2916_v10 = vld [vmem:[%s3006_s10 + $0x60] sm:$0xff]   ;;  %v3010_v11 = vld [vmem:[%s3006_s10 + $0x68] sm:$0x1]  ;;  %v292_v27 = vld [vmem:[%s3006_s10 + $0x6c] sm:$0xff]  }
  0x12   : > { %v2878_v12 = vld [vmem:[%s3006_s10] sm:$0xff]   ;;  %v3013_v13 = vunpack.c.l.bf16 %v2916_v10  ;;  %v3015_v14 = vunpack.c.h.bf16 %v2916_v10  ;;  %v3020_v16 = vld [vmem:[%s3006_s10 + $0x8] sm:$0x1]  ;;  %v4589_v20 = vunpack.c.l.bf16 %v3010_v11  ;;  %v268_v29 = vld [vmem:[%s3006_s10 + $0xc] sm:$0xff]   ;;  %v3052_v31 = vunpack.c.l.bf16 %v292_v27 }
  0x13   : > { %v3017_v15 = vunpack.c.l.bf16 %v2878_v12  ;;  %v3022_v17 = vunpack.c.h.bf16 %v2878_v12  ;;  %v4593_v23 = vunpack.c.l.bf16 %v3020_v16  ;;  %v3054_v32 = vunpack.c.h.bf16 %v292_v27  ;;  %v3069_v38 = vld [vmem:[%s3006_s10 + $0x74] sm:$0x1]  ;;  %v2917_v47 = vld [vmem:[%s3006_s10 + $0x78] sm:$0xff]   ;;  %v3123_v58 = vld [vmem:[%s3006_s10 + $0x80] sm:$0x1] }
  0x14   : > { %4708 = vst [vmem:[#allocation2_spill] sm:$0xff] %v3013_v13  ;;  %v464_v18 = vrot.slane %v3013_v13, 1  ;;  %v465_v19 = vrot.slane %v3015_v14, 1  ;;  %2593 = vmatmul.msk.f32.vlgmr.msra.gmra.mxu3 %vm507_vm0, %v3013_v13  ;;  %v467_v26 = vrot.slane %v4589_v20, 1  ;;  %v3059_v34 = vunpack.c.l.bf16 %v268_v29  ;;  %v3074_v41 = vld [vmem:[%s3006_s10 + $0x14] sm:$0x1] }
  0x15   : > { %4709 = vst [vmem:[#allocation3_spill] sm:$0xff] %v3015_v14  ;;  %v424_v21 = vrot.slane %v3017_v15, 1  ;;  %2577 = vmatmul.msk.f32.vlgmr.msra.gmra.mxu1 %vm507_vm0, %v3017_v15  ;;  %v425_v22 = vrot.slane %v3022_v17, 1  ;;  %v427_v28 = vrot.slane %v4593_v23, 1  ;;  %v3061_v35 = vunpack.c.h.bf16 %v268_v29  ;;  %v2913_v49 = vld [vmem:[%s3006_s10 + $0x18] sm:$0xff]   ;;  %v298_v3 = vld [vmem:[%s3006_s10 + $0x84] sm:$0xff]  }
  0x16   : > { %v3035_v24 = vsel %vm423_vm1, %v464_v18, %v465_v19  ;;  %v3048_v30 = vsel %vm423_vm1, %v465_v19, %v467_v26  ;;  %4712 = vst [vmem:[#allocation6_spill] sm:$0xff] %v3052_v31  ;;  %v469_v36 = vrot.slane %v3052_v31, 1  ;;  %v470_v37 = vrot.slane %v3054_v32, 1  ;;  %v3128_v61 = vld [vmem:[%s3006_s10 + $0x20] sm:$0x1]  ;;  %v274_v5 = vld [vmem:[%s3006_s10 + $0x24] sm:$0xff]  }
  0x17   : > { %4710 = vst [vmem:[#allocation4_spill] sm:$0xff] %v3035_v24  ;;  %2561 = vmatmul.msk.f32.vlgmr.msra.gmra.mxu2 %vm507_vm0, %v3035_v24  ;;  %v426_v25 = vsel %vm423_vm1, %v424_v21, %v425_v22  ;;  %v428_v33 = vsel %vm423_vm1, %v425_v22, %v427_v28  ;;  %v429_v39 = vrot.slane %v3059_v34, 1  ;;  %v430_v40 = vrot.slane %v3061_v35, 1  ;;  %v3177_v22 = vld [vmem:[%s3006_s10 + $0x8c] sm:$0x1] }
  0x18   : > { %2545 = vmatmul.msk.f32.vlgmr.msra.gmra.mxu0 %vm507_vm0, %v426_v25  ;;  %4711 = vst [vmem:[#allocation5_spill] sm:$0xff] %v3048_v30  ;;  %v3077_v42 = vsel %vm423_vm1, %v469_v36, %v470_v37  ;;  %v4588_v43 = vunpack.c.l.bf16 %v3069_v38  ;;  %v4594_v45 = vunpack.c.l.bf16 %v3074_v41  ;;  %v3103_v51 = vunpack.c.l.bf16 %v2917_v47  ;;  %v3182_v27 = vld [vmem:[%s3006_s10 + $0x2c] sm:$0x1] }
  0x19   : > { %4713 = vst [vmem:[#allocation7_spill] sm:$0xff] %v3054_v32  ;;  %v3085_v44 = vsel %vm423_vm1, %v429_v39, %v430_v40  ;;  %v3105_v52 = vunpack.c.h.bf16 %v2917_v47  ;;  %v3112_v54 = vunpack.c.l.bf16 %v2913_v49  ;;  %v3114_v55 = vunpack.c.h.bf16 %v2913_v49  ;;  %v2918_v39 = vld [vmem:[%s3006_s10 + $0x90] sm:$0xff]  }
  0x1a   : > { %4714 = vst [vmem:[#allocation8_spill] sm:$0xff] %v3077_v42  ;;  %v472_v46 = vrot.slane %v4588_v43, 1  ;;  %v432_v48 = vrot.slane %v4594_v45, 1  ;;  %v474_v56 = vrot.slane %v3103_v51, 1  ;;  %v4586_v63 = vunpack.c.l.bf16 %v3123_v58  ;;  %v2919_v45 = vld [vmem:[%s3006_s10 + $0xa8] sm:$0xff]  }
  0x1b   : > { %4715 = vst [vmem:[#allocation9_spill] sm:$0xff] %v3105_v52  ;;  %v475_v57 = vrot.slane %v3105_v52, 1  ;;  %v434_v59 = vrot.slane %v3112_v54, 1  ;;  %v435_v60 = vrot.slane %v3114_v55, 1  ;;  %v4592_v1 = vunpack.c.l.bf16 %v3128_v61 }
  0x1c   : > { %2594 = vmatmul.msk.f32.gmra.mxu3 %vm507_vm0, %v3015_v14  ;;  %v3099_v50 = vsel %vm423_vm1, %v470_v37, %v472_v46  ;;  %v3110_v53 = vsel %vm423_vm1, %v430_v40, %v432_v48  ;;  %4717 = vst [vmem:[#allocation11_spill] sm:$0xff] %v3114_v55  ;;  %v477_v2 = vrot.slane %v4586_v63, 1  ;;  %v3157_v8 = vunpack.c.l.bf16 %v298_v3  ;;  %v2914_v46 = vld [vmem:[%s3006_s10 + $0x30] sm:$0xff]  }
  0x1d   : > { %2578 = vmatmul.msk.f32.gmra.mxu1 %vm507_vm0, %v3022_v17  ;;  %4716 = vst [vmem:[#allocation10_spill] sm:$0xff] %v3110_v53  ;;  %v3131_v62 = vsel %vm423_vm1, %v474_v56, %v475_v57  ;;  %v3139_v0 = vsel %vm423_vm1, %v434_v59, %v435_v60  ;;  %v437_v4 = vrot.slane %v4592_v1, 1  ;;  %v3159_v9 = vunpack.c.h.bf16 %v298_v3  ;;  %v3231_v3 = vld [vmem:[%s3006_s10 + $0x98] sm:$0x1] }
  0x1e   : > { %4718 = vst [vmem:[#allocation12_spill] sm:$0xff] %v3131_v62  ;;  %v3153_v7 = vsel %vm423_vm1, %v475_v57, %v477_v2  ;;  %v3166_v12 = vunpack.c.l.bf16 %v274_v5  ;;  %v3168_v18 = vunpack.c.h.bf16 %v274_v5  ;;  %v479_v19 = vrot.slane %v3157_v8, 1 }
  0x1f   : > { %2562 = vmatmul.msk.f32.gmra.mxu2 %vm507_vm0, %v3048_v30  ;;  %4719 = vst [vmem:[#allocation13_spill] sm:$0xff] %v3153_v7  ;;  %v3164_v10 = vsel %vm423_vm1, %v435_v60, %v437_v4  ;;  %v480_v21 = vrot.slane %v3159_v9, 1  ;;  %v4585_v29 = vunpack.c.l.bf16 %v3177_v22  ;;  %v4591_v36 = vunpack.c.l.bf16 %v3182_v27 }
  0x20   : > { %2546 = vmatmul.msk.f32.gmra.mxu0 %vm507_vm0, %v428_v33  ;;  %4720 = vst [vmem:[#allocation14_spill] sm:$0xff] %v3157_v8  ;;  %v439_v25 = vrot.slane %v3166_v12, 1  ;;  %v440_v26 = vrot.slane %v3168_v18, 1  ;;  %v3211_v48 = vunpack.c.l.bf16 %v2918_v39  ;;  %v3213_v49 = vunpack.c.h.bf16 %v2918_v39 }
  0x21   : > { %4721 = vst [vmem:[#allocation15_spill] sm:$0xff] %v3159_v9  ;;  %v3185_v28 = vsel %vm423_vm1, %v479_v19, %v480_v21  ;;  %v482_v37 = vrot.slane %v4585_v29, 1  ;;  %v442_v40 = vrot.slane %v4591_v36, 1  ;;  %v3220_v57 = vunpack.c.l.bf16 %v2914_v46  ;;  %v3236_v19 = vld [vmem:[%s3006_s10 + $0x38] sm:$0x1] }
  0x22   : > { %4722 = vst [vmem:[#allocation16_spill] sm:$0xff] %v3166_v12  ;;  %v3193_v33 = vsel %vm423_vm1, %v439_v25, %v440_v26  ;;  %v3222_v59 = vunpack.c.h.bf16 %v2914_v46  ;;  %v484_v60 = vrot.slane %v3211_v48, 1  ;;  %v485_v2 = vrot.slane %v3213_v49, 1 }
  0x23   : > { %4723 = vst [vmem:[#allocation17_spill] sm:$0xff] %v3168_v18  ;;  %v3207_v47 = vsel %vm423_vm1, %v480_v21, %v482_v37  ;;  %v3218_v56 = vsel %vm423_vm1, %v440_v26, %v442_v40  ;;  %v444_v4 = vrot.slane %v3220_v57, 1  ;;  %v4587_v25 = vunpack.c.l.bf16 %v3231_v3  ;;  %v304_v40 = vld [vmem:[%s3006_s10 + $0x9c] sm:$0xff]  }
  0x24   : > { %2595 = vmatmul.msk.f32.gmra.mxu3 %vm507_vm0, %v3052_v31  ;;  %4724 = vst [vmem:[#allocation18_spill] sm:$0xff] %v3177_v22  ;;  %v445_v5 = vrot.slane %v3222_v59, 1  ;;  %v3239_v21 = vsel %vm423_vm1, %v484_v60, %v485_v2  ;;  %v4590_v37 = vunpack.c.l.bf16 %v3236_v19  ;;  %v280_v60 = vld [vmem:[%s3006_s10 + $0x3c] sm:$0xff]   ;;  %v3265_v29 = vunpack.c.l.bf16 %v304_v40 }
  0x25   : > { %2579 = vmatmul.msk.f32.gmra.mxu1 %vm507_vm0, %v3059_v34  ;;  %4725 = vst [vmem:[#allocation19_spill] sm:$0xff] %v3185_v28  ;;  %v487_v39 = vrot.slane %v4587_v25, 1  ;;  %v3267_v63 = vunpack.c.h.bf16 %v304_v40  ;;  %v3274_v43 = vunpack.c.l.bf16 %v280_v60  ;;  %v3276_v20 = vunpack.c.h.bf16 %v280_v60  ;;  %v3285_v40 = vld [vmem:[%s3006_s10 + $0xa4] sm:$0x1] }
  0x26   : > { %4726 = vst [vmem:[#allocation20_spill] sm:$0xff] %v3193_v33  ;;  %v3247_v26 = vsel %vm423_vm1, %v444_v4, %v445_v5  ;;  %v447_v46 = vrot.slane %v4590_v37, 1  ;;  %v3290_v60 = vld [vmem:[%s3006_s10 + $0x44] sm:$0x1]  ;;  %v4602_v36 = vunpack.c.l.bf16 %v3285_v40 }
  0x27   : > { %2563 = vmatmul.msk.f32.gmra.mxu2 %vm507_vm0, %v3077_v42  ;;  %4727 = vst [vmem:[#allocation21_spill] sm:$0xff] %v3207_v47  ;;  %v3261_v4 = vsel %vm423_vm1, %v485_v2, %v487_v39  ;;  %v489_v2 = vrot.slane %v3265_v29, 1  ;;  %v490_v39 = vrot.slane %v3267_v63, 1  ;;  %v4605_v23 = vunpack.c.l.bf16 %v3290_v60 }
  0x28   : > { %2547 = vmatmul.msk.f32.gmra.mxu0 %vm507_vm0, %v3085_v44  ;;  %4728 = vst [vmem:[#allocation22_spill] sm:$0xff] %v3211_v48  ;;  %v3272_v25 = vsel %vm423_vm1, %v445_v5, %v447_v46  ;;  %v449_v5 = vrot.slane %v3274_v43, 1  ;;  %v450_v46 = vrot.slane %v3276_v20, 1 }
  0x29   : > { %4729 = vst [vmem:[#allocation23_spill] sm:$0xff] %v3213_v49  ;;  %v3293_v37 = vsel %vm423_vm1, %v489_v2, %v490_v39  ;;  %v492_v2 = vrot.slane %v4602_v36, 1 }
  0x2a   : > { %4730 = vst [vmem:[#allocation24_spill] sm:$0xff] %v3218_v56  ;;  %v3301_v1 = vsel %vm423_vm1, %v449_v5, %v450_v46 }
  0x2b   : > { %4731 = vst [vmem:[#allocation25_spill] sm:$0xff] %v3220_v57  ;;  %v3315_v5 = vsel %vm423_vm1, %v490_v39, %v492_v2 }
  0x2c   : > { %2596 = vmatmul.msk.f32.gmra.mxu3 %vm507_vm0, %v3054_v32  ;;  %4732 = vst [vmem:[#allocation26_spill] sm:$0xff] %v3222_v59 }
  0x2d   : > { %2580 = vmatmul.msk.f32.gmra.mxu1 %vm507_vm0, %v3061_v35  ;;  %4733 = vst [vmem:[#allocation27_spill] sm:$0xff] %v3231_v3 }
  0x2e   : > { %4734 = vst [vmem:[#allocation28_spill] sm:$0xff] %v3239_v21 }
  0x2f   : > { %2564 = vmatmul.msk.f32.gmra.mxu2 %vm507_vm0, %v3099_v50  ;;  %4735 = vst [vmem:[#allocation29_spill] sm:$0xff] %v3247_v26 }
  0x30   : > { %2548 = vmatmul.msk.f32.gmra.mxu0 %vm507_vm0, %v3110_v53  ;;  %4736 = vst [vmem:[#allocation30_spill] sm:$0xff] %v3261_v4 }
  0x31   : > { %4737 = vst [vmem:[#allocation31_spill] sm:$0xff] %v3265_v29 }
  0x32   : > { %4738 = vst [vmem:[#allocation32_spill] sm:$0xff] %v3267_v63 }
  0x33   : > { %4739 = vst [vmem:[#allocation33_spill] sm:$0xff] %v3272_v25 }
  0x34   : > { %2597 = vmatmul.msk.f32.gmra.mxu3 %vm507_vm0, %v3103_v51  ;;  %4740 = vst [vmem:[#allocation34_spill] sm:$0xff] %v3274_v43 }
  0x35   : > { %2581 = vmatmul.msk.f32.gmra.mxu1 %vm507_vm0, %v3112_v54  ;;  %4741 = vst [vmem:[#allocation35_spill] sm:$0xff] %v3276_v20 }
  0x36   : > { %4742 = vst [vmem:[#allocation36_spill] sm:$0xff] %v3285_v40  ;;  %v3321_v40 = vunpack.c.h.bf16 %v2919_v45 }
  0x37   : > { %2565 = vmatmul.msk.f32.gmra.mxu2 %vm507_vm0, %v3131_v62  ;;  %4743 = vst [vmem:[#allocation37_spill] sm:$0xff] %v3293_v37 }
  0x38   : > { %2549 = vmatmul.msk.f32.gmra.mxu0 %vm507_vm0, %v3139_v0  ;;  %4744 = vst [vmem:[#allocation38_spill] sm:$0xff] %v3301_v1  ;;  %v495_v2 = vrot.slane %v3321_v40, 1 }
  0x39   : > { %4745 = vst [vmem:[#allocation39_spill] sm:$0xff] %v3315_v5 }
  0x3a   : > { %4747 = vst [vmem:[#allocation41_spill] sm:$0xff] %v3321_v40 }
  0x3c   : > { %2598 = vmatmul.msk.f32.gmra.mxu3 %vm507_vm0, %v3105_v52 }
  0x3d   : > { %2582 = vmatmul.msk.f32.gmra.mxu1 %vm507_vm0, %v3114_v55 }
  0x3f   : > { %2566 = vmatmul.msk.f32.gmra.mxu2 %vm507_vm0, %v3153_v7 }
  0x40   : > { %2550 = vmatmul.msk.f32.gmra.mxu0 %vm507_vm0, %v3164_v10 }
  0x44   : > { %2599 = vmatmul.msk.f32.gmra.mxu3 %vm507_vm0, %v3157_v8 }
  0x45   : > { %2583 = vmatmul.msk.f32.gmra.mxu1 %vm507_vm0, %v3166_v12 }
  0x47   : > { %2567 = vmatmul.msk.f32.gmra.mxu2 %vm507_vm0, %v3185_v28 }
  0x48   : > { %2551 = vmatmul.msk.f32.gmra.mxu0 %vm507_vm0, %v3193_v33 }
  0x4c   : > { %2600 = vmatmul.msk.f32.gmra.mxu3 %vm507_vm0, %v3159_v9 }
  0x4d   : > { %2584 = vmatmul.msk.f32.gmra.mxu1 %vm507_vm0, %v3168_v18 }
  0x4f   : > { %2568 = vmatmul.msk.f32.gmra.mxu2 %vm507_vm0, %v3207_v47 }
  0x50   : > { %2552 = vmatmul.msk.f32.gmra.mxu0 %vm507_vm0, %v3218_v56 }
  0x54   : > { %2601 = vmatmul.msk.f32.gmra.mxu3 %vm507_vm0, %v3211_v48 }
  0x55   : > { %2585 = vmatmul.msk.f32.gmra.mxu1 %vm507_vm0, %v3220_v57 }
  0x57   : > { %2569 = vmatmul.msk.f32.gmra.mxu2 %vm507_vm0, %v3239_v21 }
  0x58   : > { %2553 = vmatmul.msk.f32.gmra.mxu0 %vm507_vm0, %v3247_v26 }
  0x5c   : > { %2602 = vmatmul.msk.f32.gmra.mxu3 %vm507_vm0, %v3213_v49  ;;  %v1626_v49 = vunpack.c.h.bf16 %v2997_v6 }
  0x5d   : > { %2586 = vmatmul.msk.f32.gmra.mxu1 %vm507_vm0, %v3222_v59 }
  0x5e   : > { %1648 = vmatpush.msra.mxu2 %v1626_v49 }
  0x5f   : > { %2570 = vmatmul.msk.f32.gmra.mxu2 %vm507_vm0, %v3261_v4  ;;  %v452_v4 = vrot.slane %v4605_v23, 1 }
  0x60   : > { %2554 = vmatmul.msk.f32.gmra.mxu0 %vm507_vm0, %v3272_v25 }
  0x61   : > { %v3326_v36 = vsel %vm423_vm1, %v450_v46, %v452_v4 }
  0x62   : > { %4748 = vst [vmem:[#allocation42_spill] sm:$0xff] %v3326_v36 }
  0x64   : > { %2603 = vmatmul.msk.f32.gmra.mxu3 %vm507_vm0, %v3265_v29  ;;  %v2915_v29 = vld [vmem:[%s3006_s10 + $0x48] sm:$0xff]  }
  0x65   : > { %2587 = vmatmul.msk.f32.gmra.mxu1 %vm507_vm0, %v3274_v43  ;;  %v3328_v21 = vunpack.c.l.bf16 %v2915_v29  ;;  %v3330_v23 = vunpack.c.h.bf16 %v2915_v29 }
  0x67   : > { %2571 = vmatmul.msk.f32.gmra.mxu2 %vm507_vm0, %v3293_v37  ;;  %v3319_v37 = vunpack.c.l.bf16 %v2919_v45  ;;  %4749 = vst [vmem:[#allocation43_spill] sm:$0xff] %v3328_v21  ;;  %v3339_v45 = vld [vmem:[%s3006_s10 + $0xb0] sm:$0x1]  ;;  %v454_v4 = vrot.slane %v3328_v21, 1  ;;  %v455_v46 = vrot.slane %v3330_v23, 1 }
  0x68   : > { %2555 = vmatmul.msk.f32.gmra.mxu0 %vm507_vm0, %v3301_v1  ;;  %4750 = vst [vmem:[#allocation44_spill] sm:$0xff] %v3330_v23 }
  0x69   : > { %4746 = vst [vmem:[#allocation40_spill] sm:$0xff] %v3319_v37  ;;  %v494_v39 = vrot.slane %v3319_v37, 1  ;;  %v3355_v3 = vsel %vm423_vm1, %v454_v4, %v455_v46  ;;  %v310_v4 = vld [vmem:[%s3006_s10 + $0xb4] sm:$0xff]  }
  0x6a   : > { %4751 = vst [vmem:[#allocation45_spill] sm:$0xff] %v3339_v45 }
  0x6b   : > { %v3347_v29 = vsel %vm423_vm1, %v494_v39, %v495_v2  ;;  %4753 = vst [vmem:[#allocation47_spill] sm:$0xff] %v3355_v3  ;;  %v2774_v39 = vld [vmem:[%s4579_s1 + $0x1c] sm:$0xff]  }
  0x6c   : > { %2604 = vmatmul.msk.f32.gmra.mxu3 %vm507_vm0, %v3267_v63  ;;  %v3344_v63 = vld [vmem:[%s3006_s10 + $0x50] sm:$0x1]  ;;  %4752 = vst [vmem:[#allocation46_spill] sm:$0xff] %v3347_v29  ;;  %v1786_v48 = vunpack.c.l.bf16 %v2774_v39 }
  0x6d   : > { %2588 = vmatmul.msk.f32.gmra.mxu1 %vm507_vm0, %v3276_v20  ;;  %v4625_v47 = vunpack.c.l.bf16 %v3344_v63 }
  0x6e   : > { %1806 = vmatpush.msra.mxu3 %v1786_v48 }
  0x6f   : > { %2572 = vmatmul.msk.f32.gmra.mxu2 %vm507_vm0, %v3315_v5  ;;  %v4623_v5 = vunpack.c.l.bf16 %v3339_v45  ;;  %v457_v28 = vrot.slane %v4625_v47, 1  ;;  %v3379_v45 = vunpack.c.h.bf16 %v310_v4 }
  0x70   : > { %2556 = vmatmul.msk.f32.gmra.mxu0 %vm507_vm0, %v3326_v36 }
  0x71   : > { %4756 = vst [vmem:[#allocation50_spill] sm:$0xff] %v3379_v45  ;;  %v3384_v47 = vsel %vm423_vm1, %v455_v46, %v457_v28 }
  0x72   : > { %4757 = vst [vmem:[#allocation51_spill] sm:$0xff] %v3384_v47 }
  0x74   : > { %2605 = vmatmul.msk.f32.gmra.mxu3 %vm507_vm0, %v3319_v37  ;;  %v497_v37 = vrot.slane %v4623_v5, 1  ;;  %v3377_v5 = vunpack.c.l.bf16 %v310_v4  ;;  %v3397_v4 = vld [vmem:[%s3006_s10 + $0xbc] sm:$0x1] }
  0x75   : > { %2589 = vmatmul.msk.f32.gmra.mxu1 %vm507_vm0, %v3328_v21  ;;  %4760 = vst [vmem:[#allocation54_spill] sm:$0xff] %v3397_v4 }
  0x76   : > { %v3373_v6 = vsel %vm423_vm1, %v495_v2, %v497_v37  ;;  %4755 = vst [vmem:[#allocation49_spill] sm:$0xff] %v3377_v5  ;;  %v1943_v37 = vunpack.c.h.bf16 %v2774_v39  ;;  %v499_v2 = vrot.slane %v3377_v5, 1  ;;  %v4639_v39 = vunpack.c.l.bf16 %v3397_v4 }
  0x77   : > { %2573 = vmatmul.msk.f32.gmra.mxu2 %vm507_vm0, %v3347_v29  ;;  %v286_v29 = vld [vmem:[%s3006_s10 + $0x54] sm:$0xff]   ;;  %4754 = vst [vmem:[#allocation48_spill] sm:$0xff] %v3373_v6  ;;  %v4766_v4 = vunpack.c.l.bf16 %v3020_v16  ;;  %v873_v16 = vrot.slane %v3112_v54, 2 }
  0x78   : > { %2557 = vmatmul.msk.f32.gmra.mxu0 %vm507_vm0, %v3355_v3  ;;  %v3386_v49 = vunpack.c.l.bf16 %v286_v29  ;;  %v3388_v48 = vunpack.c.h.bf16 %v286_v29  ;;  %v3402_v29 = vld [vmem:[%s3006_s10 + $0x5c] sm:$0x1] }
  0x79   : > { %1963 = vmatpush.msra.mxu0 %v1943_v37  ;;  %v4640_v7 = vunpack.c.l.bf16 %v3402_v29  ;;  %v2226_v37 = vld [vmem:[%s4581_s3] sm:$0x3] }
  0x7a   : > { %4758 = vst [vmem:[#allocation52_spill] sm:$0xff] %v3386_v49  ;;  %v459_v28 = vrot.slane %v3386_v49, 1  ;;  %v460_v46 = vrot.slane %v3388_v48, 1 }
  0x7b   : > { %4759 = vst [vmem:[#allocation53_spill] sm:$0xff] %v3388_v48 }
  0x7c   : > { %2606 = vmatmul.msk.f32.gmra.mxu3 %vm507_vm0, %v3321_v40  ;;  %v500_v40 = vrot.slane %v3379_v45, 1 }
  0x7d   : > { %2590 = vmatmul.msk.f32.gmra.mxu1 %vm507_vm0, %v3330_v23 }
  0x7e   : > { %v3405_v22 = vsel %vm423_vm1, %v499_v2, %v500_v40  ;;  %v502_v2 = vrot.slane %v4639_v39, 1  ;;  %v868_v39 = vrot.slane %v3059_v34, 2 }
  0x7f   : > { %2574 = vmatmul.msk.f32.gmra.mxu2 %vm507_vm0, %v3373_v6  ;;  %4761 = vst [vmem:[#allocation55_spill] sm:$0xff] %v3405_v22  ;;  %v3413_v6 = vsel %vm423_vm1, %v459_v28, %v460_v46  ;;  %v462_v28 = vrot.slane %v4640_v7, 1 }
  0x80   : > { %2558 = vmatmul.msk.f32.gmra.mxu0 %vm507_vm0, %v3384_v47  ;;  %4762 = vst [vmem:[#allocation56_spill] sm:$0xff] %v3413_v6  ;;  %v3428_v9 = vsel %vm423_vm1, %v500_v40, %v502_v2  ;;  %v863_v40 = vrot.slane %v3017_v15, 2  ;;  %v4765_v15 = vunpack.c.l.bf16 %v3074_v41 }
  0x81   : > { %4763 = vst [vmem:[#allocation57_spill] sm:$0xff] %v3428_v9 }
  0x84   : > { %2607 = vmatmul.msk.f32.gmra.mxu3 %vm507_vm0, %v3377_v5  ;;  %v2227_v5 = vunpack.c.l.bf16 %v2226_v37  ;;  %v869_v37 = vrot.slane %v3061_v35, 2 }
  0x85   : > { %2591 = vmatmul.msk.f32.gmra.mxu1 %vm507_vm0, %v3386_v49 }
  0x86   : > { %2840 = vmatpush.msk.msra.mxu1 %vm2297_vm2, %v2227_v5  ;;  %v864_v5 = vrot.slane %v3022_v17, 2 }
  0x87   : > { %2575 = vmatmul.msk.f32.gmra.mxu2 %vm507_vm0, %v3405_v22  ;;  %v3435_v22 = vsel %vm423_vm1, %v460_v46, %v462_v28  ;;  %v870_v46 = vsel %vm862_vm3, %v868_v39, %v869_v37 }
  0x88   : > { %2559 = vmatmul.msk.f32.gmra.mxu0 %vm507_vm0, %v3413_v6  ;;  %4764 = vst [vmem:[#allocation58_spill] sm:$0xff] %v3435_v22  ;;  %v865_v28 = vsel %vm862_vm3, %v863_v40, %v864_v5 }
  0x8c   : > { %2608 = vmatmul.msk.f32.gmra.mxu3 %vm507_vm0, %v3379_v45  ;;  %v866_v45 = vrot.slane %v4766_v4, 2  ;;  %v874_v4 = vrot.slane %v3114_v55, 2 }
  0x8d   : > { %2592 = vmatmul.msk.f32.gmra.mxu1 %vm507_vm0, %v3388_v48 }
  0x8e   : > { %v867_v62 = vsel %vm862_vm3, %v864_v5, %v866_v45  ;;  %v3480_v45 = vsel %vm862_vm3, %v873_v16, %v874_v4 }
  0x8f   : > { %2576 = vmatmul.msk.f32.gmra.mxu2 %vm507_vm0, %v3428_v9  ;;  %v871_v9 = vrot.slane %v4765_v15, 2 }
  0x90   : > { %2560 = vmatmul.msk.f32.gmra.mxu0 %vm507_vm0, %v3435_v22 }
  0x92   : > { %v3445_v2 = vpop.f32.mrf.mxu1 }
  0x94   : > { %2643 = vmatmul.msk.f32.vlgmr.msrb.gmra.mxu3 %vm507_vm0, %v3059_v34  ;;  %v872_v34 = vsel %vm862_vm3, %v869_v37, %v871_v9 }
  0x95   : > { %2709 = vmatmul.msk.f32.vlgmr.msrb.gmra.mxu1 %vm507_vm0, %v870_v46  ;;  %v3452_v7 = vpop.f32.mrf.mxu0 }
  0x97   : > { %2610 = vmatmul.msk.f32.vlgmr.msrb.gmra.mxu2 %vm507_vm0, %v865_v28  ;;  %v814_v17 = vpop.f32.mrf.mxu3 }
  0x98   : > { %2676 = vmatmul.msk.f32.vlgmr.msrb.gmra.mxu0 %vm507_vm0, %v3085_v44 }
  0x9a   : > { %v3461_v39 = vpop.f32.mrf.mxu1  ;;  %v637_v40 = vpop.f32.mrf.mxu2 }
  0x9b   : > { %v3464_v8 = vadd.f32 %v814_v17, %v637_v40 }
  0x9c   : > { %2644 = vmatmul.msk.f32.gmra.mxu3 %vm507_vm0, %v3061_v35 }
  0x9d   : > { %2710 = vmatmul.msk.f32.gmra.mxu1 %vm507_vm0, %v872_v34  ;;  %v3470_v41 = vpop.f32.mrf.mxu0 }
  0x9f   : > { %2611 = vmatmul.msk.f32.gmra.mxu2 %vm507_vm0, %v867_v62  ;;  %v817_v28 = vpop.f32.mrf.mxu3  ;;  %v4768_v62 = vunpack.c.l.bf16 %v3128_v61 }
  0xa0   : > { %2677 = vmatmul.msk.f32.gmra.mxu0 %vm507_vm0, %v3110_v53 }
  0xa1   : > { %v876_v15 = vrot.slane %v4768_v62, 2  ;;  %v879_v62 = vrot.slane %v3168_v18, 2 }
  0xa2   : > { %v3477_v9 = vpop.f32.mrf.mxu1  ;;  %v640_v35 = vpop.f32.mrf.mxu2 }
  0xa3   : > { %v3482_v37 = vadd.f32 %v817_v28, %v640_v35  ;;  %v3498_v16 = vsel %vm862_vm3, %v874_v4, %v876_v15 }
  0xa4   : > { %2645 = vmatmul.msk.f32.gmra.mxu3 %vm507_vm0, %v3112_v54  ;;  %4769 = vst [vmem:[#allocation60_spill] sm:$0xff] %v3498_v16 }
  0xa5   : > { %4767 = vst [vmem:[#allocation59_spill] sm:$0xff] %v3482_v37  ;;  %2711 = vmatmul.msk.f32.gmra.mxu1 %vm507_vm0, %v3480_v45  ;;  %v3488_v5 = vpop.f32.mrf.mxu0 }
  0xa7   : > { %2612 = vmatmul.msk.f32.gmra.mxu2 %vm507_vm0, %v870_v46  ;;  %v820_v17 = vpop.f32.mrf.mxu3  ;;  %v878_v46 = vrot.slane %v3166_v12, 2 }
  0xa8   : > { %2678 = vmatmul.msk.f32.gmra.mxu0 %vm507_vm0, %v3139_v0 }
  0xa9   : > { %v3516_v15 = vsel %vm862_vm3, %v878_v46, %v879_v62 }
  0xaa   : > { %v3495_v40 = vpop.f32.mrf.mxu1  ;;  %v643_v28 = vpop.f32.mrf.mxu2 }
  0xab   : > { %v3500_v35 = vadd.f32 %v820_v17, %v643_v28 }
  0xac   : > { %2646 = vmatmul.msk.f32.gmra.mxu3 %vm507_vm0, %v3114_v55 }
  0xad   : > { %4770 = vst [vmem:[#allocation61_spill] sm:$0xff] %v3500_v35  ;;  %2712 = vmatmul.msk.f32.gmra.mxu1 %vm507_vm0, %v3498_v16  ;;  %v3506_v61 = vpop.f32.mrf.mxu0 }
  0xaf   : > { %2613 = vmatmul.msk.f32.gmra.mxu2 %vm507_vm0, %v872_v34  ;;  %v823_v37 = vpop.f32.mrf.mxu3  ;;  %v4772_v34 = vunpack.c.l.bf16 %v3182_v27 }
  0xb0   : > { %2679 = vmatmul.msk.f32.gmra.mxu0 %vm507_vm0, %v3164_v10 }
  0xb1   : > { %v881_v55 = vrot.slane %v4772_v34, 2  ;;  %v883_v34 = vrot.slane %v3220_v57, 2 }
  0xb2   : > { %v3513_v4 = vpop.f32.mrf.mxu1  ;;  %v646_v17 = vpop.f32.mrf.mxu2 }
  0xb3   : > { %v3518_v28 = vadd.f32 %v823_v37, %v646_v17  ;;  %v3535_v46 = vsel %vm862_vm3, %v879_v62, %v881_v55 }
  0xb4   : > { %2647 = vmatmul.msk.f32.gmra.mxu3 %vm507_vm0, %v3166_v12  ;;  %4773 = vst [vmem:[#allocation63_spill] sm:$0xff] %v3535_v46  ;;  %v884_v12 = vrot.slane %v3222_v59, 2 }
  0xb5   : > { %4771 = vst [vmem:[#allocation62_spill] sm:$0xff] %v3518_v28  ;;  %2713 = vmatmul.msk.f32.gmra.mxu1 %vm507_vm0, %v3516_v15  ;;  %v3524_v35 = vpop.f32.mrf.mxu0 }
  0xb6   : > { %v3554_v62 = vsel %vm862_vm3, %v883_v34, %v884_v12 }
  0xb7   : > { %2614 = vmatmul.msk.f32.gmra.mxu2 %vm507_vm0, %v3480_v45  ;;  %v826_v53 = vpop.f32.mrf.mxu3 }
  0xb8   : > { %2680 = vmatmul.msk.f32.gmra.mxu0 %vm507_vm0, %v3193_v33  ;;  %v4776_v33 = vunpack.c.l.bf16 %v3236_v19  ;;  %v888_v19 = vrot.slane %v3274_v43, 2 }
  0xba   : > { %v3532_v37 = vpop.f32.mrf.mxu1  ;;  %v649_v17 = vpop.f32.mrf.mxu2 }
  0xbb   : > { %v3537_v28 = vadd.f32 %v826_v53, %v649_v17 }
  0xbc   : > { %2648 = vmatmul.msk.f32.gmra.mxu3 %vm507_vm0, %v3168_v18 }
  0xbd   : > { %4774 = vst [vmem:[#allocation64_spill] sm:$0xff] %v3537_v28  ;;  %2714 = vmatmul.msk.f32.gmra.mxu1 %vm507_vm0, %v3535_v46  ;;  %v3543_v27 = vpop.f32.mrf.mxu0 }
  0xbf   : > { %2615 = vmatmul.msk.f32.gmra.mxu2 %vm507_vm0, %v3498_v16  ;;  %v829_v55 = vpop.f32.mrf.mxu3  ;;  %v886_v16 = vrot.slane %v4776_v33, 2 }
  0xc0   : > { %2681 = vmatmul.msk.f32.gmra.mxu0 %vm507_vm0, %v3218_v56 }
  0xc2   : > { %v3551_v53 = vpop.f32.mrf.mxu1  ;;  %v652_v17 = vpop.f32.mrf.mxu2 }
  0xc3   : > { %v3556_v28 = vadd.f32 %v829_v55, %v652_v17  ;;  %v3573_v55 = vsel %vm862_vm3, %v884_v12, %v886_v16 }
  0xc4   : > { %2649 = vmatmul.msk.f32.gmra.mxu3 %vm507_vm0, %v3220_v57  ;;  %4777 = vst [vmem:[#allocation66_spill] sm:$0xff] %v3573_v55  ;;  %v889_v57 = vrot.slane %v3276_v20, 2 }
  0xc5   : > { %4775 = vst [vmem:[#allocation65_spill] sm:$0xff] %v3556_v28  ;;  %2715 = vmatmul.msk.f32.gmra.mxu1 %vm507_vm0, %v3554_v62  ;;  %v3562_v18 = vpop.f32.mrf.mxu0 }
  0xc6   : > { %v3592_v16 = vsel %vm862_vm3, %v888_v19, %v889_v57 }
  0xc7   : > { %2616 = vmatmul.msk.f32.gmra.mxu2 %vm507_vm0, %v3516_v15  ;;  %v832_v56 = vpop.f32.mrf.mxu3 }
  0xc8   : > { %2682 = vmatmul.msk.f32.gmra.mxu0 %vm507_vm0, %v3247_v26  ;;  %v4780_v26 = vunpack.c.l.bf16 %v3290_v60  ;;  %v893_v60 = vrot.slane %v3328_v21, 2 }
  0xca   : > { %v3570_v34 = vpop.f32.mrf.mxu1  ;;  %v655_v17 = vpop.f32.mrf.mxu2 }
  0xcb   : > { %v3575_v28 = vadd.f32 %v832_v56, %v655_v17 }
  0xcc   : > { %2650 = vmatmul.msk.f32.gmra.mxu3 %vm507_vm0, %v3222_v59 }
  0xcd   : > { %4778 = vst [vmem:[#allocation67_spill] sm:$0xff] %v3575_v28  ;;  %2716 = vmatmul.msk.f32.gmra.mxu1 %vm507_vm0, %v3573_v55  ;;  %v3581_v33 = vpop.f32.mrf.mxu0 }
  0xcf   : > { %2617 = vmatmul.msk.f32.gmra.mxu2 %vm507_vm0, %v3535_v46  ;;  %v835_v12 = vpop.f32.mrf.mxu3  ;;  %v891_v46 = vrot.slane %v4780_v26, 2 }
  0xd0   : > { %2683 = vmatmul.msk.f32.gmra.mxu0 %vm507_vm0, %v3272_v25 }
  0xd2   : > { %v3589_v56 = vpop.f32.mrf.mxu1  ;;  %v658_v17 = vpop.f32.mrf.mxu2 }
  0xd3   : > { %v3594_v28 = vadd.f32 %v835_v12, %v658_v17  ;;  %v3611_v12 = vsel %vm862_vm3, %v889_v57, %v891_v46 }
  0xd4   : > { %2651 = vmatmul.msk.f32.gmra.mxu3 %vm507_vm0, %v3274_v43  ;;  %4781 = vst [vmem:[#allocation69_spill] sm:$0xff] %v3611_v12  ;;  %v894_v43 = vrot.slane %v3330_v23, 2 }
  0xd5   : > { %4779 = vst [vmem:[#allocation68_spill] sm:$0xff] %v3594_v28  ;;  %2717 = vmatmul.msk.f32.gmra.mxu1 %vm507_vm0, %v3592_v16  ;;  %v3600_v59 = vpop.f32.mrf.mxu0 }
  0xd6   : > { %v3630_v46 = vsel %vm862_vm3, %v893_v60, %v894_v43 }
  0xd7   : > { %2618 = vmatmul.msk.f32.gmra.mxu2 %vm507_vm0, %v3554_v62  ;;  %v838_v25 = vpop.f32.mrf.mxu3 }
  0xd8   : > { %2684 = vmatmul.msk.f32.gmra.mxu0 %vm507_vm0, %v3301_v1  ;;  %v4784_v1 = vunpack.c.l.bf16 %v3344_v63 }
  0xda   : > { %v3608_v19 = vpop.f32.mrf.mxu1  ;;  %v661_v17 = vpop.f32.mrf.mxu2 }
  0xdb   : > { %v3613_v28 = vadd.f32 %v838_v25, %v661_v17 }
  0xdc   : > { %2652 = vmatmul.msk.f32.gmra.mxu3 %vm507_vm0, %v3276_v20 }
  0xdd   : > { %4782 = vst [vmem:[#allocation70_spill] sm:$0xff] %v3613_v28  ;;  %2718 = vmatmul.msk.f32.gmra.mxu1 %vm507_vm0, %v3611_v12  ;;  %v3619_v26 = vpop.f32.mrf.mxu0 }
  0xdf   : > { %2619 = vmatmul.msk.f32.gmra.mxu2 %vm507_vm0, %v3573_v55  ;;  %v841_v57 = vpop.f32.mrf.mxu3  ;;  %v896_v55 = vrot.slane %v4784_v1, 2  ;;  %v898_v1 = vrot.slane %v3386_v49, 2 }
  0xe0   : > { %2685 = vmatmul.msk.f32.gmra.mxu0 %vm507_vm0, %v3326_v36 }
  0xe2   : > { %v3627_v25 = vpop.f32.mrf.mxu1  ;;  %v664_v17 = vpop.f32.mrf.mxu2 }
  0xe3   : > { %v3632_v28 = vadd.f32 %v841_v57, %v664_v17  ;;  %v3649_v57 = vsel %vm862_vm3, %v894_v43, %v896_v55 }
  0xe4   : > { %2653 = vmatmul.msk.f32.gmra.mxu3 %vm507_vm0, %v3328_v21  ;;  %4785 = vst [vmem:[#allocation72_spill] sm:$0xff] %v3649_v57  ;;  %v899_v21 = vrot.slane %v3388_v48, 2 }
  0xe5   : > { %4783 = vst [vmem:[#allocation71_spill] sm:$0xff] %v3632_v28  ;;  %2719 = vmatmul.msk.f32.gmra.mxu1 %vm507_vm0, %v3630_v46  ;;  %v3638_v20 = vpop.f32.mrf.mxu0 }
  0xe6   : > { %v3668_v55 = vsel %vm862_vm3, %v898_v1, %v899_v21 }
  0xe7   : > { %2620 = vmatmul.msk.f32.gmra.mxu2 %vm507_vm0, %v3592_v16  ;;  %v844_v36 = vpop.f32.mrf.mxu3  ;;  %4787 = vst [vmem:[#allocation74_spill] sm:$0xff] %v3668_v55 }
  0xe8   : > { %2686 = vmatmul.msk.f32.gmra.mxu0 %vm507_vm0, %v3355_v3  ;;  %v4789_v3 = vunpack.c.l.bf16 %v3402_v29  ;;  %v903_v29 = vrot.slane %v3013_v13, 2 }
  0xea   : > { %v3646_v60 = vpop.f32.mrf.mxu1  ;;  %v667_v17 = vpop.f32.mrf.mxu2 }
  0xeb   : > { %v3651_v28 = vadd.f32 %v844_v36, %v667_v17 }
  0xec   : > { %2654 = vmatmul.msk.f32.gmra.mxu3 %vm507_vm0, %v3330_v23 }
  0xed   : > { %4786 = vst [vmem:[#allocation73_spill] sm:$0xff] %v3651_v28  ;;  %2720 = vmatmul.msk.f32.gmra.mxu1 %vm507_vm0, %v3649_v57  ;;  %v3657_v63 = vpop.f32.mrf.mxu0 }
  0xef   : > { %2621 = vmatmul.msk.f32.gmra.mxu2 %vm507_vm0, %v3611_v12  ;;  %v847_v43 = vpop.f32.mrf.mxu3  ;;  %v901_v12 = vrot.slane %v4789_v3, 2 }
  0xf0   : > { %2687 = vmatmul.msk.f32.gmra.mxu0 %vm507_vm0, %v3384_v47 }
  0xf2   : > { %v3665_v36 = vpop.f32.mrf.mxu1  ;;  %v670_v17 = vpop.f32.mrf.mxu2 }
  0xf3   : > { %v3670_v28 = vadd.f32 %v847_v43, %v670_v17  ;;  %v3687_v43 = vsel %vm862_vm3, %v899_v21, %v901_v12 }
  0xf4   : > { %2655 = vmatmul.msk.f32.gmra.mxu3 %vm507_vm0, %v3386_v49  ;;  %4790 = vst [vmem:[#allocation76_spill] sm:$0xff] %v3687_v43  ;;  %v904_v49 = vrot.slane %v3015_v14, 2 }
  0xf5   : > { %4788 = vst [vmem:[#allocation75_spill] sm:$0xff] %v3670_v28  ;;  %2721 = vmatmul.msk.f32.gmra.mxu1 %vm507_vm0, %v3668_v55  ;;  %v3676_v23 = vpop.f32.mrf.mxu0 }
  0xf6   : > { %v3706_v12 = vsel %vm862_vm3, %v903_v29, %v904_v49 }
  0xf7   : > { %2622 = vmatmul.msk.f32.gmra.mxu2 %vm507_vm0, %v3630_v46  ;;  %v850_v47 = vpop.f32.mrf.mxu3  ;;  %4792 = vst [vmem:[#allocation78_spill] sm:$0xff] %v3706_v12 }
  0xf8   : > { %2688 = vmatmul.msk.f32.gmra.mxu0 %vm507_vm0, %v3413_v6  ;;  %v4794_v6 = vunpack.c.l.bf16 %v3010_v11 }
  0xfa   : > { %v3684_v1 = vpop.f32.mrf.mxu1  ;;  %v673_v17 = vpop.f32.mrf.mxu2 }
  0xfb   : > { %v3689_v28 = vadd.f32 %v850_v47, %v673_v17 }
  0xfc   : > { %2656 = vmatmul.msk.f32.gmra.mxu3 %vm507_vm0, %v3388_v48 }
  0xfd   : > { %4791 = vst [vmem:[#allocation77_spill] sm:$0xff] %v3689_v28  ;;  %2722 = vmatmul.msk.f32.gmra.mxu1 %vm507_vm0, %v3687_v43  ;;  %v3695_v3 = vpop.f32.mrf.mxu0 }
  0xff   : > { %2623 = vmatmul.msk.f32.gmra.mxu2 %vm507_vm0, %v3649_v57  ;;  %v853_v21 = vpop.f32.mrf.mxu3  ;;  %v906_v57 = vrot.slane %v4794_v6, 2  ;;  %v908_v6 = vrot.slane %v3052_v31, 2 }
 0x100   : > { %2689 = vmatmul.msk.f32.gmra.mxu0 %vm507_vm0, %v3435_v22 }
 0x102   : > { %v3703_v47 = vpop.f32.mrf.mxu1  ;;  %v676_v17 = vpop.f32.mrf.mxu2 }
 0x103   : > { %v3708_v28 = vadd.f32 %v853_v21, %v676_v17  ;;  %v3725_v21 = vsel %vm862_vm3, %v904_v49, %v906_v57 }
 0x104   : > { %2657 = vmatmul.msk.f32.gmra.mxu3 %vm507_vm0, %v3013_v13  ;;  %v909_v13 = vrot.slane %v3054_v32, 2 }
 0x105   : > { %4793 = vst [vmem:[#allocation79_spill] sm:$0xff] %v3708_v28  ;;  %2723 = vmatmul.msk.f32.gmra.mxu1 %vm507_vm0, %v3706_v12  ;;  %v3714_v48 = vpop.f32.mrf.mxu0 }
 0x106   : > { %v3742_v57 = vsel %vm862_vm3, %v908_v6, %v909_v13  ;;  %v767_v6 = vadd.f32 %v3445_v2, %v3452_v7  ;;  %v770_v7 = vadd.f32 %v3461_v39, %v3470_v41 }
 0x107   : > { %2624 = vmatmul.msk.f32.gmra.mxu2 %vm507_vm0, %v3668_v55  ;;  %v856_v22 = vpop.f32.mrf.mxu3 }
 0x108   : > { %2690 = vmatmul.msk.f32.gmra.mxu0 %vm507_vm0, %v3035_v24  ;;  %v4797_v24 = vunpack.c.l.bf16 %v3069_v38 }
 0x10a   : > { %v3722_v29 = vpop.f32.mrf.mxu1  ;;  %v679_v17 = vpop.f32.mrf.mxu2 }
 0x10b   : > { %v3727_v28 = vadd.f32 %v856_v22, %v679_v17 }
 0x10c   : > { %2658 = vmatmul.msk.f32.gmra.mxu3 %vm507_vm0, %v3015_v14 }
 0x10d   : > { %4795 = vst [vmem:[#allocation80_spill] sm:$0xff] %v3727_v28  ;;  %2724 = vmatmul.msk.f32.gmra.mxu1 %vm507_vm0, %v3725_v21  ;;  %v3733_v11 = vpop.f32.mrf.mxu0 }
 0x10f   : > { %2625 = vmatmul.msk.f32.gmra.mxu2 %vm507_vm0, %v3687_v43  ;;  %v859_v49 = vpop.f32.mrf.mxu3  ;;  %v911_v43 = vrot.slane %v4797_v24, 2 }
 0x110   : > { %2691 = vmatmul.msk.f32.gmra.mxu0 %vm507_vm0, %v3048_v30 }
 0x112   : > { %v1496_v22 = vpop.f32.mrf.mxu1  ;;  %v682_v17 = vpop.f32.mrf.mxu2 }
 0x113   : > { %v3744_v28 = vadd.f32 %v859_v49, %v682_v17  ;;  %v3759_v17 = vsel %vm862_vm3, %v909_v13, %v911_v43 }
 0x114   : > { %2659 = vmatmul.msk.f32.gmra.mxu3 %vm507_vm0, %v3052_v31 }
 0x115   : > { %4796 = vst [vmem:[#allocation81_spill] sm:$0xff] %v3744_v28  ;;  %2725 = vmatmul.msk.f32.gmra.mxu1 %vm507_vm0, %v3742_v57  ;;  %v1339_v14 = vpop.f32.mrf.mxu0 }
 0x117   : > { %2626 = vmatmul.msk.f32.gmra.mxu2 %vm507_vm0, %v3706_v12  ;;  %v1181_v30 = vpop.f32.mrf.mxu3  ;;  %v913_v12 = vrot.slane %v3103_v51, 2 }
 0x118   : > { %2692 = vmatmul.msk.f32.gmra.mxu0 %vm507_vm0, %v3077_v42  ;;  %v914_v42 = vrot.slane %v3105_v52, 2 }
 0x11a   : > { %v1499_v49 = vpop.f32.mrf.mxu1  ;;  %v1027_v28 = vpop.f32.mrf.mxu2 }
 0x11b   : > { %v1123_v31 = vadd.f32 %v1027_v28, %v767_v6 }
 0x11c   : > { %2660 = vmatmul.msk.f32.gmra.mxu3 %vm507_vm0, %v3054_v32 }
 0x11d   : > { %2726 = vmatmul.msk.f32.gmra.mxu1 %vm507_vm0, %v3759_v17  ;;  %v1277_v24 = vadd.f32 %v1181_v30, %v1123_v31  ;;  %v1342_v38 = vpop.f32.mrf.mxu0  ;;  %v3776_v30 = vsel %vm862_vm3, %v913_v12, %v914_v42  ;;  %v773_v12 = vadd.f32 %v3477_v9, %v3488_v5 }
 0x11f   : > { %v1435_v55 = vadd.f32 %v1339_v14, %v1277_v24  ;;  %2627 = vmatmul.msk.f32.gmra.mxu2 %vm507_vm0, %v3725_v21  ;;  %v1184_v13 = vpop.f32.mrf.mxu3  ;;  %v4799_v24 = vunpack.c.l.bf16 %v3123_v58 }
 0x120   : > { %2693 = vmatmul.msk.f32.gmra.mxu0 %vm507_vm0, %v3099_v50 }
 0x121   : > { %v3773_v2 = vadd.f32 %v1496_v22, %v1435_v55  ;;  %v916_v32 = vrot.slane %v4799_v24, 2  ;;  %v4800_v55 = vld [vmem:[#allocation12_spill] sm:$0xff] }
 0x122   : > { %v1502_v28 = vpop.f32.mrf.mxu1  ;;  %v1030_v31 = vpop.f32.mrf.mxu2 }
 0x123   : > { %4798 = vst [vmem:[#allocation82_spill] sm:$0xff] %v3773_v2  ;;  %v1124_v43 = vadd.f32 %v1030_v31, %v770_v7  ;;  %v4803_v2 = vld [vmem:[#allocation15_spill] sm:$0xff] }
 0x124   : > { %2661 = vmatmul.msk.f32.gmra.mxu3 %vm507_vm0, %v3103_v51  ;;  %v919_v9 = vrot.slane %v4803_v2, 2 }
 0x125   : > { %2727 = vmatmul.msk.f32.gmra.mxu1 %vm507_vm0, %v3776_v30  ;;  %v1278_v14 = vadd.f32 %v1184_v13, %v1124_v43  ;;  %v1345_v6 = vpop.f32.mrf.mxu0  ;;  %v3793_v13 = vsel %vm862_vm3, %v914_v42, %v916_v32  ;;  %v4804_v42 = vld [vmem:[#allocation13_spill] sm:$0xff] }
 0x127   : > { %v1436_v39 = vadd.f32 %v1342_v38, %v1278_v14  ;;  %2628 = vmatmul.msk.f32.gmra.mxu2 %vm507_vm0, %v3742_v57  ;;  %v1187_v41 = vpop.f32.mrf.mxu3  ;;  %v4802_v14 = vld [vmem:[#allocation14_spill] sm:$0xff] }
 0x128   : > { %2694 = vmatmul.msk.f32.gmra.mxu0 %vm507_vm0, %v4800_v55  ;;  %v918_v24 = vrot.slane %v4802_v14, 2 }
 0x129   : > { %v3790_v22 = vadd.f32 %v1499_v49, %v1436_v39  ;;  %v776_v49 = vadd.f32 %v3495_v40, %v3506_v61 }
 0x12a   : > { %v1505_v7 = vpop.f32.mrf.mxu1  ;;  %v1033_v31 = vpop.f32.mrf.mxu2 }
 0x12b   : > { %4801 = vst [vmem:[#allocation12_spill] sm:$0xff] %v3790_v22  ;;  %v1125_v58 = vadd.f32 %v1033_v31, %v773_v12  ;;  %v4806_v22 = vld [vmem:[#allocation18_spill] sm:$0xff] }
 0x12c   : > { %2662 = vmatmul.msk.f32.gmra.mxu3 %vm507_vm0, %v3105_v52  ;;  %v4807_v52 = vunpack.c.l.bf16 %v4806_v22 }
 0x12d   : > { %2728 = vmatmul.msk.f32.gmra.mxu1 %vm507_vm0, %v3793_v13  ;;  %v1279_v38 = vadd.f32 %v1187_v41, %v1125_v58  ;;  %v1348_v43 = vpop.f32.mrf.mxu0  ;;  %v3810_v41 = vsel %vm862_vm3, %v918_v24, %v919_v9  ;;  %v779_v24 = vadd.f32 %v3513_v4, %v3524_v35 }
 0x12f   : > { %v1437_v5 = vadd.f32 %v1345_v6, %v1279_v38  ;;  %2629 = vmatmul.msk.f32.gmra.mxu2 %vm507_vm0, %v3759_v17  ;;  %v1190_v32 = vpop.f32.mrf.mxu3 }
 0x130   : > { %2695 = vmatmul.msk.f32.gmra.mxu0 %vm507_vm0, %v4804_v42  ;;  %v921_v42 = vrot.slane %v4807_v52, 2 }
 0x131   : > { %v3807_v39 = vadd.f32 %v1502_v28, %v1437_v5  ;;  %v4808_v28 = vld [vmem:[#allocation19_spill] sm:$0xff] }
 0x132   : > { %v1508_v12 = vpop.f32.mrf.mxu1  ;;  %v1036_v31 = vpop.f32.mrf.mxu2 }
 0x133   : > { %4805 = vst [vmem:[#allocation14_spill] sm:$0xff] %v3807_v39  ;;  %v1126_v58 = vadd.f32 %v1036_v31, %v776_v49  ;;  %v4811_v39 = vld [vmem:[#allocation23_spill] sm:$0xff] }
 0x134   : > { %2663 = vmatmul.msk.f32.gmra.mxu3 %vm507_vm0, %v4802_v14  ;;  %v924_v35 = vrot.slane %v4811_v39, 2 }
 0x135   : > { %2729 = vmatmul.msk.f32.gmra.mxu1 %vm507_vm0, %v3810_v41  ;;  %v1280_v6 = vadd.f32 %v1190_v32, %v1126_v58  ;;  %v1351_v38 = vpop.f32.mrf.mxu0  ;;  %v3827_v32 = vsel %vm862_vm3, %v919_v9, %v921_v42  ;;  %v4810_v58 = vld [vmem:[#allocation22_spill] sm:$0xff]  ;;  %v4812_v9 = vld [vmem:[#allocation21_spill] sm:$0xff]  ;;  %v782_v42 = vadd.f32 %v3532_v37, %v3543_v27 }
 0x137   : > { %v1438_v40 = vadd.f32 %v1348_v43, %v1280_v6  ;;  %2630 = vmatmul.msk.f32.gmra.mxu2 %vm507_vm0, %v3776_v30  ;;  %v1193_v61 = vpop.f32.mrf.mxu3  ;;  %v923_v6 = vrot.slane %v4810_v58, 2 }
 0x138   : > { %2696 = vmatmul.msk.f32.gmra.mxu0 %vm507_vm0, %v4808_v28 }
 0x139   : > { %v3824_v5 = vadd.f32 %v1505_v7, %v1438_v40 }
 0x13a   : > { %v1511_v49 = vpop.f32.mrf.mxu1  ;;  %v1039_v31 = vpop.f32.mrf.mxu2 }
 0x13b   : > { %4809 = vst [vmem:[#allocation18_spill] sm:$0xff] %v3824_v5  ;;  %v1127_v22 = vadd.f32 %v1039_v31, %v779_v24  ;;  %v4814_v5 = vld [vmem:[#allocation27_spill] sm:$0xff] }
 0x13c   : > { %2664 = vmatmul.msk.f32.gmra.mxu3 %vm507_vm0, %v4803_v2  ;;  %v4815_v2 = vunpack.c.l.bf16 %v4814_v5 }
 0x13d   : > { %2730 = vmatmul.msk.f32.gmra.mxu1 %vm507_vm0, %v3827_v32  ;;  %v1281_v52 = vadd.f32 %v1193_v61, %v1127_v22  ;;  %v1354_v43 = vpop.f32.mrf.mxu0  ;;  %v3844_v61 = vsel %vm862_vm3, %v923_v6, %v924_v35  ;;  %v785_v6 = vadd.f32 %v3551_v53, %v3562_v18 }
 0x13f   : > { %v1439_v4 = vadd.f32 %v1351_v38, %v1281_v52  ;;  %2631 = vmatmul.msk.f32.gmra.mxu2 %vm507_vm0, %v3793_v13  ;;  %v1196_v7 = vpop.f32.mrf.mxu3 }
 0x140   : > { %2697 = vmatmul.msk.f32.gmra.mxu0 %vm507_vm0, %v4812_v9  ;;  %v926_v9 = vrot.slane %v4815_v2, 2 }
 0x141   : > { %v3841_v40 = vadd.f32 %v1508_v12, %v1439_v4  ;;  %v4816_v12 = vld [vmem:[#allocation28_spill] sm:$0xff] }
 0x142   : > { %v1514_v24 = vpop.f32.mrf.mxu1  ;;  %v1042_v31 = vpop.f32.mrf.mxu2 }
 0x143   : > { %4813 = vst [vmem:[#allocation19_spill] sm:$0xff] %v3841_v40  ;;  %v1128_v22 = vadd.f32 %v1042_v31, %v782_v42  ;;  %v4819_v40 = vld [vmem:[#allocation32_spill] sm:$0xff] }
 0x144   : > { %2665 = vmatmul.msk.f32.gmra.mxu3 %vm507_vm0, %v4810_v58  ;;  %v929_v18 = vrot.slane %v4819_v40, 2 }
 0x145   : > { %2731 = vmatmul.msk.f32.gmra.mxu1 %vm507_vm0, %v3844_v61  ;;  %v1282_v38 = vadd.f32 %v1196_v7, %v1128_v22  ;;  %v1357_v52 = vpop.f32.mrf.mxu0  ;;  %v3861_v7 = vsel %vm862_vm3, %v924_v35, %v926_v9  ;;  %v4818_v22 = vld [vmem:[#allocation31_spill] sm:$0xff]  ;;  %v4820_v35 = vld [vmem:[#allocation30_spill] sm:$0xff]  ;;  %v788_v9 = vadd.f32 %v3570_v34, %v3581_v33 }
 0x147   : > { %v1440_v37 = vadd.f32 %v1354_v43, %v1282_v38  ;;  %2632 = vmatmul.msk.f32.gmra.mxu2 %vm507_vm0, %v3810_v41  ;;  %v1199_v27 = vpop.f32.mrf.mxu3  ;;  %v928_v38 = vrot.slane %v4818_v22, 2 }
 0x148   : > { %2698 = vmatmul.msk.f32.gmra.mxu0 %vm507_vm0, %v4816_v12 }
 0x149   : > { %v3858_v4 = vadd.f32 %v1511_v49, %v1440_v37 }
 0x14a   : > { %v1517_v42 = vpop.f32.mrf.mxu1  ;;  %v1045_v31 = vpop.f32.mrf.mxu2 }
 0x14b   : > { %4817 = vst [vmem:[#allocation22_spill] sm:$0xff] %v3858_v4  ;;  %v1129_v5 = vadd.f32 %v1045_v31, %v785_v6  ;;  %v4822_v4 = vld [vmem:[#allocation36_spill] sm:$0xff] }
 0x14c   : > { %2666 = vmatmul.msk.f32.gmra.mxu3 %vm507_vm0, %v4811_v39  ;;  %v4823_v39 = vunpack.c.l.bf16 %v4822_v4 }
 0x14d   : > { %2732 = vmatmul.msk.f32.gmra.mxu1 %vm507_vm0, %v3861_v7  ;;  %v1283_v2 = vadd.f32 %v1199_v27, %v1129_v5  ;;  %v1360_v43 = vpop.f32.mrf.mxu0  ;;  %v3878_v27 = vsel %vm862_vm3, %v928_v38, %v929_v18  ;;  %v791_v38 = vadd.f32 %v3589_v56, %v3600_v59 }
 0x14f   : > { %v1441_v53 = vadd.f32 %v1357_v52, %v1283_v2  ;;  %2633 = vmatmul.msk.f32.gmra.mxu2 %vm507_vm0, %v3827_v32  ;;  %v1202_v49 = vpop.f32.mrf.mxu3 }
 0x150   : > { %2699 = vmatmul.msk.f32.gmra.mxu0 %vm507_vm0, %v4820_v35  ;;  %v931_v35 = vrot.slane %v4823_v39, 2 }
 0x151   : > { %v3875_v37 = vadd.f32 %v1514_v24, %v1441_v53  ;;  %v4824_v24 = vld [vmem:[#allocation37_spill] sm:$0xff] }
 0x152   : > { %v1520_v6 = vpop.f32.mrf.mxu1  ;;  %v1048_v31 = vpop.f32.mrf.mxu2 }
 0x153   : > { %4821 = vst [vmem:[#allocation27_spill] sm:$0xff] %v3875_v37  ;;  %v1130_v5 = vadd.f32 %v1048_v31, %v788_v9  ;;  %v4827_v37 = vld [vmem:[#allocation41_spill] sm:$0xff] }
 0x154   : > { %2667 = vmatmul.msk.f32.gmra.mxu3 %vm507_vm0, %v4818_v22  ;;  %v934_v59 = vrot.slane %v4827_v37, 2 }
 0x155   : > { %2733 = vmatmul.msk.f32.gmra.mxu1 %vm507_vm0, %v3878_v27  ;;  %v1284_v52 = vadd.f32 %v1202_v49, %v1130_v5  ;;  %v1363_v2 = vpop.f32.mrf.mxu0  ;;  %v3895_v49 = vsel %vm862_vm3, %v929_v18, %v931_v35  ;;  %v4826_v5 = vld [vmem:[#allocation40_spill] sm:$0xff]  ;;  %v4828_v18 = vld [vmem:[#allocation39_spill] sm:$0xff]  ;;  %v794_v35 = vadd.f32 %v3608_v19, %v3619_v26 }
 0x157   : > { %v1442_v34 = vadd.f32 %v1360_v43, %v1284_v52  ;;  %2634 = vmatmul.msk.f32.gmra.mxu2 %vm507_vm0, %v3844_v61  ;;  %v1205_v33 = vpop.f32.mrf.mxu3  ;;  %v933_v52 = vrot.slane %v4826_v5, 2 }
 0x158   : > { %2700 = vmatmul.msk.f32.gmra.mxu0 %vm507_vm0, %v4824_v24 }
 0x159   : > { %v3892_v53 = vadd.f32 %v1517_v42, %v1442_v34 }
 0x15a   : > { %v1523_v9 = vpop.f32.mrf.mxu1  ;;  %v1051_v31 = vpop.f32.mrf.mxu2 }
 0x15b   : > { %4825 = vst [vmem:[#allocation28_spill] sm:$0xff] %v3892_v53  ;;  %v1131_v4 = vadd.f32 %v1051_v31, %v791_v38  ;;  %v4830_v53 = vld [vmem:[#allocation45_spill] sm:$0xff] }
 0x15c   : > { %2668 = vmatmul.msk.f32.gmra.mxu3 %vm507_vm0, %v4819_v40  ;;  %v4831_v40 = vunpack.c.l.bf16 %v4830_v53 }
 0x15d   : > { %2734 = vmatmul.msk.f32.gmra.mxu1 %vm507_vm0, %v3895_v49  ;;  %v1285_v39 = vadd.f32 %v1205_v33, %v1131_v4  ;;  %v1366_v43 = vpop.f32.mrf.mxu0  ;;  %v3912_v33 = vsel %vm862_vm3, %v933_v52, %v934_v59  ;;  %v797_v52 = vadd.f32 %v3627_v25, %v3638_v20 }
 0x15f   : > { %v1443_v56 = vadd.f32 %v1363_v2, %v1285_v39  ;;  %2635 = vmatmul.msk.f32.gmra.mxu2 %vm507_vm0, %v3861_v7  ;;  %v1208_v42 = vpop.f32.mrf.mxu3 }
 0x160   : > { %2701 = vmatmul.msk.f32.gmra.mxu0 %vm507_vm0, %v4828_v18  ;;  %v936_v18 = vrot.slane %v4831_v40, 2 }
 0x161   : > { %v3909_v34 = vadd.f32 %v1520_v6, %v1443_v56  ;;  %v4832_v6 = vld [vmem:[#allocation46_spill] sm:$0xff] }
 0x162   : > { %v1526_v38 = vpop.f32.mrf.mxu1  ;;  %v1054_v31 = vpop.f32.mrf.mxu2 }
 0x163   : > { %4829 = vst [vmem:[#allocation31_spill] sm:$0xff] %v3909_v34  ;;  %v1132_v4 = vadd.f32 %v1054_v31, %v794_v35  ;;  %v4835_v34 = vld [vmem:[#allocation50_spill] sm:$0xff] }
 0x164   : > { %2669 = vmatmul.msk.f32.gmra.mxu3 %vm507_vm0, %v4826_v5  ;;  %v939_v20 = vrot.slane %v4835_v34, 2 }
 0x165   : > { %2735 = vmatmul.msk.f32.gmra.mxu1 %vm507_vm0, %v3912_v33  ;;  %v1286_v2 = vadd.f32 %v1208_v42, %v1132_v4  ;;  %v1369_v39 = vpop.f32.mrf.mxu0  ;;  %v3929_v42 = vsel %vm862_vm3, %v934_v59, %v936_v18  ;;  %v4834_v4 = vld [vmem:[#allocation49_spill] sm:$0xff]  ;;  %v4836_v59 = vld [vmem:[#allocation48_spill] sm:$0xff]  ;;  %v800_v18 = vadd.f32 %v3646_v60, %v3657_v63 }
 0x167   : > { %v1444_v19 = vadd.f32 %v1366_v43, %v1286_v2  ;;  %2636 = vmatmul.msk.f32.gmra.mxu2 %vm507_vm0, %v3878_v27  ;;  %v1211_v26 = vpop.f32.mrf.mxu3  ;;  %v938_v2 = vrot.slane %v4834_v4, 2 }
 0x168   : > { %2702 = vmatmul.msk.f32.gmra.mxu0 %vm507_vm0, %v4832_v6 }
 0x169   : > { %v3926_v56 = vadd.f32 %v1523_v9, %v1444_v19 }
 0x16a   : > { %v1529_v35 = vpop.f32.mrf.mxu1  ;;  %v1057_v31 = vpop.f32.mrf.mxu2 }
 0x16b   : > { %4833 = vst [vmem:[#allocation36_spill] sm:$0xff] %v3926_v56  ;;  %v1133_v53 = vadd.f32 %v1057_v31, %v797_v52  ;;  %v3946_v52 = vsel %vm862_vm3, %v938_v2, %v939_v20  ;;  %v4838_v56 = vld [vmem:[#allocation54_spill] sm:$0xff] }
 0x16c   : > { %2670 = vmatmul.msk.f32.gmra.mxu3 %vm507_vm0, %v4827_v37  ;;  %v4839_v37 = vunpack.c.l.bf16 %v4838_v56  ;;  %v2920_v2 = vld [vmem:[%s3006_s10 + $0xc0] sm:$0xff]  }
 0x16d   : > { %2736 = vmatmul.msk.f32.gmra.mxu1 %vm507_vm0, %v3929_v42  ;;  %v1287_v40 = vadd.f32 %v1211_v26, %v1133_v53  ;;  %v1372_v43 = vpop.f32.mrf.mxu0 }
 0x16f   : > { %v1445_v25 = vadd.f32 %v1369_v39, %v1287_v40  ;;  %2637 = vmatmul.msk.f32.gmra.mxu2 %vm507_vm0, %v3895_v49  ;;  %v1214_v9 = vpop.f32.mrf.mxu3 }
 0x170   : > { %2703 = vmatmul.msk.f32.gmra.mxu0 %vm507_vm0, %v4836_v59  ;;  %v941_v59 = vrot.slane %v4839_v37, 2 }
 0x171   : > { %v3943_v19 = vadd.f32 %v1526_v38, %v1445_v25  ;;  %v4840_v38 = vld [vmem:[#allocation55_spill] sm:$0xff]  ;;  %v803_v25 = vadd.f32 %v3665_v36, %v3676_v23 }
 0x172   : > { %v1532_v26 = vpop.f32.mrf.mxu1  ;;  %v1060_v31 = vpop.f32.mrf.mxu2 }
 0x173   : > { %4837 = vst [vmem:[#allocation37_spill] sm:$0xff] %v3943_v19  ;;  %v1134_v53 = vadd.f32 %v1060_v31, %v800_v18 }
 0x174   : > { %2671 = vmatmul.msk.f32.gmra.mxu3 %vm507_vm0, %v4834_v4 }
 0x175   : > { %2737 = vmatmul.msk.f32.gmra.mxu1 %vm507_vm0, %v3946_v52  ;;  %v1288_v39 = vadd.f32 %v1214_v9, %v1134_v53  ;;  %v1375_v40 = vpop.f32.mrf.mxu0  ;;  %v3964_v9 = vsel %vm862_vm3, %v939_v20, %v941_v59  ;;  %v3968_v53 = vunpack.c.h.bf16 %v2920_v2 }
 0x177   : > { %v1446_v60 = vadd.f32 %v1372_v43, %v1288_v39  ;;  %2638 = vmatmul.msk.f32.gmra.mxu2 %vm507_vm0, %v3912_v33  ;;  %v1217_v63 = vpop.f32.mrf.mxu3  ;;  %v3966_v43 = vunpack.c.l.bf16 %v2920_v2  ;;  %v1468_v20 = vrot.slane %v3968_v53, 2  ;;  %v4843_v2 = vld [vmem:[#allocation57_spill] sm:$0xff] }
 0x178   : > { %2704 = vmatmul.msk.f32.gmra.mxu0 %vm507_vm0, %v4840_v38 }
 0x179   : > { %v3961_v18 = vadd.f32 %v1529_v35, %v1446_v60  ;;  %4842 = vst [vmem:[#allocation45_spill] sm:$0xff] %v3966_v43  ;;  %v1467_v35 = vrot.slane %v3966_v43, 2  ;;  %v806_v60 = vadd.f32 %v3684_v1, %v3695_v3 }
 0x17a   : > { %v1535_v31 = vpop.f32.mrf.mxu1  ;;  %v1063_v37 = vpop.f32.mrf.mxu2 }
 0x17b   : > { %4841 = vst [vmem:[#allocation40_spill] sm:$0xff] %v3961_v18  ;;  %v1135_v56 = vadd.f32 %v1063_v37, %v803_v25  ;;  %v315_v25 = vld [vmem:[%s3006_s10 + $0xc8] sm:$0x1]  ;;  %v1311_v18 = vrot.slane %v3968_v53, 1 }
 0x17c   : > { %2672 = vmatmul.msk.f32.gmra.mxu3 %vm507_vm0, %v4835_v34  ;;  %v369_v19 = vunpack.c.l.bf16 %v315_v25 }
 0x17d   : > { %2738 = vmatmul.msk.f32.gmra.mxu1 %vm507_vm0, %v3964_v9  ;;  %v1289_v23 = vadd.f32 %v1217_v63, %v1135_v56  ;;  %v1378_v36 = vpop.f32.mrf.mxu0  ;;  %v1310_v56 = vrot.slane %v3966_v43, 1 }
 0x17f   : > { %v1447_v59 = vadd.f32 %v1375_v40, %v1289_v23  ;;  %2639 = vmatmul.msk.f32.gmra.mxu2 %vm507_vm0, %v3929_v42  ;;  %v1220_v39 = vpop.f32.mrf.mxu3  ;;  %v3988_v40 = vsel %vm862_vm3, %v1467_v35, %v1468_v20 }
 0x180   : > { %2705 = vmatmul.msk.f32.gmra.mxu0 %vm507_vm0, %v4843_v2  ;;  %4845 = vst [vmem:[#allocation49_spill] sm:$0xff] %v3988_v40 }
 0x181   : > { %v3983_v37 = vadd.f32 %v1532_v26, %v1447_v59  ;;  %v3995_v26 = vsel %vm423_vm1, %v1310_v56, %v1311_v18  ;;  %v1470_v59 = vrot.slane %v369_v19, 2 }
 0x182   : > { %v1538_v63 = vpop.f32.mrf.mxu1  ;;  %v1066_v23 = vpop.f32.mrf.mxu2 }
 0x183   : > { %4844 = vst [vmem:[#allocation46_spill] sm:$0xff] %v3983_v37  ;;  %v1136_v34 = vadd.f32 %v1066_v23, %v806_v60  ;;  %v809_v60 = vadd.f32 %v3703_v47, %v3714_v48 }
 0x184   : > { %2673 = vmatmul.msk.f32.gmra.mxu3 %vm507_vm0, %v3966_v43 }
 0x185   : > { %2739 = vmatmul.msk.f32.gmra.mxu1 %vm507_vm0, %v3988_v40  ;;  %v1290_v1 = vadd.f32 %v1220_v39, %v1136_v34  ;;  %v1381_v3 = vpop.f32.mrf.mxu0  ;;  %v1313_v34 = vrot.slane %v369_v19, 1  ;;  %v4006_v39 = vsel %vm862_vm3, %v1468_v20, %v1470_v59  ;;  %v812_v19 = vadd.f32 %v3722_v29, %v3733_v11 }
 0x187   : > { %v1448_v37 = vadd.f32 %v1378_v36, %v1290_v1  ;;  %2640 = vmatmul.msk.f32.gmra.mxu2 %vm507_vm0, %v3946_v52  ;;  %v1223_v35 = vpop.f32.mrf.mxu3  ;;  %v4013_v43 = vsel %vm423_vm1, %v1311_v18, %v1313_v34 }
 0x188   : > { %2706 = vmatmul.msk.f32.gmra.mxu0 %vm507_vm0, %v3995_v26 }
 0x189   : > { %v4003_v25 = vadd.f32 %v1535_v31, %v1448_v37 }
 0x18a   : > { %v1541_v23 = vpop.f32.mrf.mxu1  ;;  %v1069_v56 = vpop.f32.mrf.mxu2 }
 0x18b   : > { %v1137_v40 = vadd.f32 %v1069_v56, %v809_v60 }
 0x18c   : > { %2674 = vmatmul.msk.f32.gmra.mxu3 %vm507_vm0, %v3968_v53 }
 0x18d   : > { %2740 = vmatmul.msk.f32.gmra.mxu1 %vm507_vm0, %v4006_v39  ;;  %v1291_v36 = vadd.f32 %v1223_v35, %v1137_v40  ;;  %v1384_v1 = vpop.f32.mrf.mxu0 }
 0x18f   : > { %v1449_v48 = vadd.f32 %v1381_v3, %v1291_v36  ;;  %2641 = vmatmul.msk.f32.gmra.mxu2 %vm507_vm0, %v3964_v9  ;;  %v1226_v47 = vpop.f32.mrf.mxu3 }
 0x190   : > { %2707 = vmatmul.msk.f32.gmra.mxu0 %vm507_vm0, %v4013_v43 }
 0x191   : > { %v4021_v31 = vadd.f32 %v1538_v63, %v1449_v48 }
 0x192   : > { %v1544_v20 = vpop.f32.mrf.mxu1  ;;  %v1072_v37 = vpop.f32.mrf.mxu2 }
 0x193   : > { %v1138_v40 = vadd.f32 %v1072_v37, %v812_v19  ;;  %v4850_v37 = vld [vmem:[#allocation20_spill] sm:$0xff] }
 0x194   : > { %2775 = vmatmul.msk.f32.vlgmr.msra.gmra.mxu3 %vm507_vm0, %v3139_v0 }
 0x195   : > { %2841 = vmatmul.msk.f32.vlgmr.msra.gmra.mxu1 %vm2232_vm4, %v3085_v44  ;;  %v1292_v18 = vadd.f32 %v1226_v47, %v1138_v40  ;;  %v1387_v3 = vpop.f32.mrf.mxu0  ;;  %v4846_v44 = vld [vmem:[#allocation10_spill] sm:$0xff]  ;;  %v4849_v47 = vld [vmem:[#allocation59_spill] sm:$0xff] }
 0x197   : > { %v1450_v59 = vadd.f32 %v1384_v1, %v1292_v18  ;;  %2742 = vmatmul.msk.f32.vlgmr.msra.gmra.mxu2 %vm507_vm0, %v3112_v54  ;;  %v1229_v35 = vpop.f32.mrf.mxu3  ;;  %v4847_v54 = vld [vmem:[#allocation11_spill] sm:$0xff] }
 0x198   : > { %2808 = vmatmul.msk.f32.vlgmr.msra.gmra.mxu0 %vm507_vm0, %v3480_v45  ;;  %v4848_v45 = vld [vmem:[#allocation60_spill] sm:$0xff] }
 0x199   : > { %v4031_v29 = vadd.f32 %v1541_v23, %v1450_v59  ;;  %v4851_v59 = vld [vmem:[#allocation16_spill] sm:$0xff] }
 0x19a   : > { %v1547_v11 = vpop.f32.mrf.mxu1  ;;  %v1075_v63 = vpop.f32.mrf.mxu2 }
 0x19b   : > { %v1139_v60 = vadd.f32 %v1075_v63, %v3464_v8 }
 0x19c   : > { %2776 = vmatmul.msk.f32.gmra.mxu3 %vm507_vm0, %v3164_v10 }
 0x19d   : > { %2842 = vmatmul.msk.f32.gmra.mxu1 %vm2232_vm4, %v4846_v44  ;;  %v1293_v34 = vadd.f32 %v1229_v35, %v1139_v60  ;;  %v1390_v56 = vpop.f32.mrf.mxu0  ;;  %v4852_v44 = vld [vmem:[#allocation61_spill] sm:$0xff] }
 0x19f   : > { %v1451_v36 = vadd.f32 %v1387_v3, %v1293_v34  ;;  %2743 = vmatmul.msk.f32.gmra.mxu2 %vm507_vm0, %v4847_v54  ;;  %v1232_v1 = vpop.f32.mrf.mxu3 }
 0x1a0   : > { %2809 = vmatmul.msk.f32.gmra.mxu0 %vm507_vm0, %v4848_v45 }
 0x1a1   : > { %v4042_v23 = vadd.f32 %v1544_v20, %v1451_v36  ;;  %v4853_v36 = vld [vmem:[#allocation24_spill] sm:$0xff] }
 0x1a2   : > { %v1550_v48 = vpop.f32.mrf.mxu1  ;;  %v1078_v8 = vpop.f32.mrf.mxu2 }
 0x1a3   : > { %v1140_v19 = vadd.f32 %v1078_v8, %v4849_v47 }
 0x1a4   : > { %2777 = vmatmul.msk.f32.gmra.mxu3 %vm507_vm0, %v4850_v37 }
 0x1a5   : > { %2843 = vmatmul.msk.f32.gmra.mxu1 %vm2232_vm4, %v3139_v0  ;;  %v1294_v40 = vadd.f32 %v1232_v1, %v1140_v19  ;;  %v1393_v18 = vpop.f32.mrf.mxu0  ;;  %v4854_v1 = vld [vmem:[#allocation17_spill] sm:$0xff]  ;;  %v4856_v19 = vld [vmem:[#allocation62_spill] sm:$0xff] }
 0x1a7   : > { %v1452_v3 = vadd.f32 %v1390_v56, %v1294_v40  ;;  %2744 = vmatmul.msk.f32.gmra.mxu2 %vm507_vm0, %v4851_v59  ;;  %v1235_v35 = vpop.f32.mrf.mxu3 }
 0x1a8   : > { %2810 = vmatmul.msk.f32.gmra.mxu0 %vm507_vm0, %v3516_v15  ;;  %v4855_v15 = vld [vmem:[#allocation63_spill] sm:$0xff] }
 0x1a9   : > { %v4053_v20 = vadd.f32 %v1547_v11, %v1452_v3  ;;  %v4857_v3 = vld [vmem:[#allocation29_spill] sm:$0xff] }
 0x1aa   : > { %v1553_v63 = vpop.f32.mrf.mxu1  ;;  %v1081_v60 = vpop.f32.mrf.mxu2 }
 0x1ab   : > { %v1141_v34 = vadd.f32 %v1081_v60, %v4852_v44 }
 0x1ac   : > { %2778 = vmatmul.msk.f32.gmra.mxu3 %vm507_vm0, %v4853_v36 }
 0x1ad   : > { %2844 = vmatmul.msk.f32.gmra.mxu1 %vm2232_vm4, %v3164_v10  ;;  %v1295_v0 = vadd.f32 %v1235_v35, %v1141_v34  ;;  %v1396_v56 = vpop.f32.mrf.mxu0  ;;  %v4858_v35 = vld [vmem:[#allocation25_spill] sm:$0xff] }
 0x1af   : > { %v1453_v54 = vadd.f32 %v1393_v18, %v1295_v0  ;;  %2745 = vmatmul.msk.f32.gmra.mxu2 %vm507_vm0, %v4854_v1  ;;  %v1238_v45 = vpop.f32.mrf.mxu3  ;;  %v4859_v0 = vld [vmem:[#allocation64_spill] sm:$0xff]  ;;  %v4860_v1 = vld [vmem:[#allocation33_spill] sm:$0xff] }
 0x1b0   : > { %2811 = vmatmul.msk.f32.gmra.mxu0 %vm507_vm0, %v4855_v15  ;;  %v4861_v15 = vld [vmem:[#allocation26_spill] sm:$0xff] }
 0x1b1   : > { %v4064_v11 = vadd.f32 %v1550_v48, %v1453_v54 }
 0x1b2   : > { %v1556_v8 = vpop.f32.mrf.mxu1  ;;  %v1084_v47 = vpop.f32.mrf.mxu2 }
 0x1b3   : > { %v1142_v40 = vadd.f32 %v1084_v47, %v4856_v19 }
 0x1b4   : > { %2779 = vmatmul.msk.f32.gmra.mxu3 %vm507_vm0, %v4857_v3 }
 0x1b5   : > { %2845 = vmatmul.msk.f32.gmra.mxu1 %vm2232_vm4, %v4850_v37  ;;  %v1296_v10 = vadd.f32 %v1238_v45, %v1142_v40  ;;  %v1399_v18 = vpop.f32.mrf.mxu0 }
 0x1b7   : > { %v1454_v59 = vadd.f32 %v1396_v56, %v1296_v10  ;;  %2746 = vmatmul.msk.f32.gmra.mxu2 %vm507_vm0, %v4858_v35  ;;  %v1241_v60 = vpop.f32.mrf.mxu3  ;;  %v4863_v10 = vld [vmem:[#allocation65_spill] sm:$0xff]  ;;  %v4864_v35 = vld [vmem:[#allocation38_spill] sm:$0xff] }
 0x1b8   : > { %2812 = vmatmul.msk.f32.gmra.mxu0 %vm507_vm0, %v3554_v62  ;;  %v4862_v62 = vld [vmem:[#allocation66_spill] sm:$0xff] }
 0x1b9   : > { %v4075_v48 = vadd.f32 %v1553_v63, %v1454_v59 }
 0x1ba   : > { %v1559_v44 = vpop.f32.mrf.mxu1  ;;  %v1087_v34 = vpop.f32.mrf.mxu2 }
 0x1bb   : > { %v1143_v54 = vadd.f32 %v1087_v34, %v4859_v0  ;;  %v4865_v34 = vld [vmem:[#allocation34_spill] sm:$0xff] }
 0x1bc   : > { %2780 = vmatmul.msk.f32.gmra.mxu3 %vm507_vm0, %v4860_v1 }
 0x1bd   : > { %2846 = vmatmul.msk.f32.gmra.mxu1 %vm2232_vm4, %v4853_v36  ;;  %v1297_v37 = vadd.f32 %v1241_v60, %v1143_v54  ;;  %v1402_v56 = vpop.f32.mrf.mxu0 }
 0x1bf   : > { %v1455_v45 = vadd.f32 %v1399_v18, %v1297_v37  ;;  %2747 = vmatmul.msk.f32.gmra.mxu2 %vm507_vm0, %v4861_v15  ;;  %v1244_v47 = vpop.f32.mrf.mxu3 }
 0x1c0   : > { %2813 = vmatmul.msk.f32.gmra.mxu0 %vm507_vm0, %v4862_v62  ;;  %v4867_v62 = vld [vmem:[#allocation42_spill] sm:$0xff] }
 0x1c1   : > { %v4086_v63 = vadd.f32 %v1556_v8, %v1455_v45  ;;  %v4866_v45 = vld [vmem:[#allocation67_spill] sm:$0xff] }
 0x1c2   : > { %v1562_v19 = vpop.f32.mrf.mxu1  ;;  %v1090_v40 = vpop.f32.mrf.mxu2 }
 0x1c3   : > { %v1144_v59 = vadd.f32 %v1090_v40, %v4863_v10  ;;  %v4868_v40 = vld [vmem:[#allocation35_spill] sm:$0xff] }
 0x1c4   : > { %2781 = vmatmul.msk.f32.gmra.mxu3 %vm507_vm0, %v4864_v35 }
 0x1c5   : > { %2847 = vmatmul.msk.f32.gmra.mxu1 %vm2232_vm4, %v4857_v3  ;;  %v1298_v36 = vadd.f32 %v1244_v47, %v1144_v59  ;;  %v1405_v18 = vpop.f32.mrf.mxu0 }
 0x1c7   : > { %v1456_v60 = vadd.f32 %v1402_v56, %v1298_v36  ;;  %2748 = vmatmul.msk.f32.gmra.mxu2 %vm507_vm0, %v4865_v34  ;;  %v1247_v0 = vpop.f32.mrf.mxu3 }
 0x1c8   : > { %2814 = vmatmul.msk.f32.gmra.mxu0 %vm507_vm0, %v3592_v16  ;;  %v4869_v16 = vld [vmem:[#allocation69_spill] sm:$0xff] }
 0x1c9   : > { %v4097_v8 = vadd.f32 %v1559_v44, %v1456_v60  ;;  %v4870_v60 = vld [vmem:[#allocation68_spill] sm:$0xff] }
 0x1ca   : > { %v1565_v54 = vpop.f32.mrf.mxu1  ;;  %v1093_v37 = vpop.f32.mrf.mxu2 }
 0x1cb   : > { %v1145_v15 = vadd.f32 %v1093_v37, %v4866_v45  ;;  %v4871_v37 = vld [vmem:[#allocation47_spill] sm:$0xff] }
 0x1cc   : > { %2782 = vmatmul.msk.f32.gmra.mxu3 %vm507_vm0, %v4867_v62  ;;  %v4872_v45 = vld [vmem:[#allocation43_spill] sm:$0xff] }
 0x1cd   : > { %2848 = vmatmul.msk.f32.gmra.mxu1 %vm2232_vm4, %v4860_v1  ;;  %v1299_v3 = vadd.f32 %v1247_v0, %v1145_v15  ;;  %v1408_v56 = vpop.f32.mrf.mxu0 }
 0x1cf   : > { %v1457_v47 = vadd.f32 %v1405_v18, %v1299_v3  ;;  %2749 = vmatmul.msk.f32.gmra.mxu2 %vm507_vm0, %v4868_v40  ;;  %v1250_v10 = vpop.f32.mrf.mxu3  ;;  %v4873_v40 = vld [vmem:[#allocation70_spill] sm:$0xff] }
 0x1d0   : > { %2815 = vmatmul.msk.f32.gmra.mxu0 %vm507_vm0, %v4869_v16 }
 0x1d1   : > { %v4108_v44 = vadd.f32 %v1562_v19, %v1457_v47 }
 0x1d2   : > { %v1568_v59 = vpop.f32.mrf.mxu1  ;;  %v1096_v36 = vpop.f32.mrf.mxu2 }
 0x1d3   : > { %v1146_v34 = vadd.f32 %v1096_v36, %v4870_v60  ;;  %v4874_v36 = vld [vmem:[#allocation51_spill] sm:$0xff]  ;;  %v4875_v60 = vld [vmem:[#allocation44_spill] sm:$0xff] }
 0x1d4   : > { %2783 = vmatmul.msk.f32.gmra.mxu3 %vm507_vm0, %v4871_v37 }
 0x1d5   : > { %2849 = vmatmul.msk.f32.gmra.mxu1 %vm2232_vm4, %v4864_v35  ;;  %v1300_v1 = vadd.f32 %v1250_v10, %v1146_v34  ;;  %v1411_v18 = vpop.f32.mrf.mxu0 }
 0x1d7   : > { %v1458_v0 = vadd.f32 %v1408_v56, %v1300_v1  ;;  %2750 = vmatmul.msk.f32.gmra.mxu2 %vm507_vm0, %v4872_v45  ;;  %v1253_v15 = vpop.f32.mrf.mxu3  ;;  %v4878_v45 = vld [vmem:[#allocation71_spill] sm:$0xff] }
 0x1d8   : > { %2816 = vmatmul.msk.f32.gmra.mxu0 %vm507_vm0, %v3630_v46  ;;  %v4876_v46 = vld [vmem:[#allocation72_spill] sm:$0xff] }
 0x1d9   : > { %v4119_v19 = vadd.f32 %v1565_v54, %v1458_v0 }
 0x1da   : > { %v1571_v3 = vpop.f32.mrf.mxu1  ;;  %v1099_v47 = vpop.f32.mrf.mxu2 }
 0x1db   : > { %v1147_v16 = vadd.f32 %v1099_v47, %v4873_v40  ;;  %v4879_v40 = vld [vmem:[#allocation56_spill] sm:$0xff] }
 0x1dc   : > { %2784 = vmatmul.msk.f32.gmra.mxu3 %vm507_vm0, %v4874_v36 }
 0x1dd   : > { %2850 = vmatmul.msk.f32.gmra.mxu1 %vm2232_vm4, %v4867_v62  ;;  %v1301_v35 = vadd.f32 %v1253_v15, %v1147_v16  ;;  %v1414_v56 = vpop.f32.mrf.mxu0  ;;  %v4880_v16 = vld [vmem:[#allocation52_spill] sm:$0xff] }
 0x1df   : > { %v1459_v10 = vadd.f32 %v1411_v18, %v1301_v35  ;;  %2751 = vmatmul.msk.f32.gmra.mxu2 %vm507_vm0, %v4875_v60  ;;  %v1256_v34 = vpop.f32.mrf.mxu3  ;;  %v4881_v60 = vld [vmem:[#allocation74_spill] sm:$0xff] }
 0x1e0   : > { %2817 = vmatmul.msk.f32.gmra.mxu0 %vm507_vm0, %v4876_v46 }
 0x1e1   : > { %v4130_v54 = vadd.f32 %v1568_v59, %v1459_v10 }
 0x1e2   : > { %v1574_v1 = vpop.f32.mrf.mxu1  ;;  %v1102_v0 = vpop.f32.mrf.mxu2 }
 0x1e3   : > { %4877 = vst [vmem:[#allocation54_spill] sm:$0xff] %v4130_v54  ;;  %v1148_v47 = vadd.f32 %v1102_v0, %v4878_v45  ;;  %v4883_v0 = vld [vmem:[#allocation73_spill] sm:$0xff]  ;;  %v4884_v54 = vld [vmem:[#allocation58_spill] sm:$0xff] }
 0x1e4   : > { %2785 = vmatmul.msk.f32.gmra.mxu3 %vm507_vm0, %v4879_v40 }
 0x1e5   : > { %2851 = vmatmul.msk.f32.gmra.mxu1 %vm2232_vm4, %v4871_v37  ;;  %v1302_v62 = vadd.f32 %v1256_v34, %v1148_v47  ;;  %v1417_v18 = vpop.f32.mrf.mxu0  ;;  %v4885_v47 = vld [vmem:[#allocation53_spill] sm:$0xff] }
 0x1e7   : > { %v1460_v15 = vadd.f32 %v1414_v56, %v1302_v62  ;;  %2752 = vmatmul.msk.f32.gmra.mxu2 %vm507_vm0, %v4880_v16  ;;  %v1259_v35 = vpop.f32.mrf.mxu3  ;;  %v4886_v16 = vld [vmem:[#allocation76_spill] sm:$0xff] }
 0x1e8   : > { %2818 = vmatmul.msk.f32.gmra.mxu0 %vm507_vm0, %v4881_v60 }
 0x1e9   : > { %v4141_v59 = vadd.f32 %v1571_v3, %v1460_v15 }
 0x1ea   : > { %v1577_v10 = vpop.f32.mrf.mxu1  ;;  %v1105_v46 = vpop.f32.mrf.mxu2 }
 0x1eb   : > { %4882 = vst [vmem:[#allocation55_spill] sm:$0xff] %v4141_v59  ;;  %v1149_v45 = vadd.f32 %v1105_v46, %v4883_v0  ;;  %v4888_v46 = vld [vmem:[#allocation75_spill] sm:$0xff]  ;;  %v4889_v59 = vld [vmem:[#allocation4_spill] sm:$0xff] }
 0x1ec   : > { %2786 = vmatmul.msk.f32.gmra.mxu3 %vm507_vm0, %v4884_v54 }
 0x1ed   : > { %2852 = vmatmul.msk.f32.gmra.mxu1 %vm2232_vm4, %v4874_v36  ;;  %v1303_v37 = vadd.f32 %v1259_v35, %v1149_v45  ;;  %v1420_v56 = vpop.f32.mrf.mxu0  ;;  %v4890_v45 = vld [vmem:[#allocation2_spill] sm:$0xff] }
 0x1ef   : > { %v1461_v34 = vadd.f32 %v1417_v18, %v1303_v37  ;;  %2753 = vmatmul.msk.f32.gmra.mxu2 %vm507_vm0, %v4885_v47  ;;  %v1262_v62 = vpop.f32.mrf.mxu3  ;;  %v4891_v47 = vld [vmem:[#allocation78_spill] sm:$0xff] }
 0x1f0   : > { %2819 = vmatmul.msk.f32.gmra.mxu0 %vm507_vm0, %v4886_v16 }
 0x1f1   : > { %v4152_v3 = vadd.f32 %v1574_v1, %v1461_v34 }
 0x1f2   : > { %v1580_v15 = vpop.f32.mrf.mxu1  ;;  %v1108_v60 = vpop.f32.mrf.mxu2 }
 0x1f3   : > { %4887 = vst [vmem:[#allocation57_spill] sm:$0xff] %v4152_v3  ;;  %v1150_v0 = vadd.f32 %v1108_v60, %v4888_v46  ;;  %v4892_v60 = vld [vmem:[#allocation77_spill] sm:$0xff] }
 0x1f4   : > { %2787 = vmatmul.msk.f32.gmra.mxu3 %vm507_vm0, %v4889_v59  ;;  %v4893_v3 = vld [vmem:[#allocation5_spill] sm:$0xff] }
 0x1f5   : > { %2853 = vmatmul.msk.f32.gmra.mxu1 %vm2232_vm4, %v4879_v40  ;;  %v1304_v36 = vadd.f32 %v1262_v62, %v1150_v0  ;;  %v1423_v18 = vpop.f32.mrf.mxu0  ;;  %v4894_v0 = vld [vmem:[#allocation3_spill] sm:$0xff] }
 0x1f7   : > { %v1462_v35 = vadd.f32 %v1420_v56, %v1304_v36  ;;  %2754 = vmatmul.msk.f32.gmra.mxu2 %vm507_vm0, %v4890_v45  ;;  %v1265_v37 = vpop.f32.mrf.mxu3 }
 0x1f8   : > { %2820 = vmatmul.msk.f32.gmra.mxu0 %vm507_vm0, %v4891_v47  ;;  %v4895_v47 = vld [vmem:[#allocation79_spill] sm:$0xff] }
 0x1f9   : > { %v4163_v1 = vadd.f32 %v1577_v10, %v1462_v35 }
 0x1fa   : > { %v1583_v34 = vpop.f32.mrf.mxu1  ;;  %v1111_v16 = vpop.f32.mrf.mxu2 }
 0x1fb   : > { %v1151_v46 = vadd.f32 %v1111_v16, %v4892_v60  ;;  %v4896_v60 = vld [vmem:[#allocation8_spill] sm:$0xff] }
 0x1fc   : > { %2788 = vmatmul.msk.f32.gmra.mxu3 %vm507_vm0, %v4893_v3 }
 0x1fd   : > { %2854 = vmatmul.msk.f32.gmra.mxu1 %vm2232_vm4, %v4884_v54  ;;  %v1305_v40 = vadd.f32 %v1265_v37, %v1151_v46  ;;  %v1426_v56 = vpop.f32.mrf.mxu0  ;;  %v4897_v46 = vld [vmem:[#allocation6_spill] sm:$0xff] }
 0x1ff   : > { %v1463_v62 = vadd.f32 %v1423_v18, %v1305_v40  ;;  %2755 = vmatmul.msk.f32.gmra.mxu2 %vm507_vm0, %v4894_v0  ;;  %v1268_v36 = vpop.f32.mrf.mxu3  ;;  %v4898_v0 = vld [vmem:[#allocation80_spill] sm:$0xff] }
 0x200   : > { %2821 = vmatmul.msk.f32.gmra.mxu0 %vm507_vm0, %v3725_v21 }
 0x201   : > { %v4174_v10 = vadd.f32 %v1580_v15, %v1463_v62 }
 0x202   : > { %v1586_v35 = vpop.f32.mrf.mxu1  ;;  %v1114_v45 = vpop.f32.mrf.mxu2 }
 0x203   : > { %v1152_v16 = vadd.f32 %v1114_v45, %v4895_v47 }
 0x204   : > { %2789 = vmatmul.msk.f32.gmra.mxu3 %vm507_vm0, %v4896_v60 }
 0x205   : > { %2855 = vmatmul.msk.f32.gmra.mxu1 %vm2232_vm4, %v4889_v59  ;;  %v1306_v54 = vadd.f32 %v1268_v36, %v1152_v16  ;;  %v1429_v18 = vpop.f32.mrf.mxu0  ;;  %v4196_v36 = vld [vmem:[%s4582_s4] ss:$0 sm:$0xff] }
 0x207   : > { %v1464_v37 = vadd.f32 %v1426_v56, %v1306_v54  ;;  %2756 = vmatmul.msk.f32.gmra.mxu2 %vm507_vm0, %v4897_v46  ;;  %v1271_v21 = vpop.f32.mrf.mxu3 }
 0x208   : > { %2822 = vmatmul.msk.f32.gmra.mxu0 %vm507_vm0, %v3742_v57 }
 0x209   : > { %v4185_v15 = vadd.f32 %v1583_v34, %v1464_v37  ;;  %v4899_v34 = vld [vmem:[#allocation7_spill] sm:$0xff] }
 0x20a   : > { %v1589_v40 = vpop.f32.mrf.mxu1  ;;  %v1117_v62 = vpop.f32.mrf.mxu2 }
 0x20b   : > { %v1153_v45 = vadd.f32 %v1117_v62, %v4898_v0 }
 0x20c   : > { %2790 = vmatmul.msk.f32.gmra.mxu3 %vm507_vm0, %v3099_v50 }
 0x20d   : > { %2856 = vmatmul.msk.f32.gmra.mxu1 %vm2232_vm4, %v4893_v3  ;;  %v1307_v59 = vadd.f32 %v1271_v21, %v1153_v45  ;;  %v1432_v56 = vpop.f32.mrf.mxu0 }
 0x20f   : > { %v1465_v57 = vadd.f32 %v1429_v18, %v1307_v59  ;;  %2757 = vmatmul.msk.f32.gmra.mxu2 %vm507_vm0, %v4899_v34  ;;  %v1274_v47 = vpop.f32.mrf.mxu3  ;;  %v4900_v18 = vld [vmem:[#allocation81_spill] sm:$0xff]  ;;  %v4901_v34 = vld [vmem:[#allocation82_spill] sm:$0xff] }
 0x210   : > { %2823 = vmatmul.msk.f32.gmra.mxu0 %vm507_vm0, %v3759_v17 }
 0x211   : > { %v4202_v16 = vadd.f32 %v1586_v35, %v1465_v57 }
 0x212   : > { %v2318_v3 = vpop.f32.mrf.mxu1  ;;  %v1120_v54 = vpop.f32.mrf.mxu2 }
 0x213   : > { %v2319_v37 = vadd.f32 %v4196_v36, %v2318_v3  ;;  %v1154_v46 = vadd.f32 %v1120_v54, %v4900_v18 }
 0x214   : > { %2791 = vmatmul.msk.f32.gmra.mxu3 %vm507_vm0, %v4800_v55 }
 0x215   : > { %2414 = vst.msk [vmem:[%s4207_s20] sm:$0xff] %vm2232_vm4, %v2319_v37  ;;  %2857 = vmatmul.msk.f32.gmra.mxu1 %vm2232_vm4, %v4896_v60  ;;  %v1308_v17 = vadd.f32 %v1274_v47, %v1154_v46  ;;  %v1965_v35 = vpop.f32.mrf.mxu0  ;;  %v4902_v60 = vld [vmem:[#allocation13_spill] sm:$0xff] }
 0x216   : > { %v4903_v47 = vld [vmem:[#allocation9_spill] sm:$0xff] }
 0x217   : > { %v1466_v21 = vadd.f32 %v1432_v56, %v1308_v17  ;;  %2758 = vmatmul.msk.f32.gmra.mxu2 %vm507_vm0, %v3103_v51  ;;  %v1808_v62 = vpop.f32.mrf.mxu3 }
 0x218   : > { %2824 = vmatmul.msk.f32.gmra.mxu0 %vm507_vm0, %v3776_v30  ;;  %v4234_v30 = vld [vmem:[%s4580_s2] ss:$0 sm:$0xff] }
 0x219   : > { %v4221_v0 = vadd.f32 %v1589_v40, %v1466_v21  ;;  %v4904_v21 = vld [vmem:[#allocation12_spill] sm:$0xff] }
 0x21a   : > { %v2321_v45 = vpop.f32.mrf.mxu1  ;;  %v1650_v59 = vpop.f32.mrf.mxu2 }
 0x21b   : > { %v2322_v57 = vadd.f32 %v4196_v36, %v2321_v45  ;;  %v1746_v3 = vadd.f32 %v1650_v59, %v4901_v34 }
 0x21c   : > { %2792 = vmatmul.msk.f32.gmra.mxu3 %vm507_vm0, %v4902_v60 }
 0x21d   : > { %2415 = vst.msk [vmem:[%s4207_s20 + $0x8] sm:$0xff] %vm2232_vm4, %v2322_v57  ;;  %2858 = vmatmul.msk.f32.gmra.mxu1 %vm2232_vm4, %v3099_v50  ;;  %v1904_v51 = vadd.f32 %v1808_v62, %v1746_v3  ;;  %v1968_v40 = vpop.f32.mrf.mxu0 }
 0x21f   : > { %v2061_v56 = vadd.f32 %v1965_v35, %v1904_v51  ;;  %2759 = vmatmul.msk.f32.gmra.mxu2 %vm507_vm0, %v4903_v47  ;;  %v1811_v54 = vpop.f32.mrf.mxu3  ;;  %v4905_v47 = vld [vmem:[#allocation14_spill] sm:$0xff] }
 0x220   : > { %2825 = vmatmul.msk.f32.gmra.mxu0 %vm507_vm0, %v3793_v13 }
 0x221   : > { %v2097_v37 = vadd.f32 %v4234_v30, %v2061_v56 }
 0x222   : > { %v2324_v50 = vpop.f32.mrf.mxu1  ;;  %v1653_v18 = vpop.f32.mrf.mxu2 }
 0x223   : > { %v2325_v46 = vadd.f32 %v4196_v36, %v2324_v50  ;;  %v2129_v17 = vmax.f32 %v2097_v37, 0.0  ;;  %v1747_v62 = vadd.f32 %v1653_v18, %v4904_v21  ;;  %v4906_v37 = vld [vmem:[#allocation21_spill] sm:$0xff]  ;;  %v4907_v18 = vld [vmem:[#allocation15_spill] sm:$0xff] }
 0x224   : > { %2793 = vmatmul.msk.f32.gmra.mxu3 %vm507_vm0, %v4808_v28 }
 0x225   : > { %2416 = vst.msk [vmem:[%s4207_s20 + $0x10] sm:$0xff] %vm2232_vm4, %v2325_v46  ;;  %2859 = vmatmul.msk.f32.gmra.mxu1 %vm2232_vm4, %v4800_v55  ;;  %v2161_v13 = vpack.c.bf16 %v2129_v17, %v2129_v17  ;;  %v1905_v35 = vadd.f32 %v1811_v54, %v1747_v62  ;;  %v1971_v45 = vpop.f32.mrf.mxu0 }
 0x227   : > { %2194 = vst.msk [vmem:[%s4247_s28] sm:$0xf] %vm2193_vm5, %v2161_v13  ;;  %v2062_v59 = vadd.f32 %v1968_v40, %v1905_v35  ;;  %2760 = vmatmul.msk.f32.gmra.mxu2 %vm507_vm0, %v4802_v14  ;;  %v1814_v57 = vpop.f32.mrf.mxu3  ;;  %v4908_v35 = vld [vmem:[#allocation18_spill] sm:$0xff] }
 0x228   : > { %2826 = vmatmul.msk.f32.gmra.mxu0 %vm507_vm0, %v3810_v41 }
 0x229   : > { %v2098_v34 = vadd.f32 %v4234_v30, %v2062_v59 }
 0x22a   : > { %v2327_v3 = vpop.f32.mrf.mxu1  ;;  %v1656_v51 = vpop.f32.mrf.mxu2 }
 0x22b   : > { %v2328_v55 = vadd.f32 %v4196_v36, %v2327_v3  ;;  %v2130_v56 = vmax.f32 %v2098_v34, 0.0  ;;  %v1748_v54 = vadd.f32 %v1656_v51, %v4905_v47 }
 0x22c   : > { %2794 = vmatmul.msk.f32.gmra.mxu3 %vm507_vm0, %v4906_v37 }
 0x22d   : > { %2417 = vst.msk [vmem:[%s4207_s20 + $0x18] sm:$0xff] %vm2232_vm4, %v2328_v55  ;;  %2860 = vmatmul.msk.f32.gmra.mxu1 %vm2232_vm4, %v4902_v60  ;;  %v2162_v14 = vpack.c.bf16 %v2130_v56, %v2130_v56  ;;  %v1906_v41 = vadd.f32 %v1814_v57, %v1748_v54  ;;  %v1974_v40 = vpop.f32.mrf.mxu0  ;;  %v4909_v54 = vld [vmem:[#allocation19_spill] sm:$0xff] }
 0x22f   : > { %2195 = vst.msk [vmem:[%s4247_s28 + $0x4] sm:$0xf] %vm2193_vm5, %v2162_v14  ;;  %v2063_v50 = vadd.f32 %v1971_v45, %v1906_v41  ;;  %2761 = vmatmul.msk.f32.gmra.mxu2 %vm507_vm0, %v4907_v18  ;;  %v1817_v46 = vpop.f32.mrf.mxu3  ;;  %v4910_v41 = vld [vmem:[#allocation30_spill] sm:$0xff]  ;;  %v4911_v18 = vld [vmem:[#allocation23_spill] sm:$0xff] }
 0x230   : > { %2827 = vmatmul.msk.f32.gmra.mxu0 %vm507_vm0, %v3827_v32 }
 0x231   : > { %v2099_v17 = vadd.f32 %v4234_v30, %v2063_v50 }
 0x232   : > { %v2330_v21 = vpop.f32.mrf.mxu1  ;;  %v1659_v62 = vpop.f32.mrf.mxu2 }
 0x233   : > { %v2331_v60 = vadd.f32 %v4196_v36, %v2330_v21  ;;  %v2131_v13 = vmax.f32 %v2099_v17, 0.0  ;;  %v1749_v59 = vadd.f32 %v1659_v62, %v4908_v35 }
 0x234   : > { %2795 = vmatmul.msk.f32.gmra.mxu3 %vm507_vm0, %v4816_v12 }
 0x235   : > { %2418 = vst.msk [vmem:[%s4207_s20 + $0x20] sm:$0xff] %vm2232_vm4, %v2331_v60  ;;  %2861 = vmatmul.msk.f32.gmra.mxu1 %vm2232_vm4, %v4808_v28  ;;  %v2163_v45 = vpack.c.bf16 %v2131_v13, %v2131_v13  ;;  %v1907_v32 = vadd.f32 %v1817_v46, %v1749_v59  ;;  %v1977_v57 = vpop.f32.mrf.mxu0  ;;  %v4912_v13 = vld [vmem:[#allocation22_spill] sm:$0xff] }
 0x237   : > { %2196 = vst.msk [vmem:[%s4247_s28 + $0x8] sm:$0xf] %vm2193_vm5, %v2163_v45  ;;  %v2064_v34 = vadd.f32 %v1974_v40, %v1907_v32  ;;  %2762 = vmatmul.msk.f32.gmra.mxu2 %vm507_vm0, %v4810_v58  ;;  %v1820_v3 = vpop.f32.mrf.mxu3 }
 0x238   : > { %2828 = vmatmul.msk.f32.gmra.mxu0 %vm507_vm0, %v3844_v61 }
 0x239   : > { %v2100_v51 = vadd.f32 %v4234_v30, %v2064_v34 }
 0x23a   : > { %v2333_v55 = vpop.f32.mrf.mxu1  ;;  %v1662_v56 = vpop.f32.mrf.mxu2 }
 0x23b   : > { %v2334_v28 = vadd.f32 %v4196_v36, %v2333_v55  ;;  %v2132_v47 = vmax.f32 %v2100_v51, 0.0  ;;  %v1750_v14 = vadd.f32 %v1662_v56, %v4909_v54  ;;  %v4913_v56 = vld [vmem:[#allocation27_spill] sm:$0xff] }
 0x23c   : > { %2796 = vmatmul.msk.f32.gmra.mxu3 %vm507_vm0, %v4910_v41 }
 0x23d   : > { %2419 = vst.msk [vmem:[%s4207_s20 + $0x28] sm:$0xff] %vm2232_vm4, %v2334_v28  ;;  %2862 = vmatmul.msk.f32.gmra.mxu1 %vm2232_vm4, %v4906_v37  ;;  %v2164_v58 = vpack.c.bf16 %v2132_v47, %v2132_v47  ;;  %v1908_v61 = vadd.f32 %v1820_v3, %v1750_v14  ;;  %v1980_v40 = vpop.f32.mrf.mxu0  ;;  %v4914_v47 = vld [vmem:[#allocation39_spill] sm:$0xff] }
 0x23f   : > { %2197 = vst.msk [vmem:[%s4247_s28 + $0xc] sm:$0xf] %vm2193_vm5, %v2164_v58  ;;  %v2065_v50 = vadd.f32 %v1977_v57, %v1908_v61  ;;  %2763 = vmatmul.msk.f32.gmra.mxu2 %vm507_vm0, %v4911_v18  ;;  %v1823_v46 = vpop.f32.mrf.mxu3  ;;  %v4915_v58 = vld [vmem:[#allocation32_spill] sm:$0xff] }
 0x240   : > { %2829 = vmatmul.msk.f32.gmra.mxu0 %vm507_vm0, %v3861_v7 }
 0x241   : > { %v2101_v17 = vadd.f32 %v4234_v30, %v2065_v50 }
 0x242   : > { %v2336_v21 = vpop.f32.mrf.mxu1  ;;  %v1665_v62 = vpop.f32.mrf.mxu2 }
 0x243   : > { %v2337_v37 = vadd.f32 %v4196_v36, %v2336_v21  ;;  %v2133_v60 = vmax.f32 %v2101_v17, 0.0  ;;  %v1751_v35 = vadd.f32 %v1665_v62, %v4912_v13  ;;  %v4916_v17 = vld [vmem:[#allocation28_spill] sm:$0xff] }
 0x244   : > { %2797 = vmatmul.msk.f32.gmra.mxu3 %vm507_vm0, %v4824_v24 }
 0x245   : > { %2420 = vst.msk [vmem:[%s4207_s20 + $0x30] sm:$0xff] %vm2232_vm4, %v2337_v37  ;;  %2863 = vmatmul.msk.f32.gmra.mxu1 %vm2232_vm4, %v4816_v12  ;;  %v2165_v59 = vpack.c.bf16 %v2133_v60, %v2133_v60  ;;  %v1909_v7 = vadd.f32 %v1823_v46, %v1751_v35  ;;  %v1983_v45 = vpop.f32.mrf.mxu0 }
 0x247   : > { %2198 = vst.msk [vmem:[%s4247_s28 + $0x10] sm:$0xf] %vm2193_vm5, %v2165_v59  ;;  %v2066_v32 = vadd.f32 %v1980_v40, %v1909_v7  ;;  %2764 = vmatmul.msk.f32.gmra.mxu2 %vm507_vm0, %v4818_v22  ;;  %v1826_v57 = vpop.f32.mrf.mxu3 }
 0x248   : > { %2830 = vmatmul.msk.f32.gmra.mxu0 %vm507_vm0, %v3878_v27 }
 0x249   : > { %v2102_v34 = vadd.f32 %v4234_v30, %v2066_v32  ;;  %v4917_v32 = vld [vmem:[#allocation31_spill] sm:$0xff] }
 0x24a   : > { %v2339_v3 = vpop.f32.mrf.mxu1  ;;  %v1668_v51 = vpop.f32.mrf.mxu2 }
 0x24b   : > { %v2340_v12 = vadd.f32 %v4196_v36, %v2339_v3  ;;  %v2134_v55 = vmax.f32 %v2102_v34, 0.0  ;;  %v1752_v28 = vadd.f32 %v1668_v51, %v4913_v56  ;;  %v4918_v34 = vld [vmem:[#allocation48_spill] sm:$0xff] }
 0x24c   : > { %2798 = vmatmul.msk.f32.gmra.mxu3 %vm507_vm0, %v4914_v47 }
 0x24d   : > { %2421 = vst.msk [vmem:[%s4207_s20 + $0x38] sm:$0xff] %vm2232_vm4, %v2340_v12  ;;  %2864 = vmatmul.msk.f32.gmra.mxu1 %vm2232_vm4, %v4910_v41  ;;  %v2166_v22 = vpack.c.bf16 %v2134_v55, %v2134_v55  ;;  %v1910_v27 = vadd.f32 %v1826_v57, %v1752_v28  ;;  %v1986_v54 = vpop.f32.mrf.mxu0  ;;  %v4919_v12 = vld [vmem:[#allocation41_spill] sm:$0xff] }
 0x24f   : > { %2199 = vst.msk [vmem:[%s4247_s28 + $0x14] sm:$0xf] %vm2193_vm5, %v2166_v22  ;;  %v2067_v14 = vadd.f32 %v1983_v45, %v1910_v27  ;;  %2765 = vmatmul.msk.f32.gmra.mxu2 %vm507_vm0, %v4915_v58  ;;  %v1829_v61 = vpop.f32.mrf.mxu3 }
 0x250   : > { %2831 = vmatmul.msk.f32.gmra.mxu0 %vm507_vm0, %v3895_v49 }
 0x251   : > { %v2103_v40 = vadd.f32 %v4234_v30, %v2067_v14 }
 0x252   : > { %v2342_v50 = vpop.f32.mrf.mxu1  ;;  %v1671_v18 = vpop.f32.mrf.mxu2 }
 0x253   : > { %v2343_v41 = vadd.f32 %v4196_v36, %v2342_v50  ;;  %v2135_v46 = vmax.f32 %v2103_v40, 0.0  ;;  %v1753_v21 = vadd.f32 %v1671_v18, %v4916_v17 }
 0x254   : > { %2799 = vmatmul.msk.f32.gmra.mxu3 %vm507_vm0, %v4832_v6 }
 0x255   : > { %2422 = vst.msk [vmem:[%s4207_s20 + $0x40] sm:$0xff] %vm2232_vm4, %v2343_v41  ;;  %2865 = vmatmul.msk.f32.gmra.mxu1 %vm2232_vm4, %v4824_v24  ;;  %v2167_v62 = vpack.c.bf16 %v2135_v46, %v2135_v46  ;;  %v1911_v49 = vadd.f32 %v1829_v61, %v1753_v21  ;;  %v1989_v37 = vpop.f32.mrf.mxu0  ;;  %v4921_v21 = vld [vmem:[#allocation37_spill] sm:$0xff] }
 0x257   : > { %2200 = vst.msk [vmem:[%s4247_s28 + $0x18] sm:$0xf] %vm2193_vm5, %v2167_v62  ;;  %v2068_v60 = vadd.f32 %v1986_v54, %v1911_v49  ;;  %2766 = vmatmul.msk.f32.gmra.mxu2 %vm507_vm0, %v4826_v5  ;;  %v1832_v13 = vpop.f32.mrf.mxu3  ;;  %v4920_v54 = vld [vmem:[#allocation36_spill] sm:$0xff] }
 0x258   : > { %2832 = vmatmul.msk.f32.gmra.mxu0 %vm507_vm0, %v3912_v33 }
 0x259   : > { %v2104_v35 = vadd.f32 %v4234_v30, %v2068_v60  ;;  %v4922_v60 = vld [vmem:[#allocation50_spill] sm:$0xff] }
 0x25a   : > { %v2345_v59 = vpop.f32.mrf.mxu1  ;;  %v1674_v7 = vpop.f32.mrf.mxu2 }
 0x25b   : > { %v2346_v24 = vadd.f32 %v4196_v36, %v2345_v59  ;;  %v2136_v45 = vmax.f32 %v2104_v35, 0.0  ;;  %v1754_v57 = vadd.f32 %v1674_v7, %v4917_v32  ;;  %v4923_v32 = vld [vmem:[#allocation40_spill] sm:$0xff] }
 0x25c   : > { %2800 = vmatmul.msk.f32.gmra.mxu3 %vm507_vm0, %v4918_v34 }
 0x25d   : > { %2423 = vst.msk [vmem:[%s4207_s20 + $0x48] sm:$0xff] %vm2232_vm4, %v2346_v24  ;;  %2866 = vmatmul.msk.f32.gmra.mxu1 %vm2232_vm4, %v4914_v47  ;;  %v2168_v5 = vpack.c.bf16 %v2136_v45, %v2136_v45  ;;  %v1912_v33 = vadd.f32 %v1832_v13, %v1754_v57  ;;  %v1992_v3 = vpop.f32.mrf.mxu0 }
 0x25f   : > { %2201 = vst.msk [vmem:[%s4247_s28 + $0x1c] sm:$0xf] %vm2193_vm5, %v2168_v5  ;;  %v2069_v51 = vadd.f32 %v1989_v37, %v1912_v33  ;;  %2767 = vmatmul.msk.f32.gmra.mxu2 %vm507_vm0, %v4919_v12  ;;  %v1835_v55 = vpop.f32.mrf.mxu3  ;;  %v316_v33 = vld [vmem:[%s3006_s10 + $0xcc] sm:$0xff]  }
 0x260   : > { %2833 = vmatmul.msk.f32.gmra.mxu0 %vm507_vm0, %v3929_v42 }
 0x261   : > { %v2105_v56 = vadd.f32 %v4234_v30, %v2069_v51  ;;  %v4924_v51 = vld [vmem:[#allocation45_spill] sm:$0xff] }
 0x262   : > { %v2348_v28 = vpop.f32.mrf.mxu1  ;;  %v1677_v22 = vpop.f32.mrf.mxu2 }
 0x263   : > { %v2349_v47 = vadd.f32 %v4196_v36, %v2348_v28  ;;  %v2137_v27 = vmax.f32 %v2105_v56, 0.0  ;;  %v1755_v14 = vadd.f32 %v1677_v22, %v4920_v54  ;;  %v370_v56 = vunpack.c.l.bf16 %v316_v33 }
 0x264   : > { %2801 = vmatmul.msk.f32.gmra.mxu3 %vm507_vm0, %v4840_v38  ;;  %v371_v28 = vunpack.c.h.bf16 %v316_v33 }
 0x265   : > { %2424 = vst.msk [vmem:[%s4207_s20 + $0x50] sm:$0xff] %vm2232_vm4, %v2349_v47  ;;  %2867 = vmatmul.msk.f32.gmra.mxu1 %vm2232_vm4, %v4832_v6  ;;  %v2169_v58 = vpack.c.bf16 %v2137_v27, %v2137_v27  ;;  %v1913_v42 = vadd.f32 %v1835_v55, %v1755_v14  ;;  %v1995_v61 = vpop.f32.mrf.mxu0  ;;  %v4925_v55 = vld [vmem:[#allocation49_spill] sm:$0xff]  ;;  %v4926_v14 = vld [vmem:[#allocation46_spill] sm:$0xff] }
 0x267   : > { %2202 = vst.msk [vmem:[%s4247_s28 + $0x20] sm:$0xf] %vm2193_vm5, %v2169_v58  ;;  %v2070_v40 = vadd.f32 %v1992_v3, %v1913_v42  ;;  %2768 = vmatmul.msk.f32.gmra.mxu2 %vm507_vm0, %v4834_v4  ;;  %v1838_v50 = vpop.f32.mrf.mxu3  ;;  %v1779_v42 = vrot.slane %v370_v56, 1 }
 0x268   : > { %2834 = vmatmul.msk.f32.gmra.mxu0 %vm507_vm0, %v3946_v52 }
 0x269   : > { %v2106_v18 = vadd.f32 %v4234_v30, %v2070_v40 }
 0x26a   : > { %v2351_v41 = vpop.f32.mrf.mxu1  ;;  %v1680_v46 = vpop.f32.mrf.mxu2 }
 0x26b   : > { %v2352_v6 = vadd.f32 %v4196_v36, %v2351_v41  ;;  %v2138_v17 = vmax.f32 %v2106_v18, 0.0  ;;  %v1756_v62 = vadd.f32 %v1680_v46, %v4921_v21  ;;  %v318_v41 = vld [vmem:[%s3006_s10 + $0xd4] sm:$0x1] }
 0x26c   : > { %2802 = vmatmul.msk.f32.gmra.mxu3 %vm507_vm0, %v4843_v2 }
 0x26d   : > { %2425 = vst.msk [vmem:[%s4207_s20 + $0x58] sm:$0xff] %vm2232_vm4, %v2352_v6  ;;  %2868 = vmatmul.msk.f32.gmra.mxu1 %vm2232_vm4, %v4918_v34  ;;  %v2170_v4 = vpack.c.bf16 %v2138_v17, %v2138_v17  ;;  %v1914_v52 = vadd.f32 %v1838_v50, %v1756_v62  ;;  %v1998_v49 = vpop.f32.mrf.mxu0  ;;  %v1936_v62 = vrot.slane %v370_v56, 2 }
 0x26f   : > { %2203 = vst.msk [vmem:[%s4247_s28 + $0x24] sm:$0xf] %vm2193_vm5, %v2170_v4  ;;  %v2071_v37 = vadd.f32 %v1995_v61, %v1914_v52  ;;  %2769 = vmatmul.msk.f32.gmra.mxu2 %vm507_vm0, %v4922_v60  ;;  %v1841_v13 = vpop.f32.mrf.mxu3  ;;  %v1780_v61 = vrot.slane %v371_v28, 1  ;;  %v1937_v4 = vrot.slane %v371_v28, 2 }
 0x270   : > { %2835 = vmatmul.msk.f32.gmra.mxu0 %vm507_vm0, %v3964_v9 }
 0x271   : > { %v2107_v35 = vadd.f32 %v4234_v30, %v2071_v37  ;;  %v1781_v17 = vsel %vm423_vm1, %v1779_v42, %v1780_v61 }
 0x272   : > { %v2354_v59 = vpop.f32.mrf.mxu1  ;;  %v1683_v7 = vpop.f32.mrf.mxu2 }
 0x273   : > { %v2355_v24 = vadd.f32 %v4196_v36, %v2354_v59  ;;  %v2139_v45 = vmax.f32 %v2107_v35, 0.0  ;;  %v1757_v57 = vadd.f32 %v1683_v7, %v4923_v32  ;;  %v1938_v7 = vsel %vm862_vm3, %v1936_v62, %v1937_v4 }
 0x274   : > { %2803 = vmatmul.msk.f32.gmra.mxu3 %vm507_vm0, %v3995_v26 }
 0x275   : > { %2426 = vst.msk [vmem:[%s4207_s20 + $0x60] sm:$0xff] %vm2232_vm4, %v2355_v24  ;;  %2869 = vmatmul.msk.f32.gmra.mxu1 %vm2232_vm4, %v4840_v38  ;;  %v2171_v34 = vpack.c.bf16 %v2139_v45, %v2139_v45  ;;  %v1915_v5 = vadd.f32 %v1841_v13, %v1757_v57  ;;  %v2001_v9 = vpop.f32.mrf.mxu0 }
 0x277   : > { %2204 = vst.msk [vmem:[%s4247_s28 + $0x28] sm:$0xf] %vm2193_vm5, %v2171_v34  ;;  %v2072_v3 = vadd.f32 %v1998_v49, %v1915_v5  ;;  %2770 = vmatmul.msk.f32.gmra.mxu2 %vm507_vm0, %v4924_v51  ;;  %v1844_v12 = vpop.f32.mrf.mxu3 }
 0x278   : > { %2836 = vmatmul.msk.f32.gmra.mxu0 %vm507_vm0, %v4925_v55 }
 0x279   : > { %v2108_v38 = vadd.f32 %v4234_v30, %v2072_v3 }
 0x27a   : > { %v2357_v22 = vpop.f32.mrf.mxu1  ;;  %v1686_v47 = vpop.f32.mrf.mxu2 }
 0x27b   : > { %v2358_v27 = vadd.f32 %v4196_v36, %v2357_v22  ;;  %v2140_v54 = vmax.f32 %v2108_v38, 0.0  ;;  %v1758_v58 = vadd.f32 %v1686_v47, %v4926_v14 }
 0x27c   : > { %2804 = vmatmul.msk.f32.gmra.mxu3 %vm507_vm0, %v4013_v43 }
 0x27d   : > { %2427 = vst.msk [vmem:[%s4207_s20 + $0x68] sm:$0xff] %vm2232_vm4, %v2358_v27  ;;  %2870 = vmatmul.msk.f32.gmra.mxu1 %vm2232_vm4, %v4843_v2  ;;  %v2172_v40 = vpack.c.bf16 %v2140_v54, %v2140_v54  ;;  %v1916_v50 = vadd.f32 %v1844_v12, %v1758_v58  ;;  %v2004_v18 = vpop.f32.mrf.mxu0  ;;  %v372_v2 = vunpack.c.l.bf16 %v318_v41 }
 0x27f   : > { %2205 = vst.msk [vmem:[%s4247_s28 + $0x2c] sm:$0xf] %vm2193_vm5, %v2172_v40  ;;  %v2073_v46 = vadd.f32 %v2001_v9, %v1916_v50  ;;  %2771 = vmatmul.msk.f32.gmra.mxu2 %vm507_vm0, %v3968_v53  ;;  %v1847_v6 = vpop.f32.mrf.mxu3  ;;  %v1782_v59 = vrot.slane %v372_v2, 1  ;;  %v1939_v32 = vrot.slane %v372_v2, 2 }
 0x280   : > { %2837 = vmatmul.msk.f32.gmra.mxu0 %vm507_vm0, %v4006_v39 }
 0x281   : > { %v2109_v21 = vadd.f32 %v4234_v30, %v2073_v46  ;;  %v1940_v55 = vsel %vm862_vm3, %v1937_v4, %v1939_v32 }
 0x282   : > { %v2360_v52 = vpop.f32.mrf.mxu1  ;;  %v1689_v49 = vpop.f32.mrf.mxu2 }
 0x283   : > { %v2361_v37 = vadd.f32 %v4196_v36, %v2360_v52  ;;  %v2141_v60 = vmax.f32 %v2109_v21, 0.0  ;;  %v1759_v13 = vadd.f32 %v1689_v49, %v4003_v25 }
 0x284   : > { %2805 = vmatmul.msk.f32.gmra.mxu3 %vm507_vm0, %v1781_v17 }
 0x285   : > { %2428 = vst.msk [vmem:[%s4207_s20 + $0x70] sm:$0xff] %vm2232_vm4, %v2361_v37  ;;  %2871 = vmatmul.msk.f32.gmra.mxu1 %vm2232_vm4, %v3995_v26  ;;  %v2173_v53 = vpack.c.bf16 %v2141_v60, %v2141_v60  ;;  %v1917_v39 = vadd.f32 %v1847_v6, %v1759_v13  ;;  %v2007_v35 = vpop.f32.mrf.mxu0  ;;  %v1783_v26 = vsel %vm423_vm1, %v1780_v61, %v1782_v59 }
 0x287   : > { %2206 = vst.msk [vmem:[%s4247_s28 + $0x30] sm:$0xf] %vm2193_vm5, %v2173_v53  ;;  %v2074_v24 = vadd.f32 %v2004_v18, %v1917_v39  ;;  %2772 = vmatmul.msk.f32.gmra.mxu2 %vm507_vm0, %v370_v56  ;;  %v1850_v25 = vpop.f32.mrf.mxu3 }
 0x288   : > { %2838 = vmatmul.msk.f32.gmra.mxu0 %vm507_vm0, %v1938_v7 }
 0x289   : > { %v2110_v45 = vadd.f32 %v4234_v30, %v2074_v24 }
 0x28a   : > { %v2363_v57 = vpop.f32.mrf.mxu1  ;;  %v1692_v34 = vpop.f32.mrf.mxu2 }
 0x28b   : > { %v2364_v5 = vadd.f32 %v4196_v36, %v2363_v57  ;;  %v2142_v9 = vmax.f32 %v2110_v45, 0.0  ;;  %v1760_v33 = vadd.f32 %v1692_v34, %v4021_v31 }
 0x28c   : > { %2806 = vmatmul.msk.f32.gmra.mxu3 %vm507_vm0, %v1783_v26 }
 0x28d   : > { %2429 = vst.msk [vmem:[%s4207_s20 + $0x78] sm:$0xff] %vm2232_vm4, %v2364_v5  ;;  %2872 = vmatmul.msk.f32.gmra.mxu1 %vm2232_vm4, %v4013_v43  ;;  %v2174_v3 = vpack.c.bf16 %v2142_v9, %v2142_v9  ;;  %v1918_v51 = vadd.f32 %v1850_v25, %v1760_v33  ;;  %v2010_v12 = vpop.f32.mrf.mxu0 }
 0x28f   : > { %2207 = vst.msk [vmem:[%s4247_s28 + $0x34] sm:$0xf] %vm2193_vm5, %v2174_v3  ;;  %v2075_v56 = vadd.f32 %v2007_v35, %v1918_v51  ;;  %2773 = vmatmul.msk.f32.gmra.mxu2 %vm507_vm0, %v371_v28  ;;  %v1853_v31 = vpop.f32.mrf.mxu3 }
 0x290   : > { %2839 = vmatmul.msk.f32.gmra.mxu0 %vm507_vm0, %v1940_v55 }
 0x291   : > { %v2111_v38 = vadd.f32 %v4234_v30, %v2075_v56 }
 0x292   : > { %v2366_v22 = vpop.f32.mrf.mxu1  ;;  %v1695_v47 = vpop.f32.mrf.mxu2 }
 0x293   : > { %v2367_v43 = vadd.f32 %v4196_v36, %v2366_v22  ;;  %v2143_v27 = vmax.f32 %v2111_v38, 0.0  ;;  %v1761_v54 = vadd.f32 %v1695_v47, %v4031_v29 }
 0x295   : > { %2430 = vst.msk [vmem:[%s4207_s20 + $0x80] sm:$0xff] %vm2232_vm4, %v2367_v43  ;;  %v2175_v14 = vpack.c.bf16 %v2143_v27, %v2143_v27  ;;  %v1919_v58 = vadd.f32 %v1853_v31, %v1761_v54  ;;  %v2013_v42 = vpop.f32.mrf.mxu0 }
 0x297   : > { %2208 = vst.msk [vmem:[%s4247_s28 + $0x38] sm:$0xf] %vm2193_vm5, %v2175_v14  ;;  %v2076_v28 = vadd.f32 %v2010_v12, %v1919_v58  ;;  %v1856_v61 = vpop.f32.mrf.mxu3 }
 0x299   : > { %v2112_v40 = vadd.f32 %v4234_v30, %v2076_v28 }
 0x29a   : > { %v2369_v50 = vpop.f32.mrf.mxu1  ;;  %v1698_v18 = vpop.f32.mrf.mxu2 }
 0x29b   : > { %v2370_v41 = vadd.f32 %v4196_v36, %v2369_v50  ;;  %v2144_v46 = vmax.f32 %v2112_v40, 0.0  ;;  %v1762_v29 = vadd.f32 %v1698_v18, %v4042_v23 }
 0x29d   : > { %2431 = vst.msk [vmem:[%s4207_s20 + $0x88] sm:$0xff] %vm2232_vm4, %v2370_v41  ;;  %v2176_v6 = vpack.c.bf16 %v2144_v46, %v2144_v46  ;;  %v1920_v17 = vadd.f32 %v1856_v61, %v1762_v29  ;;  %v2016_v21 = vpop.f32.mrf.mxu0 }
 0x29f   : > { %2209 = vst.msk [vmem:[%s4247_s28 + $0x3c] sm:$0xf] %vm2193_vm5, %v2176_v6  ;;  %v2077_v2 = vadd.f32 %v2013_v42, %v1920_v17  ;;  %v1859_v62 = vpop.f32.mrf.mxu3 }
 0x2a1   : > { %v2113_v4 = vadd.f32 %v4234_v30, %v2077_v2 }
 0x2a2   : > { %v2372_v52 = vpop.f32.mrf.mxu1  ;;  %v1701_v49 = vpop.f32.mrf.mxu2 }
 0x2a3   : > { %v2373_v37 = vadd.f32 %v4196_v36, %v2372_v52  ;;  %v2145_v60 = vmax.f32 %v2113_v4, 0.0  ;;  %v1763_v23 = vadd.f32 %v1701_v49, %v4053_v20 }
 0x2a5   : > { %2432 = vst.msk [vmem:[%s4207_s20 + $0x90] sm:$0xff] %vm2232_vm4, %v2373_v37  ;;  %v2177_v13 = vpack.c.bf16 %v2145_v60, %v2145_v60  ;;  %v1921_v53 = vadd.f32 %v1859_v62, %v1763_v23  ;;  %v2019_v39 = vpop.f32.mrf.mxu0 }
 0x2a7   : > { %2210 = vst.msk [vmem:[%s4247_s28 + $0x40] sm:$0xf] %vm2193_vm5, %v2177_v13  ;;  %v2078_v35 = vadd.f32 %v2016_v21, %v1921_v53  ;;  %v1862_v59 = vpop.f32.mrf.mxu3 }
 0x2a9   : > { %v2114_v7 = vadd.f32 %v4234_v30, %v2078_v35 }
 0x2aa   : > { %v2375_v24 = vpop.f32.mrf.mxu1  ;;  %v1704_v25 = vpop.f32.mrf.mxu2 }
 0x2ab   : > { %v2376_v45 = vadd.f32 %v4196_v36, %v2375_v24  ;;  %v2146_v26 = vmax.f32 %v2114_v7, 0.0  ;;  %v1764_v20 = vadd.f32 %v1704_v25, %v4064_v11 }
 0x2ad   : > { %2433 = vst.msk [vmem:[%s4207_s20 + $0x98] sm:$0xff] %vm2232_vm4, %v2376_v45  ;;  %v2178_v32 = vpack.c.bf16 %v2146_v26, %v2146_v26  ;;  %v1922_v57 = vadd.f32 %v1862_v59, %v1764_v20  ;;  %v2022_v34 = vpop.f32.mrf.mxu0 }
 0x2af   : > { %2211 = vst.msk [vmem:[%s4247_s28 + $0x44] sm:$0xf] %vm2193_vm5, %v2178_v32  ;;  %v2079_v5 = vadd.f32 %v2019_v39, %v1922_v57  ;;  %v1865_v9 = vpop.f32.mrf.mxu3 }
 0x2b1   : > { %v2115_v33 = vadd.f32 %v4234_v30, %v2079_v5 }
 0x2b2   : > { %v2378_v3 = vpop.f32.mrf.mxu1  ;;  %v1707_v51 = vpop.f32.mrf.mxu2 }
 0x2b3   : > { %v2379_v12 = vadd.f32 %v4196_v36, %v2378_v3  ;;  %v2147_v55 = vmax.f32 %v2115_v33, 0.0  ;;  %v1765_v11 = vadd.f32 %v1707_v51, %v4075_v48 }
 0x2b5   : > { %2434 = vst.msk [vmem:[%s4207_s20 + $0xa0] sm:$0xff] %vm2232_vm4, %v2379_v12  ;;  %v2179_v56 = vpack.c.bf16 %v2147_v55, %v2147_v55  ;;  %v1923_v31 = vadd.f32 %v1865_v9, %v1765_v11  ;;  %v2025_v38 = vpop.f32.mrf.mxu0  ;;  %v4927_v55 = vld [vmem:[#allocation54_spill] sm:$0xff] }
 0x2b7   : > { %2212 = vst.msk [vmem:[%s4247_s28 + $0x48] sm:$0xf] %vm2193_vm5, %v2179_v56  ;;  %v2080_v22 = vadd.f32 %v2022_v34, %v1923_v31  ;;  %v1868_v47 = vpop.f32.mrf.mxu3 }
 0x2b9   : > { %v2116_v43 = vadd.f32 %v4234_v30, %v2080_v22 }
 0x2ba   : > { %v2381_v27 = vpop.f32.mrf.mxu1  ;;  %v1710_v54 = vpop.f32.mrf.mxu2 }
 0x2bb   : > { %v2382_v14 = vadd.f32 %v4196_v36, %v2381_v27  ;;  %v2148_v58 = vmax.f32 %v2116_v43, 0.0  ;;  %v1766_v48 = vadd.f32 %v1710_v54, %v4086_v63 }
 0x2bd   : > { %2435 = vst.msk [vmem:[%s4207_s20 + $0xa8] sm:$0xff] %vm2232_vm4, %v2382_v14  ;;  %v2180_v42 = vpack.c.bf16 %v2148_v58, %v2148_v58  ;;  %v1924_v28 = vadd.f32 %v1868_v47, %v1766_v48  ;;  %v2028_v61 = vpop.f32.mrf.mxu0  ;;  %v4928_v58 = vld [vmem:[#allocation55_spill] sm:$0xff] }
 0x2bf   : > { %2213 = vst.msk [vmem:[%s4247_s28 + $0x4c] sm:$0xf] %vm2193_vm5, %v2180_v42  ;;  %v2081_v40 = vadd.f32 %v2025_v38, %v1924_v28  ;;  %v1871_v50 = vpop.f32.mrf.mxu3 }
 0x2c1   : > { %v2117_v18 = vadd.f32 %v4234_v30, %v2081_v40 }
 0x2c2   : > { %v2384_v41 = vpop.f32.mrf.mxu1  ;;  %v1713_v46 = vpop.f32.mrf.mxu2 }
 0x2c3   : > { %v2385_v29 = vadd.f32 %v4196_v36, %v2384_v41  ;;  %v2149_v6 = vmax.f32 %v2117_v18, 0.0  ;;  %v1767_v63 = vadd.f32 %v1713_v46, %v4097_v8 }
 0x2c5   : > { %2436 = vst.msk [vmem:[%s4207_s20 + $0xb0] sm:$0xff] %vm2232_vm4, %v2385_v29  ;;  %v2181_v17 = vpack.c.bf16 %v2149_v6, %v2149_v6  ;;  %v1925_v21 = vadd.f32 %v1871_v50, %v1767_v63  ;;  %v2031_v2 = vpop.f32.mrf.mxu0  ;;  %v4929_v63 = vld [vmem:[#allocation57_spill] sm:$0xff] }
 0x2c7   : > { %2214 = vst.msk [vmem:[%s4247_s28 + $0x50] sm:$0xf] %vm2193_vm5, %v2181_v17  ;;  %v2082_v62 = vadd.f32 %v2028_v61, %v1925_v21  ;;  %v1874_v4 = vpop.f32.mrf.mxu3 }
 0x2c9   : > { %v2118_v52 = vadd.f32 %v4234_v30, %v2082_v62 }
 0x2ca   : > { %v2387_v49 = vpop.f32.mrf.mxu1  ;;  %v1716_v37 = vpop.f32.mrf.mxu2 }
 0x2cb   : > { %v2388_v60 = vadd.f32 %v4196_v36, %v2387_v49  ;;  %v2150_v23 = vmax.f32 %v2118_v52, 0.0  ;;  %v1768_v8 = vadd.f32 %v1716_v37, %v4108_v44 }
 0x2cd   : > { %2437 = vst.msk [vmem:[%s4207_s20 + $0xb8] sm:$0xff] %vm2232_vm4, %v2388_v60  ;;  %v2182_v13 = vpack.c.bf16 %v2150_v23, %v2150_v23  ;;  %v1926_v53 = vadd.f32 %v1874_v4, %v1768_v8  ;;  %v2034_v39 = vpop.f32.mrf.mxu0 }
 0x2cf   : > { %2215 = vst.msk [vmem:[%s4247_s28 + $0x54] sm:$0xf] %vm2193_vm5, %v2182_v13  ;;  %v2083_v35 = vadd.f32 %v2031_v2, %v1926_v53  ;;  %v1877_v59 = vpop.f32.mrf.mxu3 }
 0x2d1   : > { %v2119_v7 = vadd.f32 %v4234_v30, %v2083_v35 }
 0x2d2   : > { %v2390_v24 = vpop.f32.mrf.mxu1  ;;  %v1719_v25 = vpop.f32.mrf.mxu2 }
 0x2d3   : > { %v2391_v45 = vadd.f32 %v4196_v36, %v2390_v24  ;;  %v2151_v26 = vmax.f32 %v2119_v7, 0.0  ;;  %v1769_v44 = vadd.f32 %v1719_v25, %v4119_v19 }
 0x2d5   : > { %2438 = vst.msk [vmem:[%s4207_s20 + $0xc0] sm:$0xff] %vm2232_vm4, %v2391_v45  ;;  %v2183_v20 = vpack.c.bf16 %v2151_v26, %v2151_v26  ;;  %v1927_v32 = vadd.f32 %v1877_v59, %v1769_v44  ;;  %v2037_v57 = vpop.f32.mrf.mxu0 }
 0x2d7   : > { %2216 = vst.msk [vmem:[%s4247_s28 + $0x58] sm:$0xf] %vm2193_vm5, %v2183_v20  ;;  %v2084_v34 = vadd.f32 %v2034_v39, %v1927_v32  ;;  %v1880_v5 = vpop.f32.mrf.mxu3 }
 0x2d9   : > { %v2120_v9 = vadd.f32 %v4234_v30, %v2084_v34 }
 0x2da   : > { %v2393_v33 = vpop.f32.mrf.mxu1  ;;  %v1722_v3 = vpop.f32.mrf.mxu2 }
 0x2db   : > { %v2394_v51 = vadd.f32 %v4196_v36, %v2393_v33  ;;  %v2152_v12 = vmax.f32 %v2120_v9, 0.0  ;;  %v1770_v19 = vadd.f32 %v1722_v3, %v4927_v55 }
 0x2dd   : > { %2439 = vst.msk [vmem:[%s4207_s20 + $0xc8] sm:$0xff] %vm2232_vm4, %v2394_v51  ;;  %v2184_v11 = vpack.c.bf16 %v2152_v12, %v2152_v12  ;;  %v1928_v56 = vadd.f32 %v1880_v5, %v1770_v19  ;;  %v2040_v31 = vpop.f32.mrf.mxu0 }
 0x2df   : > { %2217 = vst.msk [vmem:[%s4247_s28 + $0x5c] sm:$0xf] %vm2193_vm5, %v2184_v11  ;;  %v2085_v38 = vadd.f32 %v2037_v57, %v1928_v56  ;;  %v1883_v22 = vpop.f32.mrf.mxu3 }
 0x2e1   : > { %v2121_v47 = vadd.f32 %v4234_v30, %v2085_v38 }
 0x2e2   : > { %v2396_v43 = vpop.f32.mrf.mxu1  ;;  %v1725_v27 = vpop.f32.mrf.mxu2 }
 0x2e3   : > { %v2397_v54 = vadd.f32 %v4196_v36, %v2396_v43  ;;  %v2153_v14 = vmax.f32 %v2121_v47, 0.0  ;;  %v1771_v48 = vadd.f32 %v1725_v27, %v4928_v58 }
 0x2e5   : > { %2440 = vst.msk [vmem:[%s4207_s20 + $0xd0] sm:$0xff] %vm2232_vm4, %v2397_v54  ;;  %v2185_v42 = vpack.c.bf16 %v2153_v14, %v2153_v14  ;;  %v1929_v28 = vadd.f32 %v1883_v22, %v1771_v48  ;;  %v2043_v61 = vpop.f32.mrf.mxu0 }
 0x2e7   : > { %2218 = vst.msk [vmem:[%s4247_s28 + $0x60] sm:$0xf] %vm2193_vm5, %v2185_v42  ;;  %v2086_v40 = vadd.f32 %v2040_v31, %v1929_v28  ;;  %v1886_v50 = vpop.f32.mrf.mxu3 }
 0x2e9   : > { %v2122_v18 = vadd.f32 %v4234_v30, %v2086_v40 }
 0x2ea   : > { %v2399_v41 = vpop.f32.mrf.mxu1  ;;  %v1728_v46 = vpop.f32.mrf.mxu2 }
 0x2eb   : > { %v2400_v29 = vadd.f32 %v4196_v36, %v2399_v41  ;;  %v2154_v6 = vmax.f32 %v2122_v18, 0.0  ;;  %v1772_v17 = vadd.f32 %v1728_v46, %v4929_v63 }
 0x2ed   : > { %2441 = vst.msk [vmem:[%s4207_s20 + $0xd8] sm:$0xff] %vm2232_vm4, %v2400_v29  ;;  %v2186_v21 = vpack.c.bf16 %v2154_v6, %v2154_v6  ;;  %v1930_v2 = vadd.f32 %v1886_v50, %v1772_v17  ;;  %v2046_v62 = vpop.f32.mrf.mxu0 }
 0x2ef   : > { %2219 = vst.msk [vmem:[%s4247_s28 + $0x64] sm:$0xf] %vm2193_vm5, %v2186_v21  ;;  %v2087_v4 = vadd.f32 %v2043_v61, %v1930_v2  ;;  %v1889_v52 = vpop.f32.mrf.mxu3 }
 0x2f1   : > { %v2123_v49 = vadd.f32 %v4234_v30, %v2087_v4 }
 0x2f2   : > { %v2402_v37 = vpop.f32.mrf.mxu1  ;;  %v1731_v60 = vpop.f32.mrf.mxu2 }
 0x2f3   : > { %v2403_v23 = vadd.f32 %v4196_v36, %v2402_v37  ;;  %v2155_v8 = vmax.f32 %v2123_v49, 0.0  ;;  %v1773_v13 = vadd.f32 %v1731_v60, %v4163_v1 }
 0x2f5   : > { %2442 = vst.msk [vmem:[%s4207_s20 + $0xe0] sm:$0xff] %vm2232_vm4, %v2403_v23  ;;  %v2187_v53 = vpack.c.bf16 %v2155_v8, %v2155_v8  ;;  %v1931_v39 = vadd.f32 %v1889_v52, %v1773_v13  ;;  %v2049_v35 = vpop.f32.mrf.mxu0 }
 0x2f7   : > { %2220 = vst.msk [vmem:[%s4247_s28 + $0x68] sm:$0xf] %vm2193_vm5, %v2187_v53  ;;  %v2088_v59 = vadd.f32 %v2046_v62, %v1931_v39  ;;  %v1892_v7 = vpop.f32.mrf.mxu3 }
 0x2f9   : > { %v2124_v24 = vadd.f32 %v4234_v30, %v2088_v59 }
 0x2fa   : > { %v2405_v25 = vpop.f32.mrf.mxu1  ;;  %v1734_v45 = vpop.f32.mrf.mxu2 }
 0x2fb   : > { %v2406_v26 = vadd.f32 %v4196_v36, %v2405_v25  ;;  %v2156_v44 = vmax.f32 %v2124_v24, 0.0  ;;  %v1774_v1 = vadd.f32 %v1734_v45, %v4174_v10 }
 0x2fd   : > { %2443 = vst.msk [vmem:[%s4207_s20 + $0xe8] sm:$0xff] %vm2232_vm4, %v2406_v26  ;;  %v2188_v20 = vpack.c.bf16 %v2156_v44, %v2156_v44  ;;  %v1932_v32 = vadd.f32 %v1892_v7, %v1774_v1  ;;  %v2052_v5 = vpop.f32.mrf.mxu0 }
 0x2ff   : > { %2221 = vst.msk [vmem:[%s4247_s28 + $0x6c] sm:$0xf] %vm2193_vm5, %v2188_v20  ;;  %v2089_v57 = vadd.f32 %v2049_v35, %v1932_v32  ;;  %v1895_v34 = vpop.f32.mrf.mxu3 }
 0x301   : > { %v2125_v9 = vadd.f32 %v4234_v30, %v2089_v57 }
 0x302   : > { %v2408_v33 = vpop.f32.mrf.mxu1  ;;  %v1737_v3 = vpop.f32.mrf.mxu2 }
 0x303   : > { %v2409_v51 = vadd.f32 %v4196_v36, %v2408_v33  ;;  %v2157_v12 = vmax.f32 %v2125_v9, 0.0  ;;  %v1775_v10 = vadd.f32 %v1737_v3, %v4185_v15 }
 0x305   : > { %2444 = vst.msk [vmem:[%s4207_s20 + $0xf0] sm:$0xff] %vm2232_vm4, %v2409_v51  ;;  %v2189_v55 = vpack.c.bf16 %v2157_v12, %v2157_v12  ;;  %v1933_v19 = vadd.f32 %v1895_v34, %v1775_v10  ;;  %v2055_v47 = vpop.f32.mrf.mxu0 }
 0x307   : > { %2222 = vst.msk [vmem:[%s4247_s28 + $0x70] sm:$0xf] %vm2193_vm5, %v2189_v55  ;;  %v2090_v11 = vadd.f32 %v2052_v5, %v1933_v19  ;;  %v1898_v56 = vpop.f32.mrf.mxu3 }
 0x309   : > { %v2126_v31 = vadd.f32 %v4234_v30, %v2090_v11 }
 0x30a   : > { %v2411_v38 = vpop.f32.mrf.mxu1  ;;  %v1740_v22 = vpop.f32.mrf.mxu2 }
 0x30b   : > { %v2412_v43 = vadd.f32 %v4196_v36, %v2411_v38  ;;  %v2158_v27 = vmax.f32 %v2126_v31, 0.0  ;;  %v1776_v15 = vadd.f32 %v1740_v22, %v4202_v16 }
 0x30d   : > { %2445 = vst.msk [vmem:[%s4207_s20 + $0xf8] sm:$0xff] %vm2232_vm4, %v2412_v43  ;;  %v2190_v54 = vpack.c.bf16 %v2158_v27, %v2158_v27  ;;  %v1934_v14 = vadd.f32 %v1898_v56, %v1776_v15  ;;  %v2058_v36 = vpop.f32.mrf.mxu0 }
 0x30f   : > { %2223 = vst.msk [vmem:[%s4247_s28 + $0x74] sm:$0xf] %vm2193_vm5, %v2190_v54  ;;  %v2091_v58 = vadd.f32 %v2055_v47, %v1934_v14  ;;  %v1901_v28 = vpop.f32.mrf.mxu3 }
 0x311   : > { %v2127_v48 = vadd.f32 %v4234_v30, %v2091_v58 }
 0x312   : > { %v1743_v42 = vpop.f32.mrf.mxu2 }
 0x313   : > { %v2159_v61 = vmax.f32 %v2127_v48, 0.0  ;;  %v1777_v40 = vadd.f32 %v1743_v42, %v4221_v0 }
 0x315   : > { %v2191_v50 = vpack.c.bf16 %v2159_v61, %v2159_v61  ;;  %v1935_v18 = vadd.f32 %v1901_v28, %v1777_v40 }
 0x317   : > { %2224 = vst.msk [vmem:[%s4247_s28 + $0x78] sm:$0xf] %vm2193_vm5, %v2191_v50  ;;  %v2092_v16 = vadd.f32 %v2058_v36, %v1935_v18 }
 0x319   : > { %v2128_v41 = vadd.f32 %v4234_v30, %v2092_v16 }
 0x31b   : > { %v2160_v46 = vmax.f32 %v2128_v41, 0.0 }
 0x31d   : > { %v2192_v29 = vpack.c.bf16 %v2160_v46, %v2160_v46 }
 0x31f   : > { %2225 = vst.msk [vmem:[%s4247_s28 + $0x7c] sm:$0xf] %vm2193_vm5, %v2192_v29 }
 0x320 PF: > { %s17_s21 = sadd.s32 1, %s2940_s21  }
 0x321   : > { %p14_p4 = scmp.ge.s32.totalorder %s17_s21, 4  }
 0x323   :  { %16 = sbr.rel (!%p14_p4) target bundleno = 1 (0x1), region = 90 }

</bundles_post_ra>
